<compile_context>
chip_gen: v7x
topology: tpu7x:2x2x1
jax: 0.10.0
libtpu: 0.0.40
codegen_flags: <defaults>
</compile_context>

<pallas_src>
import jax
import jax.numpy as jnp
from jax import lax
from jax.experimental import pallas as pl
from jax.experimental.pallas import tpu as pltpu

_LN_EPS = 1e-5  # PyTorch nn.LayerNorm default


# ---------------------------------------------------------------------------
# Fused kernel
# ---------------------------------------------------------------------------
def _linear_relu_ln(x, w, b, g, beta):
    """y = LayerNorm(ReLU(x @ W + b)) over the last axis (f32 math)."""
    y = jnp.dot(x, w, preferred_element_type=jnp.float32)
    y = y + b.astype(jnp.float32)
    y = jnp.maximum(y, 0.0)
    mean = jnp.mean(y, axis=-1, keepdims=True)
    var = jnp.mean(y * y, axis=-1, keepdims=True) - mean * mean
    y_hat = (y - mean) * lax.rsqrt(var + _LN_EPS)
    return y_hat * g.astype(jnp.float32) + beta.astype(jnp.float32)


def _make_fused_kernel(repeat: int, has_shortcut: bool):
    """Builds the fused block kernel for a static (repeat, has_shortcut)."""

    def kernel(*refs):
        idx = 0
        x_ref = refs[idx]; idx += 1
        wi_ref, bi_ref, gi_ref, bti_ref = refs[idx:idx + 4]; idx += 4
        if repeat > 0:
            wh_ref, bh_ref, gh_ref, bth_ref = refs[idx:idx + 4]; idx += 4
        wo_ref, bo_ref, go_ref, bto_ref = refs[idx:idx + 4]; idx += 4
        if has_shortcut:
            ws_ref, bs_ref = refs[idx:idx + 2]; idx += 2
        o_ref = refs[idx]

        x = x_ref[...]  # native dtype -> MXU directly

        # ---- input layer ----
        x1 = _linear_relu_ln(x, wi_ref[...], bi_ref[...],
                             gi_ref[...], bti_ref[...])

        # ---- hidden layers (static unroll; weights resident in VMEM) ----
        for k in range(repeat):
            x1 = _linear_relu_ln(x1.astype(wh_ref.dtype), wh_ref[k],
                                 bh_ref[k], gh_ref[k], bth_ref[k])

        # ---- output layer ----
        x1 = _linear_relu_ln(x1.astype(wo_ref.dtype), wo_ref[...],
                             bo_ref[...], go_ref[...], bto_ref[...])

        # ---- shortcut + add + ReLU ----
        if has_shortcut:
            s = jnp.dot(x, ws_ref[...], preferred_element_type=jnp.float32)
            s = s + bs_ref[...].astype(jnp.float32)
        else:
            s = x.astype(jnp.float32)
        o_ref[...] = jnp.maximum(s + x1, 0.0).astype(o_ref.dtype)

    return kernel


# ---------------------------------------------------------------------------
# pallas_call wrapper: one fused call, batch-tiled grid
# ---------------------------------------------------------------------------
def _pick_batch_tile(B):
    for cand in (512, 256, 128, 64, 32, 16, 8):
        if cand <= B and B % cand == 0:
            return cand
    return B  # block == full batch (always legal)


@jax.jit
def res_linear_block_forward(params, x):
    B, IN_F = x.shape
    wi, bi, gi, bti = params["input"]
    H = wi.shape[1]
    wo, bo, go, bto = params["output"]
    OUT_F = wo.shape[1]
    repeat = len(params["hidden"])
    has_shortcut = params["shortcut"] is not None

    tb = _pick_batch_tile(B)
    grid = (B // tb,)

    def row_spec(f):
        return pl.BlockSpec((tb, f), lambda i: (i, 0))

    def whole_spec(shape):
        # block == full array: satisfies the (8,128) rule for any feature size
        return pl.BlockSpec(shape, lambda i, _n=len(shape): (0,) * _n)

    inputs = [x, wi, bi, gi, bti]
    in_specs = [row_spec(IN_F),
                whole_spec(wi.shape), whole_spec(bi.shape),
                whole_spec(gi.shape), whole_spec(bti.shape)]

    if repeat > 0:
        # Stack hidden-layer params so the kernel can index them statically.
        wh = jnp.stack([p[0] for p in params["hidden"]])      # (R, H, H)
        bh = jnp.stack([p[1] for p in params["hidden"]])      # (R, 1, H)
        gh = jnp.stack([p[2] for p in params["hidden"]])      # (R, 1, H)
        bth = jnp.stack([p[3] for p in params["hidden"]])     # (R, 1, H)
        inputs += [wh, bh, gh, bth]
        in_specs += [whole_spec(wh.shape), whole_spec(bh.shape),
                     whole_spec(gh.shape), whole_spec(bth.shape)]
        # TODO(synk): for very large hidden_features, stream Wh_k per layer via
        # pltpu.emit_pipeline / make_async_copy instead of keeping the whole
        # stack resident (v7x VMEM is 64 MiB).

    inputs += [wo, bo, go, bto]
    in_specs += [whole_spec(wo.shape), whole_spec(bo.shape),
                 whole_spec(go.shape), whole_spec(bto.shape)]

    if has_shortcut:
        ws, bs = params["shortcut"]
        inputs += [ws, bs]
        in_specs += [whole_spec(ws.shape), whole_spec(bs.shape)]

    kernel = _make_fused_kernel(repeat, has_shortcut)

    return pl.pallas_call(
        kernel,
        out_shape=jax.ShapeDtypeStruct((B, OUT_F), x.dtype),
        grid=grid,
        in_specs=in_specs,
        out_specs=row_spec(OUT_F),
        compiler_params=pltpu.CompilerParams(
            dimension_semantics=("parallel",),          # megacore: split batch
            vmem_limit_bytes=48 * 1024 * 1024,          # > default scoped limit,
        ),                                              # < v7x 64 MiB physical
    )(*inputs)


# ---------------------------------------------------------------------------
# Parameter construction (PyTorch-like shapes, deterministic)
# ---------------------------------------------------------------------------
def init_res_linear_block(key, in_features, out_features, hidden_features,
                          repeat=0, dtype=jnp.float32):
    def linear(k, fin, fout):
        kw, kb = jax.random.split(k)
        w = jax.random.normal(kw, (fin, fout), dtype) * (1.0 / jnp.sqrt(fin))
        b = jax.random.normal(kb, (1, fout), dtype) * 0.1
        return w, b

    def ln(fout):
        # PyTorch defaults: gamma=1, beta=0
        return jnp.ones((1, fout), dtype), jnp.zeros((1, fout), dtype)

    keys = jax.random.split(key, repeat + 3)
    params = {}
    params["input"] = (*linear(keys[0], in_features, hidden_features),
                       *ln(hidden_features))
    params["hidden"] = [
        (*linear(keys[1 + r], hidden_features, hidden_features),
         *ln(hidden_features))
        for r in range(repeat)
    ]
    params["output"] = (*linear(keys[repeat + 1], hidden_features, out_features),
                        *ln(out_features))
    if in_features != out_features:
        params["shortcut"] = linear(keys[repeat + 2], in_features, out_features)
    else:
        params["shortcut"] = None
    return params


# ---------------------------------------------------------------------------
# Pure-JAX reference (correctness check only)
# ---------------------------------------------------------------------------
def _ref_forward(params, x):
    def lrln(x, w, b, g, beta):
        y = jnp.maximum(x @ w + b, 0.0)
        mu = jnp.mean(y, axis=-1, keepdims=True)
        var = jnp.mean((y - mu) ** 2, axis=-1, keepdims=True)
        return (y - mu) / jnp.sqrt(var + _LN_EPS) * g + beta

    x1 = lrln(x, *params["input"])
    for p in params["hidden"]:
        x1 = lrln(x1, *p)
    x1 = lrln(x1, *params["output"])
    if params["shortcut"] is not None:
        ws, bs = params["shortcut"]
        s = x @ ws + bs
    else:
        s = x
    return jnp.maximum(s + x1, 0.0)


if __name__ == "__main__":
    # Small but lane-dense shapes consistent with the module's forward.
    # in != out -> the linear-shortcut path is exercised.
    B, IN_F, HID_F, OUT_F, REPEAT = 256, 64, 128, 128, 2

    key = jax.random.PRNGKey(0)
    kx, kp = jax.random.split(key)
    x = jax.random.normal(kx, (B, IN_F), jnp.float32)
    params = init_res_linear_block(kp, IN_F, OUT_F, HID_F, repeat=REPEAT)

    out = res_linear_block_forward(params, x)
    out = jax.block_until_ready(out)

    ref = _ref_forward(params, x)
    assert out.shape == (B, OUT_F)
    assert jnp.allclose(out, ref, atol=2e-4, rtol=2e-4), "mismatch vs reference"

    print("KERNEL_OK")
</pallas_src>

<mosaic_0001>
module attributes {stable_mosaic.version = 11 : i64} {
  func.func @kernel(%arg0: i32, %arg1: memref<256x64xf32, #tpu.memory_space<vmem>>, %arg2: memref<64x128xf32, #tpu.memory_space<vmem>>, %arg3: memref<1x128xf32, #tpu.memory_space<vmem>>, %arg4: memref<1x128xf32, #tpu.memory_space<vmem>>, %arg5: memref<1x128xf32, #tpu.memory_space<vmem>>, %arg6: memref<2x128x128xf32, #tpu.memory_space<vmem>>, %arg7: memref<2x1x128xf32, #tpu.memory_space<vmem>>, %arg8: memref<2x1x128xf32, #tpu.memory_space<vmem>>, %arg9: memref<2x1x128xf32, #tpu.memory_space<vmem>>, %arg10: memref<128x128xf32, #tpu.memory_space<vmem>>, %arg11: memref<1x128xf32, #tpu.memory_space<vmem>>, %arg12: memref<1x128xf32, #tpu.memory_space<vmem>>, %arg13: memref<1x128xf32, #tpu.memory_space<vmem>>, %arg14: memref<64x128xf32, #tpu.memory_space<vmem>>, %arg15: memref<1x128xf32, #tpu.memory_space<vmem>>, %arg16: memref<256x128xf32, #tpu.memory_space<vmem>>) attributes {dimension_semantics = [#tpu.dimension_semantics<parallel>], iteration_bounds = array<i64: 1>, scalar_prefetch = 0 : i64, scratch_operands = 0 : i64, tpu.core_type = #tpu.core_type<tc>, window_params = [{transform_indices = @transform_0, window_bounds = array<i64: 256, 64>}, {pipeline_mode = #tpu.pipeline_mode<synchronous>, transform_indices = @transform_1, window_bounds = array<i64: 64, 128>}, {pipeline_mode = #tpu.pipeline_mode<synchronous>, transform_indices = @transform_2, window_bounds = array<i64: 1, 128>}, {pipeline_mode = #tpu.pipeline_mode<synchronous>, transform_indices = @transform_3, window_bounds = array<i64: 1, 128>}, {pipeline_mode = #tpu.pipeline_mode<synchronous>, transform_indices = @transform_4, window_bounds = array<i64: 1, 128>}, {pipeline_mode = #tpu.pipeline_mode<synchronous>, transform_indices = @transform_5, window_bounds = array<i64: 2, 128, 128>}, {pipeline_mode = #tpu.pipeline_mode<synchronous>, transform_indices = @transform_6, window_bounds = array<i64: 2, 1, 128>}, {pipeline_mode = #tpu.pipeline_mode<synchronous>, transform_indices = @transform_7, window_bounds = array<i64: 2, 1, 128>}, {pipeline_mode = #tpu.pipeline_mode<synchronous>, transform_indices = @transform_8, window_bounds = array<i64: 2, 1, 128>}, {pipeline_mode = #tpu.pipeline_mode<synchronous>, transform_indices = @transform_9, window_bounds = array<i64: 128, 128>}, {pipeline_mode = #tpu.pipeline_mode<synchronous>, transform_indices = @transform_10, window_bounds = array<i64: 1, 128>}, {pipeline_mode = #tpu.pipeline_mode<synchronous>, transform_indices = @transform_11, window_bounds = array<i64: 1, 128>}, {pipeline_mode = #tpu.pipeline_mode<synchronous>, transform_indices = @transform_12, window_bounds = array<i64: 1, 128>}, {pipeline_mode = #tpu.pipeline_mode<synchronous>, transform_indices = @transform_13, window_bounds = array<i64: 64, 128>}, {pipeline_mode = #tpu.pipeline_mode<synchronous>, transform_indices = @transform_14, window_bounds = array<i64: 1, 128>}, {transform_indices = @transform_15, window_bounds = array<i64: 256, 128>}]} {
    %c0 = arith.constant 0 : index
    %c0_0 = arith.constant 0 : index
    %0 = vector.load %arg1[%c0, %c0_0] : memref<256x64xf32, #tpu.memory_space<vmem>>, vector<256x64xf32>
    %c0_1 = arith.constant 0 : index
    %c0_2 = arith.constant 0 : index
    %1 = vector.load %arg2[%c0_1, %c0_2] : memref<64x128xf32, #tpu.memory_space<vmem>>, vector<64x128xf32>
    %c0_3 = arith.constant 0 : index
    %c0_4 = arith.constant 0 : index
    %2 = vector.load %arg3[%c0_3, %c0_4] : memref<1x128xf32, #tpu.memory_space<vmem>>, vector<1x128xf32>
    %c0_5 = arith.constant 0 : index
    %c0_6 = arith.constant 0 : index
    %3 = vector.load %arg4[%c0_5, %c0_6] : memref<1x128xf32, #tpu.memory_space<vmem>>, vector<1x128xf32>
    %c0_7 = arith.constant 0 : index
    %c0_8 = arith.constant 0 : index
    %4 = vector.load %arg5[%c0_7, %c0_8] : memref<1x128xf32, #tpu.memory_space<vmem>>, vector<1x128xf32>
    %cst = arith.constant dense<0.000000e+00> : vector<256x128xf32>
    %5 = tpu.matmul %0, %1, %cst {dimension_numbers = #tpu.dot_dimension_numbers<[1], [0], [0], [1], [0, 0, 1, 1], [], []>} : vector<256x64xf32>, vector<64x128xf32>, vector<256x128xf32> -> vector<256x128xf32>
    %6 = vector.broadcast %2 : vector<1x128xf32> to vector<256x128xf32>
    %7 = arith.addf %5, %6 : vector<256x128xf32>
    %cst_9 = arith.constant 0.000000e+00 : f32
    %8 = vector.broadcast %cst_9 : f32 to vector<256x128xf32>
    %9 = arith.maximumf %7, %8 : vector<256x128xf32>
    %cst_10 = arith.constant dense<0.000000e+00> : vector<256xf32>
    %10 = vector.multi_reduction <add>, %9, %cst_10 [1] : vector<256x128xf32> to vector<256xf32>
    %11 = vector.shape_cast %10 : vector<256xf32> to vector<256x1xf32>
    %cst_11 = arith.constant 1.280000e+02 : f32
    %12 = vector.broadcast %cst_11 : f32 to vector<256x1xf32>
    %13 = arith.divf %11, %12 : vector<256x1xf32>
    %14 = arith.mulf %9, %9 : vector<256x128xf32>
    %cst_12 = arith.constant dense<0.000000e+00> : vector<256xf32>
    %15 = vector.multi_reduction <add>, %14, %cst_12 [1] : vector<256x128xf32> to vector<256xf32>
    %16 = vector.shape_cast %15 : vector<256xf32> to vector<256x1xf32>
    %cst_13 = arith.constant 1.280000e+02 : f32
    %17 = vector.broadcast %cst_13 : f32 to vector<256x1xf32>
    %18 = arith.divf %16, %17 : vector<256x1xf32>
    %19 = arith.mulf %13, %13 : vector<256x1xf32>
    %20 = arith.subf %18, %19 : vector<256x1xf32>
    %21 = vector.broadcast %13 : vector<256x1xf32> to vector<256x128xf32>
    %22 = arith.subf %9, %21 : vector<256x128xf32>
    %cst_14 = arith.constant 9.99999974E-6 : f32
    %23 = vector.broadcast %cst_14 : f32 to vector<256x1xf32>
    %24 = arith.addf %20, %23 : vector<256x1xf32>
    %25 = math.rsqrt %24 : vector<256x1xf32>
    %26 = vector.broadcast %25 : vector<256x1xf32> to vector<256x128xf32>
    %27 = arith.mulf %22, %26 : vector<256x128xf32>
    %28 = vector.broadcast %3 : vector<1x128xf32> to vector<256x128xf32>
    %29 = arith.mulf %27, %28 : vector<256x128xf32>
    %30 = vector.broadcast %4 : vector<1x128xf32> to vector<256x128xf32>
    %31 = arith.addf %29, %30 : vector<256x128xf32>
    %c0_15 = arith.constant 0 : index
    %c0_16 = arith.constant 0 : index
    %c0_17 = arith.constant 0 : index
    %32 = vector.load %arg6[%c0_15, %c0_16, %c0_17] : memref<2x128x128xf32, #tpu.memory_space<vmem>>, vector<1x128x128xf32>
    %33 = vector.shape_cast %32 : vector<1x128x128xf32> to vector<128x128xf32>
    %c0_18 = arith.constant 0 : index
    %c0_19 = arith.constant 0 : index
    %c0_20 = arith.constant 0 : index
    %34 = vector.load %arg7[%c0_18, %c0_19, %c0_20] : memref<2x1x128xf32, #tpu.memory_space<vmem>>, vector<1x1x128xf32>
    %35 = vector.shape_cast %34 : vector<1x1x128xf32> to vector<1x128xf32>
    %c0_21 = arith.constant 0 : index
    %c0_22 = arith.constant 0 : index
    %c0_23 = arith.constant 0 : index
    %36 = vector.load %arg8[%c0_21, %c0_22, %c0_23] : memref<2x1x128xf32, #tpu.memory_space<vmem>>, vector<1x1x128xf32>
    %37 = vector.shape_cast %36 : vector<1x1x128xf32> to vector<1x128xf32>
    %c0_24 = arith.constant 0 : index
    %c0_25 = arith.constant 0 : index
    %c0_26 = arith.constant 0 : index
    %38 = vector.load %arg9[%c0_24, %c0_25, %c0_26] : memref<2x1x128xf32, #tpu.memory_space<vmem>>, vector<1x1x128xf32>
    %39 = vector.shape_cast %38 : vector<1x1x128xf32> to vector<1x128xf32>
    %cst_27 = arith.constant dense<0.000000e+00> : vector<256x128xf32>
    %40 = tpu.matmul %31, %33, %cst_27 {dimension_numbers = #tpu.dot_dimension_numbers<[1], [0], [0], [1], [0, 0, 1, 1], [], []>} : vector<256x128xf32>, vector<128x128xf32>, vector<256x128xf32> -> vector<256x128xf32>
    %41 = vector.broadcast %35 : vector<1x128xf32> to vector<256x128xf32>
    %42 = arith.addf %40, %41 : vector<256x128xf32>
    %cst_28 = arith.constant 0.000000e+00 : f32
    %43 = vector.broadcast %cst_28 : f32 to vector<256x128xf32>
    %44 = arith.maximumf %42, %43 : vector<256x128xf32>
    %cst_29 = arith.constant dense<0.000000e+00> : vector<256xf32>
    %45 = vector.multi_reduction <add>, %44, %cst_29 [1] : vector<256x128xf32> to vector<256xf32>
    %46 = vector.shape_cast %45 : vector<256xf32> to vector<256x1xf32>
    %cst_30 = arith.constant 1.280000e+02 : f32
    %47 = vector.broadcast %cst_30 : f32 to vector<256x1xf32>
    %48 = arith.divf %46, %47 : vector<256x1xf32>
    %49 = arith.mulf %44, %44 : vector<256x128xf32>
    %cst_31 = arith.constant dense<0.000000e+00> : vector<256xf32>
    %50 = vector.multi_reduction <add>, %49, %cst_31 [1] : vector<256x128xf32> to vector<256xf32>
    %51 = vector.shape_cast %50 : vector<256xf32> to vector<256x1xf32>
    %cst_32 = arith.constant 1.280000e+02 : f32
    %52 = vector.broadcast %cst_32 : f32 to vector<256x1xf32>
    %53 = arith.divf %51, %52 : vector<256x1xf32>
    %54 = arith.mulf %48, %48 : vector<256x1xf32>
    %55 = arith.subf %53, %54 : vector<256x1xf32>
    %56 = vector.broadcast %48 : vector<256x1xf32> to vector<256x128xf32>
    %57 = arith.subf %44, %56 : vector<256x128xf32>
    %cst_33 = arith.constant 9.99999974E-6 : f32
    %58 = vector.broadcast %cst_33 : f32 to vector<256x1xf32>
    %59 = arith.addf %55, %58 : vector<256x1xf32>
    %60 = math.rsqrt %59 : vector<256x1xf32>
    %61 = vector.broadcast %60 : vector<256x1xf32> to vector<256x128xf32>
    %62 = arith.mulf %57, %61 : vector<256x128xf32>
    %63 = vector.broadcast %37 : vector<1x128xf32> to vector<256x128xf32>
    %64 = arith.mulf %62, %63 : vector<256x128xf32>
    %65 = vector.broadcast %39 : vector<1x128xf32> to vector<256x128xf32>
    %66 = arith.addf %64, %65 : vector<256x128xf32>
    %c1 = arith.constant 1 : index
    %c0_34 = arith.constant 0 : index
    %c0_35 = arith.constant 0 : index
    %67 = vector.load %arg6[%c1, %c0_34, %c0_35] : memref<2x128x128xf32, #tpu.memory_space<vmem>>, vector<1x128x128xf32>
    %68 = vector.shape_cast %67 : vector<1x128x128xf32> to vector<128x128xf32>
    %c1_36 = arith.constant 1 : index
    %c0_37 = arith.constant 0 : index
    %c0_38 = arith.constant 0 : index
    %69 = vector.load %arg7[%c1_36, %c0_37, %c0_38] : memref<2x1x128xf32, #tpu.memory_space<vmem>>, vector<1x1x128xf32>
    %70 = vector.shape_cast %69 : vector<1x1x128xf32> to vector<1x128xf32>
    %c1_39 = arith.constant 1 : index
    %c0_40 = arith.constant 0 : index
    %c0_41 = arith.constant 0 : index
    %71 = vector.load %arg8[%c1_39, %c0_40, %c0_41] : memref<2x1x128xf32, #tpu.memory_space<vmem>>, vector<1x1x128xf32>
    %72 = vector.shape_cast %71 : vector<1x1x128xf32> to vector<1x128xf32>
    %c1_42 = arith.constant 1 : index
    %c0_43 = arith.constant 0 : index
    %c0_44 = arith.constant 0 : index
    %73 = vector.load %arg9[%c1_42, %c0_43, %c0_44] : memref<2x1x128xf32, #tpu.memory_space<vmem>>, vector<1x1x128xf32>
    %74 = vector.shape_cast %73 : vector<1x1x128xf32> to vector<1x128xf32>
    %cst_45 = arith.constant dense<0.000000e+00> : vector<256x128xf32>
    %75 = tpu.matmul %66, %68, %cst_45 {dimension_numbers = #tpu.dot_dimension_numbers<[1], [0], [0], [1], [0, 0, 1, 1], [], []>} : vector<256x128xf32>, vector<128x128xf32>, vector<256x128xf32> -> vector<256x128xf32>
    %76 = vector.broadcast %70 : vector<1x128xf32> to vector<256x128xf32>
    %77 = arith.addf %75, %76 : vector<256x128xf32>
    %cst_46 = arith.constant 0.000000e+00 : f32
    %78 = vector.broadcast %cst_46 : f32 to vector<256x128xf32>
    %79 = arith.maximumf %77, %78 : vector<256x128xf32>
    %cst_47 = arith.constant dense<0.000000e+00> : vector<256xf32>
    %80 = vector.multi_reduction <add>, %79, %cst_47 [1] : vector<256x128xf32> to vector<256xf32>
    %81 = vector.shape_cast %80 : vector<256xf32> to vector<256x1xf32>
    %cst_48 = arith.constant 1.280000e+02 : f32
    %82 = vector.broadcast %cst_48 : f32 to vector<256x1xf32>
    %83 = arith.divf %81, %82 : vector<256x1xf32>
    %84 = arith.mulf %79, %79 : vector<256x128xf32>
    %cst_49 = arith.constant dense<0.000000e+00> : vector<256xf32>
    %85 = vector.multi_reduction <add>, %84, %cst_49 [1] : vector<256x128xf32> to vector<256xf32>
    %86 = vector.shape_cast %85 : vector<256xf32> to vector<256x1xf32>
    %cst_50 = arith.constant 1.280000e+02 : f32
    %87 = vector.broadcast %cst_50 : f32 to vector<256x1xf32>
    %88 = arith.divf %86, %87 : vector<256x1xf32>
    %89 = arith.mulf %83, %83 : vector<256x1xf32>
    %90 = arith.subf %88, %89 : vector<256x1xf32>
    %91 = vector.broadcast %83 : vector<256x1xf32> to vector<256x128xf32>
    %92 = arith.subf %79, %91 : vector<256x128xf32>
    %cst_51 = arith.constant 9.99999974E-6 : f32
    %93 = vector.broadcast %cst_51 : f32 to vector<256x1xf32>
    %94 = arith.addf %90, %93 : vector<256x1xf32>
    %95 = math.rsqrt %94 : vector<256x1xf32>
    %96 = vector.broadcast %95 : vector<256x1xf32> to vector<256x128xf32>
    %97 = arith.mulf %92, %96 : vector<256x128xf32>
    %98 = vector.broadcast %72 : vector<1x128xf32> to vector<256x128xf32>
    %99 = arith.mulf %97, %98 : vector<256x128xf32>
    %100 = vector.broadcast %74 : vector<1x128xf32> to vector<256x128xf32>
    %101 = arith.addf %99, %100 : vector<256x128xf32>
    %c0_52 = arith.constant 0 : index
    %c0_53 = arith.constant 0 : index
    %102 = vector.load %arg10[%c0_52, %c0_53] : memref<128x128xf32, #tpu.memory_space<vmem>>, vector<128x128xf32>
    %c0_54 = arith.constant 0 : index
    %c0_55 = arith.constant 0 : index
    %103 = vector.load %arg11[%c0_54, %c0_55] : memref<1x128xf32, #tpu.memory_space<vmem>>, vector<1x128xf32>
    %c0_56 = arith.constant 0 : index
    %c0_57 = arith.constant 0 : index
    %104 = vector.load %arg12[%c0_56, %c0_57] : memref<1x128xf32, #tpu.memory_space<vmem>>, vector<1x128xf32>
    %c0_58 = arith.constant 0 : index
    %c0_59 = arith.constant 0 : index
    %105 = vector.load %arg13[%c0_58, %c0_59] : memref<1x128xf32, #tpu.memory_space<vmem>>, vector<1x128xf32>
    %cst_60 = arith.constant dense<0.000000e+00> : vector<256x128xf32>
    %106 = tpu.matmul %101, %102, %cst_60 {dimension_numbers = #tpu.dot_dimension_numbers<[1], [0], [0], [1], [0, 0, 1, 1], [], []>} : vector<256x128xf32>, vector<128x128xf32>, vector<256x128xf32> -> vector<256x128xf32>
    %107 = vector.broadcast %103 : vector<1x128xf32> to vector<256x128xf32>
    %108 = arith.addf %106, %107 : vector<256x128xf32>
    %cst_61 = arith.constant 0.000000e+00 : f32
    %109 = vector.broadcast %cst_61 : f32 to vector<256x128xf32>
    %110 = arith.maximumf %108, %109 : vector<256x128xf32>
    %cst_62 = arith.constant dense<0.000000e+00> : vector<256xf32>
    %111 = vector.multi_reduction <add>, %110, %cst_62 [1] : vector<256x128xf32> to vector<256xf32>
    %112 = vector.shape_cast %111 : vector<256xf32> to vector<256x1xf32>
    %cst_63 = arith.constant 1.280000e+02 : f32
    %113 = vector.broadcast %cst_63 : f32 to vector<256x1xf32>
    %114 = arith.divf %112, %113 : vector<256x1xf32>
    %115 = arith.mulf %110, %110 : vector<256x128xf32>
    %cst_64 = arith.constant dense<0.000000e+00> : vector<256xf32>
    %116 = vector.multi_reduction <add>, %115, %cst_64 [1] : vector<256x128xf32> to vector<256xf32>
    %117 = vector.shape_cast %116 : vector<256xf32> to vector<256x1xf32>
    %cst_65 = arith.constant 1.280000e+02 : f32
    %118 = vector.broadcast %cst_65 : f32 to vector<256x1xf32>
    %119 = arith.divf %117, %118 : vector<256x1xf32>
    %120 = arith.mulf %114, %114 : vector<256x1xf32>
    %121 = arith.subf %119, %120 : vector<256x1xf32>
    %122 = vector.broadcast %114 : vector<256x1xf32> to vector<256x128xf32>
    %123 = arith.subf %110, %122 : vector<256x128xf32>
    %cst_66 = arith.constant 9.99999974E-6 : f32
    %124 = vector.broadcast %cst_66 : f32 to vector<256x1xf32>
    %125 = arith.addf %121, %124 : vector<256x1xf32>
    %126 = math.rsqrt %125 : vector<256x1xf32>
    %127 = vector.broadcast %126 : vector<256x1xf32> to vector<256x128xf32>
    %128 = arith.mulf %123, %127 : vector<256x128xf32>
    %129 = vector.broadcast %104 : vector<1x128xf32> to vector<256x128xf32>
    %130 = arith.mulf %128, %129 : vector<256x128xf32>
    %131 = vector.broadcast %105 : vector<1x128xf32> to vector<256x128xf32>
    %132 = arith.addf %130, %131 : vector<256x128xf32>
    %c0_67 = arith.constant 0 : index
    %c0_68 = arith.constant 0 : index
    %133 = vector.load %arg14[%c0_67, %c0_68] : memref<64x128xf32, #tpu.memory_space<vmem>>, vector<64x128xf32>
    %cst_69 = arith.constant dense<0.000000e+00> : vector<256x128xf32>
    %134 = tpu.matmul %0, %133, %cst_69 {dimension_numbers = #tpu.dot_dimension_numbers<[1], [0], [0], [1], [0, 0, 1, 1], [], []>} : vector<256x64xf32>, vector<64x128xf32>, vector<256x128xf32> -> vector<256x128xf32>
    %c0_70 = arith.constant 0 : index
    %c0_71 = arith.constant 0 : index
    %135 = vector.load %arg15[%c0_70, %c0_71] : memref<1x128xf32, #tpu.memory_space<vmem>>, vector<1x128xf32>
    %136 = vector.broadcast %135 : vector<1x128xf32> to vector<256x128xf32>
    %137 = arith.addf %134, %136 : vector<256x128xf32>
    %138 = arith.addf %137, %132 : vector<256x128xf32>
    %cst_72 = arith.constant 0.000000e+00 : f32
    %139 = vector.broadcast %cst_72 : f32 to vector<256x128xf32>
    %140 = arith.maximumf %138, %139 : vector<256x128xf32>
    %c0_73 = arith.constant 0 : index
    %c0_74 = arith.constant 0 : index
    %141 = vector.load %arg16[%c0_73, %c0_74] : memref<256x128xf32, #tpu.memory_space<vmem>>, vector<256x128xf32>
    tpu.vector_store %arg16[%c0_73, %c0_74], %140 {strides = array<i32>} : memref<256x128xf32, #tpu.memory_space<vmem>>, vector<256x128xf32>,
    return
  }
  func.func @transform_0(%arg0: i32) -> (i32, i32) {
    %c0_i32 = arith.constant 0 : i32
    %c0_i32_0 = arith.constant 0 : i32
    return %arg0, %c0_i32 : i32, i32
  }
  func.func @transform_1(%arg0: i32) -> (i32, i32) {
    %c0_i32 = arith.constant 0 : i32
    %c0_i32_0 = arith.constant 0 : i32
    %c0_i32_1 = arith.constant 0 : i32
    return %c0_i32, %c0_i32_0 : i32, i32
  }
  func.func @transform_2(%arg0: i32) -> (i32, i32) {
    %c0_i32 = arith.constant 0 : i32
    %c0_i32_0 = arith.constant 0 : i32
    %c0_i32_1 = arith.constant 0 : i32
    return %c0_i32, %c0_i32_0 : i32, i32
  }
  func.func @transform_3(%arg0: i32) -> (i32, i32) {
    %c0_i32 = arith.constant 0 : i32
    %c0_i32_0 = arith.constant 0 : i32
    %c0_i32_1 = arith.constant 0 : i32
    return %c0_i32, %c0_i32_0 : i32, i32
  }
  func.func @transform_4(%arg0: i32) -> (i32, i32) {
    %c0_i32 = arith.constant 0 : i32
    %c0_i32_0 = arith.constant 0 : i32
    %c0_i32_1 = arith.constant 0 : i32
    return %c0_i32, %c0_i32_0 : i32, i32
  }
  func.func @transform_5(%arg0: i32) -> (i32, i32, i32) {
    %c0_i32 = arith.constant 0 : i32
    %c0_i32_0 = arith.constant 0 : i32
    %c0_i32_1 = arith.constant 0 : i32
    %c0_i32_2 = arith.constant 0 : i32
    return %c0_i32, %c0_i32_0, %c0_i32_1 : i32, i32, i32
  }
  func.func @transform_6(%arg0: i32) -> (i32, i32, i32) {
    %c0_i32 = arith.constant 0 : i32
    %c0_i32_0 = arith.constant 0 : i32
    %c0_i32_1 = arith.constant 0 : i32
    %c0_i32_2 = arith.constant 0 : i32
    return %c0_i32, %c0_i32_0, %c0_i32_1 : i32, i32, i32
  }
  func.func @transform_7(%arg0: i32) -> (i32, i32, i32) {
    %c0_i32 = arith.constant 0 : i32
    %c0_i32_0 = arith.constant 0 : i32
    %c0_i32_1 = arith.constant 0 : i32
    %c0_i32_2 = arith.constant 0 : i32
    return %c0_i32, %c0_i32_0, %c0_i32_1 : i32, i32, i32
  }
  func.func @transform_8(%arg0: i32) -> (i32, i32, i32) {
    %c0_i32 = arith.constant 0 : i32
    %c0_i32_0 = arith.constant 0 : i32
    %c0_i32_1 = arith.constant 0 : i32
    %c0_i32_2 = arith.constant 0 : i32
    return %c0_i32, %c0_i32_0, %c0_i32_1 : i32, i32, i32
  }
  func.func @transform_9(%arg0: i32) -> (i32, i32) {
    %c0_i32 = arith.constant 0 : i32
    %c0_i32_0 = arith.constant 0 : i32
    %c0_i32_1 = arith.constant 0 : i32
    return %c0_i32, %c0_i32_0 : i32, i32
  }
  func.func @transform_10(%arg0: i32) -> (i32, i32) {
    %c0_i32 = arith.constant 0 : i32
    %c0_i32_0 = arith.constant 0 : i32
    %c0_i32_1 = arith.constant 0 : i32
    return %c0_i32, %c0_i32_0 : i32, i32
  }
  func.func @transform_11(%arg0: i32) -> (i32, i32) {
    %c0_i32 = arith.constant 0 : i32
    %c0_i32_0 = arith.constant 0 : i32
    %c0_i32_1 = arith.constant 0 : i32
    return %c0_i32, %c0_i32_0 : i32, i32
  }
  func.func @transform_12(%arg0: i32) -> (i32, i32) {
    %c0_i32 = arith.constant 0 : i32
    %c0_i32_0 = arith.constant 0 : i32
    %c0_i32_1 = arith.constant 0 : i32
    return %c0_i32, %c0_i32_0 : i32, i32
  }
  func.func @transform_13(%arg0: i32) -> (i32, i32) {
    %c0_i32 = arith.constant 0 : i32
    %c0_i32_0 = arith.constant 0 : i32
    %c0_i32_1 = arith.constant 0 : i32
    return %c0_i32, %c0_i32_0 : i32, i32
  }
  func.func @transform_14(%arg0: i32) -> (i32, i32) {
    %c0_i32 = arith.constant 0 : i32
    %c0_i32_0 = arith.constant 0 : i32
    %c0_i32_1 = arith.constant 0 : i32
    return %c0_i32, %c0_i32_0 : i32, i32
  }
  func.func @transform_15(%arg0: i32) -> (i32, i32) {
    %c0_i32 = arith.constant 0 : i32
    %c0_i32_0 = arith.constant 0 : i32
    return %arg0, %c0_i32 : i32, i32
  }
}

</mosaic_0001>

<bundles_post_ra>
// kernel: res_linear_block_forward.1
= control target key start
LH: loop header
LB: loop body
LE: loop exit
PB: predicated region body
PF: predicated region fallthrough
CT: control target
= control target key end

     0   :  { %vm100_vm0 = vcmask 523264   ;;  %s7241_s0 = inlined_call_operand.vmem [shape: f32[256,64], index: 0, kind: input, shape index: {}]   ;;  %s7242_s1 = inlined_call_operand.vmem [shape: f32[64,128], index: 1, kind: input, shape index: {}]   ;;  %s7243_s2 = inlined_call_operand.vmem [shape: f32[1,128], index: 2, kind: input, shape index: {}]   ;;  %s7244_s3 = inlined_call_operand.vmem [shape: f32[1,128], index: 3, kind: input, shape index: {}]   ;;  %s7245_s4 = inlined_call_operand.vmem [shape: f32[1,128], index: 4, kind: input, shape index: {}]   ;;  %s7246_s5 = inlined_call_operand.vmem [shape: f32[2,128,128], index: 5, kind: input, shape index: {}]   ;;  %s7247_s6 = inlined_call_operand.vmem [shape: f32[2,1,128], index: 6, kind: input, shape index: {}]   ;;  %s7248_s7 = inlined_call_operand.vmem [shape: f32[2,1,128], index: 7, kind: input, shape index: {}]   ;;  %s7249_s8 = inlined_call_operand.vmem [shape: f32[2,1,128], index: 8, kind: input, shape index: {}]   ;;  %s7250_s9 = inlined_call_operand.vmem [shape: f32[128,128], index: 9, kind: input, shape index: {}]   ;;  %s7251_s10 = inlined_call_operand.vmem [shape: f32[1,128], index: 10, kind: input, shape index: {}]   ;;  %s7252_s11 = inlined_call_operand.vmem [shape: f32[1,128], index: 11, kind: input, shape index: {}]   ;;  %s7253_s12 = inlined_call_operand.vmem [shape: f32[1,128], index: 12, kind: input, shape index: {}]   ;;  %s7254_s13 = inlined_call_operand.vmem [shape: f32[64,128], index: 13, kind: input, shape index: {}]   ;;  %s7255_s14 = inlined_call_operand.vmem [shape: f32[1,128], index: 14, kind: input, shape index: {}]   ;;  %s7256_s15 = inlined_call_operand.hbm [shape: f32[256,128], index: 15, kind: output, shape index: {}]  }
   0x1   :  { %v83_v0 = vld [vmem:[%s7242_s1] sm:$0xff]  ;;  %v84_v1 = vld [vmem:[%s7242_s1 + $0x8] sm:$0xff]  ;;  %v85_v2 = vld [vmem:[%s7242_s1 + $0x10] sm:$0xff] }
   0x2   :  { %v4313_v3 = vpack.c.bf16 %v84_v1, %v83_v0  ;;  %v86_v4 = vld [vmem:[%s7242_s1 + $0x18] sm:$0xff]  ;;  %v87_v6 = vld [vmem:[%s7242_s1 + $0x20] sm:$0xff]  ;;  %v88_v7 = vld [vmem:[%s7242_s1 + $0x28] sm:$0xff] }
   0x3   :  { %v4317_v5 = vpack.c.bf16 %v86_v4, %v85_v2  ;;  %v51_v8 = vld [vmem:[%s7241_s0] sm:$0xff]  ;;  %v4321_v10 = vpack.c.bf16 %v88_v7, %v87_v6  ;;  %v89_v11 = vld [vmem:[%s7242_s1 + $0x30] sm:$0xff]  ;;  %v90_v12 = vld [vmem:[%s7242_s1 + $0x38] sm:$0xff] }
   0x4   :  { %4314 = vmatprep.subr.bf16.mxu0 %v4313_v3  ;;  %4441 = vmatprep.subr.bf16.mxu1 %v4313_v3  ;;  %v67_v9 = vld [vmem:[%s7241_s0 + $0x80] sm:$0xff]  ;;  %v4325_v13 = vpack.c.bf16 %v90_v12, %v89_v11 }
   0x5   :  { %4316 = vmatpush3.bf16.msra.mxu0 %v4313_v3  ;;  %4445 = vmatpush3.bf16.msra.mxu1 %v4313_v3 }
   0x6   :  { %4318 = vmatprep.subr.bf16.mxu0 %v4317_v5  ;;  %4442 = vmatprep.subr.bf16.mxu1 %v4317_v5 }
   0x7   :  { %3961 = vmatprep.mubr.msk.f32.mxu0 %vm100_vm0, %v51_v8  ;;  %3985 = vmatprep.mubr.msk.f32.mxu1 %vm100_vm0, %v67_v9 }
   0x9   :  { %4320 = vmatpush3.bf16.msra.mxu0 %v4317_v5  ;;  %4446 = vmatpush3.bf16.msra.mxu1 %v4317_v5 }
   0xa   :  { %4322 = vmatprep.subr.bf16.mxu0 %v4321_v10  ;;  %4443 = vmatprep.subr.bf16.mxu1 %v4321_v10 }
   0xd   :  { %4324 = vmatpush3.bf16.msra.mxu0 %v4321_v10  ;;  %4447 = vmatpush3.bf16.msra.mxu1 %v4321_v10 }
   0xe   :  { %4326 = vmatprep.subr.bf16.mxu0 %v4325_v13  ;;  %4444 = vmatprep.subr.bf16.mxu1 %v4325_v13 }
   0xf   :  { %20 = vsyncpa [#allocation3], 0  ;;  %v52_v14 = vld [vmem:[%s7241_s0 + $0x8] sm:$0xff]  ;;  %v53_v16 = vld [vmem:[%s7241_s0 + $0x10] sm:$0xff] }
  0x10   :  { %v68_v15 = vld [vmem:[%s7241_s0 + $0x88] sm:$0xff]  ;;  %v69_v17 = vld [vmem:[%s7241_s0 + $0x90] sm:$0xff]  ;;  %v54_v18 = vld [vmem:[%s7241_s0 + $0x18] sm:$0xff] }
  0x11   :  { %4328 = vmatpush3.bf16.msra.mxu0 %v4325_v13  ;;  %4448 = vmatpush3.bf16.msra.mxu1 %v4325_v13  ;;  %v70_v19 = vld [vmem:[%s7241_s0 + $0x98] sm:$0xff]  ;;  %v55_v20 = vld [vmem:[%s7241_s0 + $0x20] sm:$0xff]  ;;  %v56_v22 = vld [vmem:[%s7241_s0 + $0x28] sm:$0xff] }
  0x12   :  { %v71_v21 = vld [vmem:[%s7241_s0 + $0xa0] sm:$0xff]  ;;  %v72_v23 = vld [vmem:[%s7241_s0 + $0xa8] sm:$0xff]  ;;  %v57_v24 = vld [vmem:[%s7241_s0 + $0x30] sm:$0xff] }
  0x13   :  { %v73_v25 = vld [vmem:[%s7241_s0 + $0xb0] sm:$0xff]  ;;  %v58_v26 = vld [vmem:[%s7241_s0 + $0x38] sm:$0xff]  ;;  %v59_v28 = vld [vmem:[%s7241_s0 + $0x40] sm:$0xff] }
  0x14   :  { %3962 = vmatmul.mubr.msk.f32.vlgmr.msra.gmra.mrb[0].mxu0 %vm100_vm0, %v52_v14  ;;  %3986 = vmatmul.mubr.msk.f32.vlgmr.msra.gmra.mrb[0].mxu1 %vm100_vm0, %v68_v15  ;;  %v74_v27 = vld [vmem:[%s7241_s0 + $0xb8] sm:$0xff]  ;;  %v75_v29 = vld [vmem:[%s7241_s0 + $0xc0] sm:$0xff]  ;;  %v60_v30 = vld [vmem:[%s7241_s0 + $0x48] sm:$0xff] }
  0x15   :  { %3964 = vmatprep.mubr.msk.f32.mxu0 %vm100_vm0, %v53_v16  ;;  %3988 = vmatprep.mubr.msk.f32.mxu1 %vm100_vm0, %v69_v17  ;;  %v76_v31 = vld [vmem:[%s7241_s0 + $0xc8] sm:$0xff]  ;;  %v61_v32 = vld [vmem:[%s7241_s0 + $0x50] sm:$0xff]  ;;  %v62_v34 = vld [vmem:[%s7241_s0 + $0x58] sm:$0xff] }
  0x16   :  { %v77_v33 = vld [vmem:[%s7241_s0 + $0xd0] sm:$0xff]  ;;  %v78_v35 = vld [vmem:[%s7241_s0 + $0xd8] sm:$0xff]  ;;  %v63_v36 = vld [vmem:[%s7241_s0 + $0x60] sm:$0xff] }
  0x17   :  { %v79_v37 = vld [vmem:[%s7241_s0 + $0xe0] sm:$0xff]  ;;  %v64_v38 = vld [vmem:[%s7241_s0 + $0x68] sm:$0xff]  ;;  %v65_v40 = vld [vmem:[%s7241_s0 + $0x70] sm:$0xff] }
  0x18   :  { %3965 = vmatmul.mubr.msk.f32.gmra.mrb[2].mxu0 %vm100_vm0, %v54_v18  ;;  %3989 = vmatmul.mubr.msk.f32.gmra.mrb[2].mxu1 %vm100_vm0, %v70_v19  ;;  %v80_v39 = vld [vmem:[%s7241_s0 + $0xe8] sm:$0xff]  ;;  %v81_v41 = vld [vmem:[%s7241_s0 + $0xf0] sm:$0xff]  ;;  %v66_v42 = vld [vmem:[%s7241_s0 + $0x78] sm:$0xff] }
  0x19   :  { %3967 = vmatprep.mubr.msk.f32.mxu0 %vm100_vm0, %v55_v20  ;;  %3991 = vmatprep.mubr.msk.f32.mxu1 %vm100_vm0, %v71_v21  ;;  %v82_v43 = vld [vmem:[%s7241_s0 + $0xf8] sm:$0xff]  ;;  %v5002_v44 = vld [vmem:[%s7243_s2] ss:$0 sm:$0xff] }
  0x1c   :  { %3968 = vmatmul.mubr.msk.f32.gmra.mrb[4].mxu0 %vm100_vm0, %v56_v22  ;;  %3992 = vmatmul.mubr.msk.f32.gmra.mrb[4].mxu1 %vm100_vm0, %v72_v23 }
  0x1d   :  { %3970 = vmatprep.mubr.msk.f32.mxu0 %vm100_vm0, %v57_v24  ;;  %3994 = vmatprep.mubr.msk.f32.mxu1 %vm100_vm0, %v73_v25  ;;  %v947_v25 = vld [vmem:[%s7246_s5] sm:$0xff] }
  0x20   :  { %3971 = vmatmul.mubr.msk.f32.gmra.mrb[6].mxu0 %vm100_vm0, %v58_v26  ;;  %3995 = vmatmul.mubr.msk.f32.gmra.mrb[6].mxu1 %vm100_vm0, %v74_v27  ;;  %v948_v26 = vld [vmem:[%s7246_s5 + $0x8] sm:$0xff] }
  0x21   :  { %3973 = vmatprep.mubr.msk.f32.mxu0 %vm100_vm0, %v59_v28  ;;  %3997 = vmatprep.mubr.msk.f32.mxu1 %vm100_vm0, %v75_v29 }
  0x24   :  { %3974 = vmatmul.mubr.msk.f32.gmra.mrb[8].mxu0 %vm100_vm0, %v60_v30  ;;  %3998 = vmatmul.mubr.msk.f32.gmra.mrb[8].mxu1 %vm100_vm0, %v76_v31 }
  0x25   :  { %3976 = vmatprep.mubr.msk.f32.mxu0 %vm100_vm0, %v61_v32  ;;  %4000 = vmatprep.mubr.msk.f32.mxu1 %vm100_vm0, %v77_v33 }
  0x28   :  { %3977 = vmatmul.mubr.msk.f32.gmra.mrb[10].mxu0 %vm100_vm0, %v62_v34  ;;  %4001 = vmatmul.mubr.msk.f32.gmra.mrb[10].mxu1 %vm100_vm0, %v78_v35  ;;  %v4329_v35 = vpack.c.bf16 %v948_v26, %v947_v25 }
  0x29   :  { %3979 = vmatprep.mubr.msk.f32.mxu0 %vm100_vm0, %v63_v36  ;;  %4003 = vmatprep.mubr.msk.f32.mxu1 %vm100_vm0, %v79_v37 }
  0x2a   :  { %4330 = vmatprep.subr.bf16.mxu1 %v4329_v35 }
  0x2b   :  { %4332 = vmatpush3.bf16.msra.mxu1 %v4329_v35 }
  0x2c   :  { %3980 = vmatmul.mubr.msk.f32.gmra.mrb[12].mxu0 %vm100_vm0, %v64_v38  ;;  %4004 = vmatmul.mubr.msk.f32.gmra.mrb[12].mxu1 %vm100_vm0, %v80_v39  ;;  %v949_v38 = vld [vmem:[%s7246_s5 + $0x10] sm:$0xff]  ;;  %v950_v39 = vld [vmem:[%s7246_s5 + $0x18] sm:$0xff] }
  0x2d   :  { %3982 = vmatprep.mubr.msk.f32.mxu0 %vm100_vm0, %v65_v40  ;;  %4006 = vmatprep.mubr.msk.f32.mxu1 %vm100_vm0, %v81_v41 }
  0x30   :  { %3983 = vmatmul.mubr.msk.f32.gmra.mrb[14].mxu0 %vm100_vm0, %v66_v42  ;;  %4007 = vmatmul.mubr.msk.f32.gmra.mrb[14].mxu1 %vm100_vm0, %v82_v43 }
  0xe7   :  { %v3963_v45 = vpop.f32.mrb[0].mxu0  ;;  %v3987_v46 = vpop.f32.mrb[0].mxu1 }
  0xe8   :  { %v269_v47 = vadd.f32 %v3963_v45, %v5002_v44  ;;  %v349_v48 = vadd.f32 %v3987_v46, %v5002_v44  ;;  %v263_v49 = vpop.f32.mrb[1].mxu0  ;;  %v343_v50 = vpop.f32.mrb[1].mxu1 }
  0xe9   :  { %v264_v53 = vadd.f32 %v5002_v44, %v263_v49  ;;  %v344_v59 = vadd.f32 %v5002_v44, %v343_v50  ;;  %v4333_v49 = vpack.c.bf16 %v950_v39, %v949_v38 }
  0xea   :  { %v5006_v51 = vmax.f32 %v269_v47, 0.0  ;;  %v5008_v52 = vmax.f32 %v349_v48, 0.0 }
  0xeb   :  { %v3966_v54 = vpop.f32.mrb[2].mxu0  ;;  %v3990_v55 = vpop.f32.mrb[2].mxu1  ;;  %v5013_v58 = vmax.f32 %v264_v53, 0.0  ;;  %v5027_v1 = vmax.f32 %v344_v59, 0.0  ;;  %4334 = vmatprep.subr.bf16.mxu1 %v4333_v49 }
  0xec   :  { %488 = vadd.xlane.f32.xlu1 %v5008_v52  ;;  %456 = vadd.xlane.f32.xlu0 %v5006_v51  ;;  %v273_v56 = vpop.f32.mrb[3].mxu0  ;;  %v353_v57 = vpop.f32.mrb[3].mxu1  ;;  %v552_v60 = vmul.f32 %v5006_v51, %v5006_v51  ;;  %v568_v2 = vmul.f32 %v5008_v52, %v5008_v52  ;;  %v279_v3 = vadd.f32 %v3966_v54, %v5002_v44 }
  0xed   :  { %v274_v6 = vadd.f32 %v5002_v44, %v273_v56  ;;  %v567_v9 = vmul.f32 %v5027_v1, %v5027_v1  ;;  %v551_v10 = vmul.f32 %v5013_v58, %v5013_v58  ;;  %v359_v12 = vadd.f32 %v3990_v55, %v5002_v44  ;;  %4336 = vmatpush3.bf16.msra.mxu1 %v4333_v49 }
  0xee   :  { %v5046_v11 = vmax.f32 %v279_v3, 0.0  ;;  %v354_v16 = vadd.f32 %v5002_v44, %v353_v57 }
  0xef   :  { %v5018_v61 = vpop.f32.mrb[4].mxu0  ;;  %v5020_v62 = vpop.f32.mrb[4].mxu1  ;;  %v5049_v15 = vmax.f32 %v274_v6, 0.0  ;;  %v5070_v27 = vmax.f32 %v359_v12, 0.0 }
  0xf0   :  { %585 = vadd.xlane.f32.xlu1 %v552_v60  ;;  %454 = vadd.xlane.f32.xlu0 %v5013_v58  ;;  %v5023_v63 = vpop.f32.mrb[5].mxu0  ;;  %v5025_v0 = vpop.f32.mrb[5].mxu1  ;;  %v5072_v28 = vmax.f32 %v354_v16, 0.0  ;;  %v554_v48 = vmul.f32 %v5046_v11, %v5046_v11  ;;  %v289_v50 = vadd.f32 %v5018_v61, %v5002_v44  ;;  %v952_v61 = vld [vmem:[%s7246_s5 + $0x28] sm:$0xff] }
  0xf1   :  { %v553_v47 = vmul.f32 %v5049_v15, %v5049_v15  ;;  %v284_v55 = vadd.f32 %v5002_v44, %v5023_v63  ;;  %v364_v16 = vadd.f32 %v5002_v44, %v5025_v0  ;;  %v956_v0 = vld [vmem:[%s7246_s5 + $0x48] sm:$0xff] }
  0xf2   :  { %v569_v6 = vmul.f32 %v5072_v28, %v5072_v28  ;;  %v5138_v12 = vmax.f32 %v289_v50, 0.0 }
  0xf3   :  { %v5032_v4 = vpop.f32.mrb[6].mxu0  ;;  %v5034_v5 = vpop.f32.mrb[6].mxu1  ;;  %v5154_v25 = vmax.f32 %v364_v16, 0.0 }
  0xf4   :  { %617 = vadd.xlane.f32.xlu1 %v568_v2  ;;  %486 = vadd.xlane.f32.xlu0 %v5027_v1  ;;  %v5038_v7 = vpop.f32.mrb[7].mxu0  ;;  %v5040_v8 = vpop.f32.mrb[7].mxu1  ;;  %v951_v2 = vld [vmem:[%s7246_s5 + $0x20] sm:$0xff]  ;;  %v299_v38 = vadd.f32 %v5032_v4, %v5002_v44  ;;  %v379_v50 = vadd.f32 %v5034_v5, %v5002_v44 }
  0xf5   :  { %v294_v39 = vadd.f32 %v5002_v44, %v5038_v7 }
  0xf6   :  { %v5190_v4 = vmax.f32 %v299_v38, 0.0 }
  0xf7   :  { %v3975_v13 = vpop.f32.mrb[8].mxu0  ;;  %v3999_v14 = vpop.f32.mrb[8].mxu1  ;;  %v5192_v7 = vmax.f32 %v294_v39, 0.0 }
  0xf8   :  { %615 = vadd.xlane.f32.xlu0 %v567_v9  ;;  %583 = vadd.xlane.f32.xlu1 %v551_v10  ;;  %v5053_v17 = vadd.f32 %v3975_v13, %v5002_v44  ;;  %v303_v18 = vpop.f32.mrb[9].mxu0  ;;  %v5056_v19 = vadd.f32 %v3999_v14, %v5002_v44  ;;  %v383_v20 = vpop.f32.mrb[9].mxu1  ;;  %v570_v9 = vmul.f32 %v5070_v27, %v5070_v27  ;;  %v5140_v13 = vmax.f32 %v284_v55, 0.0  ;;  %v962_v55 = vld [vmem:[%s7246_s5 + $0x78] sm:$0xff] }
  0xf9   :  { %v5059_v21 = vadd.f32 %v5002_v44, %v303_v18  ;;  %v5062_v22 = vadd.f32 %v5002_v44, %v383_v20  ;;  %v4337_v10 = vpack.c.bf16 %v952_v61, %v951_v2  ;;  %v369_v14 = vadd.f32 %v5020_v62, %v5002_v44  ;;  %v953_v18 = vld [vmem:[%s7246_s5 + $0x30] sm:$0xff]  ;;  %v954_v20 = vld [vmem:[%s7246_s5 + $0x38] sm:$0xff]  ;;  %v955_v62 = vld [vmem:[%s7246_s5 + $0x40] sm:$0xff] }
  0xfa   :  { %v4345_v26 = vpack.c.bf16 %v956_v0, %v955_v62  ;;  %v558_v5 = vmul.f32 %v5190_v4, %v5190_v4 }
  0xfb   :  { %v3978_v23 = vpop.f32.mrb[10].mxu0  ;;  %v4002_v24 = vpop.f32.mrb[10].mxu1  ;;  %4338 = vmatprep.subr.bf16.mxu1 %v4337_v10 }
  0xfc   :  { %458 = vadd.xlane.f32.xlu0 %v5049_v15  ;;  %460 = vadd.xlane.f32.xlu1 %v5046_v11  ;;  %v5077_v29 = vadd.f32 %v3978_v23, %v5002_v44  ;;  %v313_v30 = vpop.f32.mrb[11].mxu0  ;;  %v5080_v31 = vadd.f32 %v4002_v24, %v5002_v44  ;;  %v393_v32 = vpop.f32.mrb[11].mxu1  ;;  %v4341_v23 = vpack.c.bf16 %v954_v20, %v953_v18  ;;  %v5152_v24 = vmax.f32 %v369_v14, 0.0 }
  0xfd   :  { %v5083_v33 = vadd.f32 %v5002_v44, %v313_v30  ;;  %v5086_v34 = vadd.f32 %v5002_v44, %v393_v32  ;;  %4340 = vmatpush3.bf16.msra.mxu1 %v4337_v10  ;;  %v957_v30 = vld [vmem:[%s7246_s5 + $0x50] sm:$0xff]  ;;  %v958_v32 = vld [vmem:[%s7246_s5 + $0x58] sm:$0xff] }
  0xfe   :  { %4342 = vmatprep.subr.bf16.mxu1 %v4341_v23  ;;  %v4349_v35 = vpack.c.bf16 %v958_v32, %v957_v30  ;;  %v572_v49 = vmul.f32 %v5152_v24, %v5152_v24  ;;  %v5233_v16 = vmax.f32 %v5077_v29, 0.0  ;;  %v5281_v32 = vmax.f32 %v5080_v31, 0.0 }
  0xff   :  { %v3981_v36 = vpop.f32.mrb[12].mxu0  ;;  %v4005_v37 = vpop.f32.mrb[12].mxu1 }
 0x100   :  { %490 = vadd.xlane.f32.xlu0 %v5072_v28  ;;  %492 = vadd.xlane.f32.xlu1 %v5070_v27  ;;  %v5097_v40 = vadd.f32 %v3981_v36, %v5002_v44  ;;  %v323_v41 = vpop.f32.mrb[13].mxu0  ;;  %v5100_v42 = vadd.f32 %v4005_v37, %v5002_v44  ;;  %v403_v43 = vpop.f32.mrb[13].mxu1  ;;  %v555_v36 = vmul.f32 %v5140_v13, %v5140_v13 }
 0x101   :  { %v5103_v45 = vadd.f32 %v5002_v44, %v323_v41  ;;  %v5106_v46 = vadd.f32 %v5002_v44, %v403_v43  ;;  %4344 = vmatpush3.bf16.msra.mxu1 %v4341_v23  ;;  %v556_v37 = vmul.f32 %v5138_v12, %v5138_v12  ;;  %v959_v41 = vld [vmem:[%s7246_s5 + $0x60] sm:$0xff]  ;;  %v960_v43 = vld [vmem:[%s7246_s5 + $0x68] sm:$0xff]  ;;  %v562_v18 = vmul.f32 %v5233_v16, %v5233_v16 }
 0x102   :  { %4346 = vmatprep.subr.bf16.mxu1 %v4345_v26  ;;  %v5245_v20 = vmax.f32 %v5097_v40, 0.0 }
 0x103   :  { %v3984_v53 = vpop.f32.mrb[14].mxu0  ;;  %v4008_v54 = vpop.f32.mrb[14].mxu1  ;;  %v5248_v29 = vmax.f32 %v5103_v45, 0.0  ;;  %v5296_v31 = vmax.f32 %v5106_v46, 0.0 }
 0x104   :  { %587 = vadd.xlane.f32.xlu0 %v553_v47  ;;  %589 = vadd.xlane.f32.xlu1 %v554_v48  ;;  %v5117_v56 = vadd.f32 %v3984_v53, %v5002_v44  ;;  %v333_v57 = vpop.f32.mrb[15].mxu0  ;;  %v5120_v59 = vadd.f32 %v4008_v54, %v5002_v44  ;;  %v413_v60 = vpop.f32.mrb[15].mxu1  ;;  %v4353_v47 = vpack.c.bf16 %v960_v43, %v959_v41  ;;  %v961_v54 = vld [vmem:[%s7246_s5 + $0x70] sm:$0xff] }
 0x105   :  { %v5129_v3 = vadd.f32 %v5002_v44, %v333_v57  ;;  %v5132_v63 = vadd.f32 %v5002_v44, %v413_v60  ;;  %4348 = vmatpush3.bf16.msra.mxu1 %v4345_v26  ;;  %v571_v48 = vmul.f32 %v5154_v25, %v5154_v25  ;;  %v374_v53 = vadd.f32 %v5002_v44, %v5040_v8 }
 0x106   :  { %4350 = vmatprep.subr.bf16.mxu1 %v4349_v35  ;;  %v4357_v57 = vpack.c.bf16 %v962_v55, %v961_v54  ;;  %v5204_v60 = vmax.f32 %v379_v50, 0.0  ;;  %v557_v44 = vmul.f32 %v5192_v7, %v5192_v7  ;;  %v564_v23 = vmul.f32 %v5245_v20, %v5245_v20  ;;  %7272 = vst [vmem:[#allocation6_spill] sm:$0xff] %v5296_v31 }
 0x107   :  { %v5206_v2 = vmax.f32 %v374_v53, 0.0  ;;  %v5257_v62 = vmax.f32 %v5117_v56, 0.0  ;;  %v5260_v40 = vmax.f32 %v5129_v3, 0.0  ;;  %v5269_v26 = vmax.f32 %v5056_v19, 0.0 }
 0x108   :  { %619 = vadd.xlane.f32.xlu0 %v569_v6  ;;  %621 = vadd.xlane.f32.xlu1 %v570_v9  ;;  %v574_v61 = vmul.f32 %v5204_v60, %v5204_v60  ;;  %v5221_v6 = vmax.f32 %v5053_v17, 0.0  ;;  %v5224_v9 = vmax.f32 %v5059_v21, 0.0  ;;  %v5236_v17 = vmax.f32 %v5083_v33, 0.0 }
 0x109   :  { %4352 = vmatpush3.bf16.msra.mxu1 %v4349_v35  ;;  %v573_v8 = vmul.f32 %v5206_v2, %v5206_v2  ;;  %v563_v33 = vmul.f32 %v5248_v29, %v5248_v29  ;;  %v565_v45 = vmul.f32 %v5260_v40, %v5260_v40  ;;  %v566_v0 = vmul.f32 %v5257_v62, %v5257_v62 }
 0x10a   :  { %4354 = vmatprep.subr.bf16.mxu1 %v4353_v47  ;;  %v559_v10 = vmul.f32 %v5224_v9, %v5224_v9  ;;  %v560_v14 = vmul.f32 %v5221_v6, %v5221_v6  ;;  %v561_v21 = vmul.f32 %v5236_v17, %v5236_v17  ;;  %v5272_v56 = vmax.f32 %v5062_v22, 0.0 }
 0x10b   :  { %v576_v30 = vmul.f32 %v5269_v26, %v5269_v26  ;;  %v5284_v19 = vmax.f32 %v5086_v34, 0.0  ;;  %v578_v35 = vmul.f32 %v5281_v32, %v5281_v32  ;;  %v579_v34 = vmul.f32 %v5296_v31, %v5296_v31 }
 0x10c   :  { %462 = vadd.xlane.f32.xlu0 %v5140_v13  ;;  %464 = vadd.xlane.f32.xlu1 %v5138_v12  ;;  %v575_v3 = vmul.f32 %v5272_v56, %v5272_v56  ;;  %v5305_v38 = vmax.f32 %v5120_v59, 0.0 }
 0x10d   :  { %4356 = vmatpush3.bf16.msra.mxu1 %v4353_v47  ;;  %v577_v22 = vmul.f32 %v5284_v19, %v5284_v19 }
 0x10e   :  { %4358 = vmatprep.subr.bf16.mxu1 %v4357_v57  ;;  %7273 = vst [vmem:[#allocation7_spill] sm:$0xff] %v5305_v38  ;;  %v582_v39 = vmul.f32 %v5305_v38, %v5305_v38 }
 0x110   :  { %494 = vadd.xlane.f32.xlu0 %v5154_v25  ;;  %496 = vadd.xlane.f32.xlu1 %v5152_v24 }
 0x111   :  { %4360 = vmatpush3.bf16.msra.mxu1 %v4357_v57 }
 0x114   :  { %591 = vadd.xlane.f32.xlu0 %v555_v36  ;;  %593 = vadd.xlane.f32.xlu1 %v556_v37  ;;  %v5293_v36 = vmax.f32 %v5100_v42, 0.0  ;;  %v5308_v42 = vmax.f32 %v5132_v63, 0.0 }
 0x116   :  { %7271 = vst [vmem:[#allocation5_spill] sm:$0xff] %v5293_v36  ;;  %v580_v37 = vmul.f32 %v5293_v36, %v5293_v36  ;;  %7274 = vst [vmem:[#allocation8_spill] sm:$0xff] %v5308_v42  ;;  %v581_v46 = vmul.f32 %v5308_v42, %v5308_v42 }
 0x118   :  { %623 = vadd.xlane.f32.xlu0 %v571_v48  ;;  %625 = vadd.xlane.f32.xlu1 %v572_v49 }
 0x11c   :  { %466 = vadd.xlane.f32.xlu0 %v5192_v7  ;;  %468 = vadd.xlane.f32.xlu1 %v5190_v4 }
 0x120   :  { %498 = vadd.xlane.f32.xlu0 %v5206_v2  ;;  %500 = vadd.xlane.f32.xlu1 %v5204_v60 }
 0x124   :  { %595 = vadd.xlane.f32.xlu0 %v557_v44  ;;  %597 = vadd.xlane.f32.xlu1 %v558_v5 }
 0x128   :  { %627 = vadd.xlane.f32.xlu0 %v573_v8  ;;  %629 = vadd.xlane.f32.xlu1 %v574_v61 }
 0x12c   :  { %470 = vadd.xlane.f32.xlu0 %v5224_v9  ;;  %472 = vadd.xlane.f32.xlu1 %v5221_v6 }
 0x130   :  { %599 = vadd.xlane.f32.xlu0 %v559_v10  ;;  %601 = vadd.xlane.f32.xlu1 %v560_v14 }
 0x134   :  { %474 = vadd.xlane.f32.xlu0 %v5236_v17  ;;  %476 = vadd.xlane.f32.xlu1 %v5233_v16 }
 0x138   :  { %603 = vadd.xlane.f32.xlu0 %v561_v21  ;;  %605 = vadd.xlane.f32.xlu1 %v562_v18 }
 0x13c   :  { %478 = vadd.xlane.f32.xlu0 %v5248_v29  ;;  %480 = vadd.xlane.f32.xlu1 %v5245_v20 }
 0x140   :  { %607 = vadd.xlane.f32.xlu0 %v563_v33  ;;  %609 = vadd.xlane.f32.xlu1 %v564_v23 }
 0x144   :  { %482 = vadd.xlane.f32.xlu0 %v5260_v40  ;;  %484 = vadd.xlane.f32.xlu1 %v5257_v62 }
 0x148   :  { %611 = vadd.xlane.f32.xlu0 %v565_v45  ;;  %613 = vadd.xlane.f32.xlu1 %v566_v0 }
 0x14c   :  { %502 = vadd.xlane.f32.xlu0 %v5272_v56  ;;  %504 = vadd.xlane.f32.xlu1 %v5269_v26 }
 0x150   :  { %631 = vadd.xlane.f32.xlu0 %v575_v3  ;;  %633 = vadd.xlane.f32.xlu1 %v576_v30 }
 0x154   :  { %506 = vadd.xlane.f32.xlu0 %v5284_v19  ;;  %508 = vadd.xlane.f32.xlu1 %v5281_v32 }
 0x158   :  { %635 = vadd.xlane.f32.xlu0 %v577_v22  ;;  %637 = vadd.xlane.f32.xlu1 %v578_v35 }
 0x15c   :  { %510 = vadd.xlane.f32.xlu0 %v5296_v31  ;;  %512 = vadd.xlane.f32.xlu1 %v5293_v36 }
 0x160   :  { %639 = vadd.xlane.f32.xlu0 %v579_v34  ;;  %641 = vadd.xlane.f32.xlu1 %v580_v37 }
 0x164   :  { %514 = vadd.xlane.f32.xlu0 %v5308_v42  ;;  %516 = vadd.xlane.f32.xlu1 %v5305_v38 }
 0x168   :  { %643 = vadd.xlane.f32.xlu0 %v581_v46  ;;  %645 = vadd.xlane.f32.xlu1 %v582_v39 }
 0x179   :  { %v5316_v41 = vpop.xlane.xlu1 %488  ;;  %v457_v59 = vpop.xlane.xlu0 %456 }
 0x17a   :  { %v520_v43 = vmul.f32 0.0078125, %v457_v59 }
 0x17c   :  { %v680_v49 = vmul.f32 %v520_v43, %v520_v43  ;;  %v744_v39 = vsub.f32 %v5006_v51, %v520_v43 }
 0x17d   :  { %v586_v63 = vpop.xlane.xlu1 %585  ;;  %v455_v47 = vpop.xlane.xlu0 %454 }
 0x17e   :  { %v648_v48 = vmul.f32 0.0078125, %v586_v63  ;;  %v519_v55 = vmul.f32 0.0078125, %v455_v47 }
 0x180   :  { %v712_v50 = vsub.f32 %v648_v48, %v680_v49  ;;  %v679_v8 = vmul.f32 %v519_v55, %v519_v55 }
 0x181   :  { %v5318_v53 = vpop.xlane.xlu1 %617  ;;  %v5320_v54 = vpop.xlane.xlu0 %486 }
 0x182   :  { %v776_v57 = vadd.f32 1e-05, %v712_v50  ;;  %v743_v50 = vsub.f32 %v5013_v58, %v519_v55 }
 0x184   :  { %4452 = vrsqrt.f32 %v776_v57 }
 0x185   :  { %v5322_v44 = vpop.xlane.xlu0 %615  ;;  %v584_v5 = vpop.xlane.xlu1 %583 }
 0x186   :  { %v647_v61 = vmul.f32 0.0078125, %v584_v5 }
 0x188   :  { %v711_v10 = vsub.f32 %v647_v61, %v679_v8  ;;  %v5337_v61 = vld [vmem:[%s7244_s3] ss:$0 sm:$0xff] }
 0x189   :  { %v459_v14 = vpop.xlane.xlu0 %458  ;;  %v461_v21 = vpop.xlane.xlu1 %460 }
 0x18a   :  { %v775_v18 = vadd.f32 1e-05, %v711_v10  ;;  %v521_v45 = vmul.f32 0.0078125, %v459_v14  ;;  %v522_v0 = vmul.f32 0.0078125, %v461_v21  ;;  %v5343_v21 = vld [vmem:[%s7245_s4] ss:$0 sm:$0xff] }
 0x18c   :  { %4454 = vrsqrt.f32 %v775_v18  ;;  %v681_v22 = vmul.f32 %v521_v45, %v521_v45  ;;  %v682_v35 = vmul.f32 %v522_v0, %v522_v0 }
 0x18d   :  { %v5324_v33 = vpop.xlane.xlu0 %490  ;;  %v5326_v23 = vpop.xlane.xlu1 %492 }
 0x18e   :  { %v4453_v46 = vpop.eup %4452 }
 0x18f   :  { %v840_v49 = vmul.f32 %v4453_v46, %v744_v39 }
 0x191   :  { %v588_v3 = vpop.xlane.xlu0 %587  ;;  %v590_v30 = vpop.xlane.xlu1 %589  ;;  %v878_v14 = vmul.f32 %v5337_v61, %v840_v49 }
 0x192   :  { %v649_v34 = vmul.f32 0.0078125, %v588_v3  ;;  %v650_v37 = vmul.f32 0.0078125, %v590_v30 }
 0x194   :  { %v713_v59 = vsub.f32 %v649_v34, %v681_v22  ;;  %v714_v63 = vsub.f32 %v650_v37, %v682_v35  ;;  %v916_v35 = vadd.f32 %v5343_v21, %v878_v14  ;;  %v745_v34 = vsub.f32 %v5049_v15, %v521_v45 }
 0x195   :  { %v5329_v47 = vpop.xlane.xlu0 %619  ;;  %v5331_v48 = vpop.xlane.xlu1 %621  ;;  %v746_v37 = vsub.f32 %v5046_v11, %v522_v0 }
 0x196   :  { %v777_v57 = vadd.f32 1e-05, %v713_v59  ;;  %v778_v5 = vadd.f32 1e-05, %v714_v63  ;;  %v4455_v8 = vpop.eup %4454 }
 0x197   :  { %v839_v10 = vmul.f32 %v4455_v8, %v743_v50 }
 0x198   :  { %4456 = vrsqrt.f32 %v777_v57 }
 0x199   :  { %4458 = vrsqrt.f32 %v778_v5  ;;  %v463_v51 = vpop.xlane.xlu0 %462  ;;  %v465_v43 = vpop.xlane.xlu1 %464  ;;  %v877_v58 = vmul.f32 %v5337_v61, %v839_v10 }
 0x19a   :  { %v523_v30 = vmul.f32 0.0078125, %v463_v51  ;;  %v524_v22 = vmul.f32 0.0078125, %v465_v43 }
 0x19b   :  { %v915_v18 = vadd.f32 %v5343_v21, %v877_v58 }
 0x19c   :  { %v683_v63 = vmul.f32 %v523_v30, %v523_v30  ;;  %v684_v49 = vmul.f32 %v524_v22, %v524_v22 }
 0x19d   :  { %v5346_v55 = vpop.xlane.xlu0 %494  ;;  %v5349_v3 = vpop.xlane.xlu1 %496  ;;  %4041 = vmatprep.mubr.f32.mxu1 %v915_v18 }
 0x19e   :  { %4042 = vmatmul.mubr.f32.vlgmr.msra.gmra.mrb[16].mxu1 %v916_v35 }
 0x1a1   :  { %v592_v46 = vpop.xlane.xlu0 %591  ;;  %v594_v39 = vpop.xlane.xlu1 %593 }
 0x1a2   :  { %v4457_v59 = vpop.eup %4456  ;;  %v651_v50 = vmul.f32 0.0078125, %v592_v46  ;;  %v652_v57 = vmul.f32 0.0078125, %v594_v39 }
 0x1a3   :  { %v4459_v5 = vpop.eup %4458  ;;  %v841_v8 = vmul.f32 %v4457_v59, %v745_v34 }
 0x1a4   :  { %v715_v10 = vsub.f32 %v651_v50, %v683_v63  ;;  %v716_v51 = vsub.f32 %v652_v57, %v684_v49  ;;  %v842_v43 = vmul.f32 %v4459_v5, %v746_v37  ;;  %v747_v49 = vsub.f32 %v5140_v13, %v523_v30 }
 0x1a5   :  { %v5354_v58 = vpop.xlane.xlu0 %623  ;;  %v5356_v14 = vpop.xlane.xlu1 %625  ;;  %v879_v15 = vmul.f32 %v5337_v61, %v841_v8  ;;  %v748_v50 = vsub.f32 %v5138_v12, %v524_v22 }
 0x1a6   :  { %v779_v45 = vadd.f32 1e-05, %v715_v10  ;;  %v780_v11 = vadd.f32 1e-05, %v716_v51  ;;  %v880_v18 = vmul.f32 %v5337_v61, %v842_v43 }
 0x1a7   :  { %v917_v0 = vadd.f32 %v5343_v21, %v879_v15 }
 0x1a8   :  { %4460 = vrsqrt.f32 %v779_v45  ;;  %v918_v46 = vadd.f32 %v5343_v21, %v880_v18 }
 0x1a9   :  { %4462 = vrsqrt.f32 %v780_v11  ;;  %v467_v35 = vpop.xlane.xlu0 %466  ;;  %4044 = vmatprep.mubr.f32.mxu1 %v917_v0  ;;  %v469_v34 = vpop.xlane.xlu1 %468 }
 0x1aa   :  { %4045 = vmatmul.mubr.f32.gmra.mrb[18].mxu1 %v918_v46  ;;  %v525_v59 = vmul.f32 0.0078125, %v467_v35  ;;  %v5366_v63 = vmul.f32 0.0078125, %v469_v34 }
 0x1ac   :  { %v685_v10 = vmul.f32 %v525_v59, %v525_v59  ;;  %v686_v51 = vmul.f32 %v5366_v63, %v5366_v63 }
 0x1ad   :  { %v5362_v37 = vpop.xlane.xlu0 %498  ;;  %v5364_v39 = vpop.xlane.xlu1 %500 }
 0x1b1   :  { %v596_v57 = vpop.xlane.xlu0 %595  ;;  %v598_v5 = vpop.xlane.xlu1 %597 }
 0x1b2   :  { %v4461_v8 = vpop.eup %4460  ;;  %v653_v43 = vmul.f32 0.0078125, %v596_v57  ;;  %v654_v15 = vmul.f32 0.0078125, %v598_v5  ;;  %v5380_v57 = vmul.f32 0.0078125, %v5316_v41 }
 0x1b3   :  { %v4463_v45 = vpop.eup %4462  ;;  %v843_v11 = vmul.f32 %v4461_v8, %v747_v49 }
 0x1b4   :  { %v717_v0 = vsub.f32 %v653_v43, %v685_v10  ;;  %v718_v18 = vsub.f32 %v654_v15, %v686_v51  ;;  %v844_v35 = vmul.f32 %v4463_v45, %v748_v50  ;;  %v664_v51 = vmul.f32 0.0078125, %v5318_v53 }
 0x1b5   :  { %v5372_v34 = vpop.xlane.xlu0 %627  ;;  %v5374_v46 = vpop.xlane.xlu1 %629  ;;  %v881_v12 = vmul.f32 %v5337_v61, %v843_v11  ;;  %v696_v43 = vmul.f32 %v5380_v57, %v5380_v57  ;;  %v749_v53 = vsub.f32 %v5192_v7, %v525_v59 }
 0x1b6   :  { %v781_v13 = vadd.f32 1e-05, %v717_v0  ;;  %v782_v30 = vadd.f32 1e-05, %v718_v18  ;;  %v882_v38 = vmul.f32 %v5337_v61, %v844_v35  ;;  %v5395_v35 = vmul.f32 0.0078125, %v5320_v54 }
 0x1b7   :  { %v919_v22 = vadd.f32 %v5343_v21, %v881_v12  ;;  %v728_v18 = vsub.f32 %v664_v51, %v696_v43  ;;  %v5404_v51 = vmul.f32 0.0078125, %v5324_v33  ;;  %v750_v54 = vsub.f32 %v5190_v4, %v5366_v63 }
 0x1b8   :  { %4464 = vrsqrt.f32 %v781_v13  ;;  %v920_v5 = vadd.f32 %v5343_v21, %v882_v38  ;;  %v695_v59 = vmul.f32 %v5395_v35, %v5395_v35 }
 0x1b9   :  { %4466 = vrsqrt.f32 %v782_v30  ;;  %v471_v49 = vpop.xlane.xlu0 %470  ;;  %4047 = vmatprep.mubr.f32.mxu1 %v919_v22  ;;  %v473_v50 = vpop.xlane.xlu1 %472  ;;  %v792_v7 = vadd.f32 1e-05, %v728_v18 }
 0x1ba   :  { %v5383_v8 = vmul.f32 0.0078125, %v471_v49  ;;  %v5385_v10 = vmul.f32 0.0078125, %v473_v50  ;;  %4048 = vmatmul.mubr.f32.gmra.mrb[20].mxu1 %v920_v5 }
 0x1bc   :  { %v687_v41 = vmul.f32 %v5383_v8, %v5383_v8  ;;  %v688_v11 = vmul.f32 %v5385_v10, %v5385_v10 }
 0x1bd   :  { %v600_v15 = vpop.xlane.xlu0 %599  ;;  %v602_v45 = vpop.xlane.xlu1 %601 }
 0x1be   :  { %v655_v0 = vmul.f32 0.0078125, %v600_v15  ;;  %v656_v38 = vmul.f32 0.0078125, %v602_v45  ;;  %v663_v15 = vmul.f32 0.0078125, %v5322_v44  ;;  %v5411_v45 = vmul.f32 0.0078125, %v5326_v23 }
 0x1bf   :  { %v697_v23 = vmul.f32 %v5404_v51, %v5404_v51 }
 0x1c0   :  { %v719_v12 = vsub.f32 %v655_v0, %v687_v41  ;;  %v720_v13 = vsub.f32 %v656_v38, %v688_v11  ;;  %v665_v41 = vmul.f32 0.0078125, %v5329_v47 }
 0x1c1   :  { %v475_v30 = vpop.xlane.xlu0 %474  ;;  %v477_v22 = vpop.xlane.xlu1 %476 }
 0x1c2   :  { %v4465_v49 = vpop.eup %4464  ;;  %v783_v50 = vadd.f32 1e-05, %v719_v12  ;;  %v784_v5 = vadd.f32 1e-05, %v720_v13  ;;  %v5398_v42 = vmul.f32 0.0078125, %v475_v30  ;;  %v5400_v36 = vmul.f32 0.0078125, %v477_v22 }
 0x1c3   :  { %v4467_v31 = vpop.eup %4466  ;;  %v845_v43 = vmul.f32 %v4465_v49, %v749_v53  ;;  %v727_v12 = vsub.f32 %v663_v15, %v695_v59  ;;  %v666_v53 = vmul.f32 0.0078125, %v5331_v48  ;;  %v698_v22 = vmul.f32 %v5411_v45, %v5411_v45 }
 0x1c4   :  { %4468 = vrsqrt.f32 %v783_v50  ;;  %v846_v0 = vmul.f32 %v4467_v31, %v750_v54  ;;  %v689_v4 = vmul.f32 %v5398_v42, %v5398_v42  ;;  %v690_v63 = vmul.f32 %v5400_v36, %v5400_v36 }
 0x1c5   :  { %4470 = vrsqrt.f32 %v784_v5  ;;  %v604_v11 = vpop.xlane.xlu0 %603  ;;  %v606_v44 = vpop.xlane.xlu1 %605  ;;  %v883_v33 = vmul.f32 %v5337_v61, %v845_v43  ;;  %v729_v49 = vsub.f32 %v665_v41, %v697_v23  ;;  %v730_v48 = vsub.f32 %v666_v53, %v698_v22 }
 0x1c6   :  { %v657_v38 = vmul.f32 0.0078125, %v604_v11  ;;  %v658_v18 = vmul.f32 0.0078125, %v606_v44  ;;  %v884_v13 = vmul.f32 %v5337_v61, %v846_v0  ;;  %4472 = vrsqrt.f32 %v792_v7 }
 0x1c7   :  { %v921_v47 = vadd.f32 %v5343_v21, %v883_v33  ;;  %v791_v44 = vadd.f32 1e-05, %v727_v12  ;;  %v793_v33 = vadd.f32 1e-05, %v729_v49  ;;  %v751_v41 = vsub.f32 %v5224_v9, %v5383_v8 }
 0x1c8   :  { %v721_v30 = vsub.f32 %v657_v38, %v689_v4  ;;  %v722_v31 = vsub.f32 %v658_v18, %v690_v63  ;;  %v922_v15 = vadd.f32 %v5343_v21, %v884_v13  ;;  %v752_v0 = vsub.f32 %v5221_v6, %v5385_v10 }
 0x1c9   :  { %v479_v50 = vpop.xlane.xlu0 %478  ;;  %4050 = vmatprep.mubr.f32.mxu1 %v921_v47  ;;  %v481_v5 = vpop.xlane.xlu1 %480  ;;  %v5440_v9 = vmul.f32 0.0078125, %v5346_v55  ;;  %v794_v53 = vadd.f32 1e-05, %v730_v48  ;;  %v667_v55 = vmul.f32 0.0078125, %v5354_v58  ;;  %v754_v58 = vsub.f32 %v5233_v16, %v5400_v36 }
 0x1ca   :  { %v785_v54 = vadd.f32 1e-05, %v721_v30  ;;  %v786_v43 = vadd.f32 1e-05, %v722_v31  ;;  %v5427_v59 = vmul.f32 0.0078125, %v479_v50  ;;  %v5429_v11 = vmul.f32 0.0078125, %v481_v5  ;;  %4051 = vmatmul.mubr.f32.gmra.mrb[22].mxu1 %v922_v15 }
 0x1cb   :  { %v699_v48 = vmul.f32 %v5440_v9, %v5440_v9  ;;  %v5473_v36 = vmul.f32 0.0078125, %v5364_v39  ;;  %v670_v39 = vmul.f32 0.0078125, %v5374_v46 }
 0x1cc   :  { %4474 = vrsqrt.f32 %v785_v54  ;;  %v691_v18 = vmul.f32 %v5427_v59, %v5427_v59  ;;  %v692_v7 = vmul.f32 %v5429_v11, %v5429_v11  ;;  %v5448_v54 = vmul.f32 0.0078125, %v5349_v3 }
 0x1cd   :  { %4476 = vrsqrt.f32 %v786_v43  ;;  %v608_v4 = vpop.xlane.xlu0 %607  ;;  %v610_v63 = vpop.xlane.xlu1 %609  ;;  %v753_v3 = vsub.f32 %v5236_v17, %v5398_v42  ;;  %v731_v16 = vsub.f32 %v667_v55, %v699_v48 }
 0x1ce   :  { %v4469_v38 = vpop.eup %4468  ;;  %v659_v12 = vmul.f32 0.0078125, %v608_v4  ;;  %v660_v23 = vmul.f32 0.0078125, %v610_v63  ;;  %4478 = vrsqrt.f32 %v791_v44  ;;  %v700_v17 = vmul.f32 %v5448_v54, %v5448_v54 }
 0x1cf   :  { %v4471_v47 = vpop.eup %4470  ;;  %v847_v13 = vmul.f32 %v4469_v38, %v751_v41  ;;  %4480 = vrsqrt.f32 %v793_v33  ;;  %v668_v33 = vmul.f32 0.0078125, %v5356_v14  ;;  %v5457_v41 = vmul.f32 0.0078125, %v5362_v37 }
 0x1d0   :  { %v723_v8 = vsub.f32 %v659_v12, %v691_v18  ;;  %v724_v6 = vsub.f32 %v660_v23, %v692_v7  ;;  %v848_v10 = vmul.f32 %v4471_v47, %v752_v0  ;;  %v5459_v0 = vpop.eup %4472  ;;  %v669_v47 = vmul.f32 0.0078125, %v5372_v34 }
 0x1d1   :  { %v483_v30 = vpop.xlane.xlu0 %482  ;;  %v485_v31 = vpop.xlane.xlu1 %484  ;;  %v885_v22 = vmul.f32 %v5337_v61, %v847_v13  ;;  %v795_v34 = vadd.f32 1e-05, %v731_v16 }
 0x1d2   :  { %v787_v49 = vadd.f32 1e-05, %v723_v8  ;;  %v788_v50 = vadd.f32 1e-05, %v724_v6  ;;  %v5443_v5 = vmul.f32 0.0078125, %v483_v30  ;;  %v5445_v15 = vmul.f32 0.0078125, %v485_v31 }
 0x1d3   :  { %v923_v43 = vadd.f32 %v5343_v21, %v885_v22  ;;  %v886_v44 = vmul.f32 %v5337_v61, %v848_v10  ;;  %v732_v30 = vsub.f32 %v668_v33, %v700_v17  ;;  %v702_v33 = vmul.f32 %v5473_v36, %v5473_v36 }
 0x1d4   :  { %4482 = vrsqrt.f32 %v787_v49  ;;  %v693_v14 = vmul.f32 %v5443_v5, %v5443_v5  ;;  %v694_v37 = vmul.f32 %v5445_v15, %v5445_v15 }
 0x1d5   :  { %4484 = vrsqrt.f32 %v788_v50  ;;  %v612_v4 = vpop.xlane.xlu0 %611  ;;  %4053 = vmatprep.mubr.f32.mxu1 %v923_v43  ;;  %v614_v63 = vpop.xlane.xlu1 %613  ;;  %v924_v38 = vadd.f32 %v5343_v21, %v886_v44  ;;  %v701_v50 = vmul.f32 %v5457_v41, %v5457_v41 }
 0x1d6   :  { %v4475_v18 = vpop.eup %4474  ;;  %v661_v7 = vmul.f32 0.0078125, %v612_v4  ;;  %v662_v12 = vmul.f32 0.0078125, %v614_v63  ;;  %4486 = vrsqrt.f32 %v794_v53  ;;  %v755_v4 = vsub.f32 %v5248_v29, %v5427_v59 }
 0x1d7   :  { %v4477_v23 = vpop.eup %4476  ;;  %4054 = vmatmul.mubr.f32.gmra.mrb[24].mxu1 %v924_v38  ;;  %v849_v42 = vmul.f32 %v4475_v18, %v753_v3  ;;  %v796_v29 = vadd.f32 1e-05, %v732_v30  ;;  %v761_v30 = vsub.f32 %v5072_v28, %v5404_v51  ;;  %v757_v51 = vsub.f32 %v5260_v40, %v5443_v5 }
 0x1d8   :  { %v725_v13 = vsub.f32 %v661_v7, %v693_v14  ;;  %v726_v8 = vsub.f32 %v662_v12, %v694_v37  ;;  %v850_v6 = vmul.f32 %v4477_v23, %v754_v58  ;;  %v5476_v10 = vpop.eup %4478  ;;  %v733_v58 = vsub.f32 %v669_v47, %v701_v50 }
 0x1d9   :  { %v503_v31 = vpop.xlane.xlu0 %502  ;;  %v505_v22 = vpop.xlane.xlu1 %504  ;;  %v887_v49 = vmul.f32 %v5337_v61, %v849_v42  ;;  %v734_v37 = vsub.f32 %v670_v39, %v702_v33  ;;  %v756_v7 = vsub.f32 %v5245_v20, %v5429_v11  ;;  %v759_v20 = vsub.f32 %v5027_v1, %v5395_v35 }
 0x1da   :  { %v789_v55 = vadd.f32 1e-05, %v725_v13  ;;  %v790_v43 = vadd.f32 1e-05, %v726_v8  ;;  %v5482_v44 = vpop.eup %4480  ;;  %v5484_v48 = vmul.f32 0.0078125, %v503_v31  ;;  %v888_v53 = vmul.f32 %v5337_v61, %v850_v6 }
 0x1db   :  { %v925_v3 = vadd.f32 %v5343_v21, %v887_v49  ;;  %v5497_v12 = vmul.f32 0.0078125, %v505_v22  ;;  %v797_v16 = vadd.f32 1e-05, %v733_v58  ;;  %v760_v8 = vsub.f32 %v5008_v52, %v5380_v57 }
 0x1dc   :  { %4488 = vrsqrt.f32 %v789_v55  ;;  %v703_v46 = vmul.f32 %v5484_v48, %v5484_v48  ;;  %v926_v18 = vadd.f32 %v5343_v21, %v888_v53  ;;  %v798_v49 = vadd.f32 1e-05, %v734_v37 }
 0x1dd   :  { %4490 = vrsqrt.f32 %v790_v43  ;;  %v632_v63 = vpop.xlane.xlu0 %631  ;;  %4056 = vmatprep.mubr.f32.mxu1 %v925_v3  ;;  %v634_v38 = vpop.xlane.xlu1 %633  ;;  %v704_v42 = vmul.f32 %v5497_v12, %v5497_v12  ;;  %v856_v1 = vmul.f32 %v5459_v0, %v760_v8  ;;  %v855_v58 = vmul.f32 %v5476_v10, %v759_v20 }
 0x1de   :  { %v4483_v14 = vpop.eup %4482  ;;  %v671_v23 = vmul.f32 0.0078125, %v632_v63  ;;  %4492 = vrsqrt.f32 %v795_v34  ;;  %4057 = vmatmul.mubr.f32.gmra.mrb[26].mxu1 %v926_v18  ;;  %v672_v47 = vmul.f32 0.0078125, %v634_v38  ;;  %v762_v18 = vsub.f32 %v5070_v27, %v5411_v45 }
 0x1df   :  { %v4485_v17 = vpop.eup %4484  ;;  %v851_v59 = vmul.f32 %v4483_v14, %v755_v4  ;;  %4494 = vrsqrt.f32 %v796_v29  ;;  %v758_v4 = vsub.f32 %v5257_v62, %v5445_v15  ;;  %v857_v5 = vmul.f32 %v5482_v44, %v761_v30 }
 0x1e0   :  { %v852_v13 = vmul.f32 %v4485_v17, %v756_v7  ;;  %v735_v11 = vsub.f32 %v671_v23, %v703_v46  ;;  %v4487_v55 = vpop.eup %4486  ;;  %4496 = vrsqrt.f32 %v797_v16  ;;  %v736_v35 = vsub.f32 %v672_v47, %v704_v42 }
 0x1e1   :  { %v507_v6 = vpop.xlane.xlu0 %506  ;;  %v509_v31 = vpop.xlane.xlu1 %508  ;;  %v889_v22 = vmul.f32 %v5337_v61, %v851_v59  ;;  %4498 = vrsqrt.f32 %v798_v49  ;;  %v893_v15 = vmul.f32 %v5337_v61, %v855_v58  ;;  %v894_v59 = vmul.f32 %v5337_v61, %v856_v1 }
 0x1e2   :  { %v5508_v50 = vmul.f32 0.0078125, %v507_v6  ;;  %v5510_v39 = vmul.f32 0.0078125, %v509_v31  ;;  %v890_v57 = vmul.f32 %v5337_v61, %v852_v13  ;;  %v799_v34 = vadd.f32 1e-05, %v735_v11 }
 0x1e3   :  { %v927_v52 = vadd.f32 %v5343_v21, %v889_v22  ;;  %v800_v14 = vadd.f32 1e-05, %v736_v35  ;;  %v763_v27 = vsub.f32 %v5154_v25, %v5440_v9  ;;  %v895_v13 = vmul.f32 %v5337_v61, %v857_v5 }
 0x1e4   :  { %v705_v43 = vmul.f32 %v5508_v50, %v5508_v50  ;;  %v706_v28 = vmul.f32 %v5510_v39, %v5510_v39  ;;  %v928_v33 = vadd.f32 %v5343_v21, %v890_v57  ;;  %4500 = vrsqrt.f32 %v799_v34 }
 0x1e5   :  { %v636_v3 = vpop.xlane.xlu0 %635  ;;  %4059 = vmatprep.mubr.f32.mxu1 %v927_v52  ;;  %v638_v53 = vpop.xlane.xlu1 %637  ;;  %v858_v8 = vmul.f32 %v4487_v55, %v762_v18  ;;  %4502 = vrsqrt.f32 %v800_v14  ;;  %v931_v55 = vadd.f32 %v5343_v21, %v893_v15  ;;  %v764_v1 = vsub.f32 %v5152_v24, %v5448_v54 }
 0x1e6   :  { %v4489_v0 = vpop.eup %4488  ;;  %v673_v46 = vmul.f32 0.0078125, %v636_v3  ;;  %v674_v63 = vmul.f32 0.0078125, %v638_v53  ;;  %4060 = vmatmul.mubr.f32.gmra.mrb[28].mxu1 %v928_v33  ;;  %v765_v35 = vsub.f32 %v5206_v2, %v5457_v41  ;;  %v766_v33 = vsub.f32 %v5204_v60, %v5473_v36 }
 0x1e7   :  { %v4491_v38 = vpop.eup %4490  ;;  %v853_v40 = vmul.f32 %v4489_v0, %v757_v51  ;;  %v896_v53 = vmul.f32 %v5337_v61, %v858_v8  ;;  %v768_v15 = vsub.f32 %v5269_v26, %v5497_v12  ;;  %v770_v12 = vsub.f32 %v5281_v32, %v5510_v39  ;;  %v7276_v32 = vld [vmem:[#allocation5_spill] sm:$0xff] }
 0x1e8   :  { %v737_v37 = vsub.f32 %v673_v46, %v705_v43  ;;  %v738_v7 = vsub.f32 %v674_v63, %v706_v28  ;;  %v854_v23 = vmul.f32 %v4491_v38, %v758_v4  ;;  %v4493_v10 = vpop.eup %4492  ;;  %v932_v43 = vadd.f32 %v5343_v21, %v894_v59 }
 0x1e9   :  { %v511_v17 = vpop.xlane.xlu0 %510  ;;  %v513_v29 = vpop.xlane.xlu1 %512  ;;  %v891_v62 = vmul.f32 %v5337_v61, %v853_v40  ;;  %v859_v30 = vmul.f32 %v4493_v10, %v763_v27  ;;  %v933_v28 = vadd.f32 %v5343_v21, %v895_v13  ;;  %v767_v40 = vsub.f32 %v5272_v56, %v5484_v48 }
 0x1ea   :  { %v801_v45 = vadd.f32 1e-05, %v737_v37  ;;  %v5533_v16 = vmul.f32 0.0078125, %v511_v17  ;;  %v5535_v44 = vmul.f32 0.0078125, %v513_v29  ;;  %v892_v47 = vmul.f32 %v5337_v61, %v854_v23  ;;  %v4495_v9 = vpop.eup %4494 }
 0x1eb   :  { %v929_v42 = vadd.f32 %v5343_v21, %v891_v62  ;;  %v802_v20 = vadd.f32 1e-05, %v738_v7  ;;  %v4497_v49 = vpop.eup %4496  ;;  %v897_v54 = vmul.f32 %v5337_v61, %v859_v30  ;;  %v860_v2 = vmul.f32 %v4495_v9, %v764_v1 }
 0x1ec   :  { %v707_v11 = vmul.f32 %v5533_v16, %v5533_v16  ;;  %v708_v25 = vmul.f32 %v5535_v44, %v5535_v44  ;;  %4504 = vrsqrt.f32 %v801_v45  ;;  %v930_v22 = vadd.f32 %v5343_v21, %v892_v47  ;;  %v4499_v51 = vpop.eup %4498 }
 0x1ed   :  { %v640_v6 = vpop.xlane.xlu0 %639  ;;  %4062 = vmatprep.mubr.f32.mxu1 %v929_v42  ;;  %v642_v31 = vpop.xlane.xlu1 %641  ;;  %4506 = vrsqrt.f32 %v802_v20  ;;  %v861_v41 = vmul.f32 %v4497_v49, %v765_v35  ;;  %v862_v18 = vmul.f32 %v4499_v51, %v766_v33  ;;  %v934_v37 = vadd.f32 %v5343_v21, %v896_v53  ;;  %v7277_v51 = vld [vmem:[#allocation8_spill] sm:$0xff]  ;;  %v7278_v33 = vld [vmem:[#allocation7_spill] sm:$0xff] }
 0x1ee   :  { %v675_v52 = vmul.f32 0.0078125, %v640_v6  ;;  %v676_v57 = vmul.f32 0.0078125, %v642_v31  ;;  %4063 = vmatmul.mubr.f32.gmra.mrb[30].mxu1 %v930_v22  ;;  %v4501_v38 = vpop.eup %4500  ;;  %v898_v7 = vmul.f32 %v5337_v61, %v860_v2  ;;  %v935_v48 = vadd.f32 %v5343_v21, %v897_v54 }
 0x1ef   :  { %4065 = vmatprep.mubr.f32.mxu1 %v931_v55  ;;  %v899_v23 = vmul.f32 %v5337_v61, %v861_v41  ;;  %v4503_v10 = vpop.eup %4502  ;;  %v863_v29 = vmul.f32 %v4501_v38, %v767_v40  ;;  %v769_v59 = vsub.f32 %v5284_v19, %v5508_v50  ;;  %v900_v42 = vmul.f32 %v5337_v61, %v862_v18  ;;  %v7275_v50 = vld [vmem:[#allocation6_spill] sm:$0xff] }
 0x1f0   :  { %v739_v34 = vsub.f32 %v675_v52, %v707_v11  ;;  %v740_v3 = vsub.f32 %v676_v57, %v708_v25  ;;  %v936_v47 = vadd.f32 %v5343_v21, %v898_v7  ;;  %v864_v8 = vmul.f32 %v4503_v10, %v768_v15 }
 0x1f1   :  { %v515_v58 = vpop.xlane.xlu0 %514  ;;  %v517_v24 = vpop.xlane.xlu1 %516  ;;  %v937_v13 = vadd.f32 %v5343_v21, %v899_v23  ;;  %v901_v9 = vmul.f32 %v5337_v61, %v863_v29  ;;  %v938_v19 = vadd.f32 %v5343_v21, %v900_v42  ;;  %v771_v6 = vsub.f32 %v7275_v50, %v5533_v16 }
 0x1f2   :  { %v803_v0 = vadd.f32 1e-05, %v739_v34  ;;  %v804_v4 = vadd.f32 1e-05, %v740_v3  ;;  %v5556_v46 = vmul.f32 0.0078125, %v515_v58  ;;  %v5558_v63 = vmul.f32 0.0078125, %v517_v24  ;;  %4066 = vmatmul.mubr.f32.gmra.mrb[32].mxu1 %v932_v43 }
 0x1f3   :  { %4068 = vmatprep.mubr.f32.mxu1 %v933_v28  ;;  %v902_v31 = vmul.f32 %v5337_v61, %v864_v8  ;;  %v939_v49 = vadd.f32 %v5343_v21, %v901_v9  ;;  %v772_v39 = vsub.f32 %v7276_v32, %v5535_v44  ;;  %v3668_v8 = vld [vmem:[%s7246_s5 + $0xa8] sm:$0xff] }
 0x1f4   :  { %4508 = vrsqrt.f32 %v803_v0  ;;  %v709_v60 = vmul.f32 %v5556_v46, %v5556_v46  ;;  %v710_v36 = vmul.f32 %v5558_v63, %v5558_v63  ;;  %v773_v34 = vsub.f32 %v7277_v51, %v5556_v46 }
 0x1f5   :  { %4510 = vrsqrt.f32 %v804_v4  ;;  %v644_v5 = vpop.xlane.xlu0 %643  ;;  %v646_v14 = vpop.xlane.xlu1 %645  ;;  %v940_v1 = vadd.f32 %v5343_v21, %v902_v31  ;;  %v774_v58 = vsub.f32 %v7278_v33, %v5558_v63  ;;  %v5607_v63 = vld [vmem:[%s7247_s6] ss:$0 sm:$0xff]  ;;  %v3672_v31 = vld [vmem:[%s7246_s5 + $0xc8] sm:$0xff] }
 0x1f6   :  { %v677_v17 = vmul.f32 0.0078125, %v644_v5  ;;  %v678_v56 = vmul.f32 0.0078125, %v646_v14  ;;  %v4505_v62 = vpop.eup %4504  ;;  %4069 = vmatmul.mubr.f32.gmra.mrb[34].mxu1 %v934_v37 }
 0x1f7   :  { %4071 = vmatprep.mubr.f32.mxu1 %v935_v48  ;;  %v4507_v20 = vpop.eup %4506  ;;  %v865_v26 = vmul.f32 %v4505_v62, %v769_v59  ;;  %v3664_v48 = vld [vmem:[%s7246_s5 + $0x88] sm:$0xff]  ;;  %v3665_v59 = vld [vmem:[%s7246_s5 + $0x90] sm:$0xff] }
 0x1f8   :  { %v741_v27 = vsub.f32 %v677_v17, %v709_v60  ;;  %v742_v45 = vsub.f32 %v678_v56, %v710_v36  ;;  %v866_v22 = vmul.f32 %v4507_v20, %v770_v12  ;;  %v3663_v56 = vld [vmem:[%s7246_s5 + $0x80] sm:$0xff] }
 0x1f9   :  { %v903_v52 = vmul.f32 %v5337_v61, %v865_v26  ;;  %v4361_v62 = vpack.c.bf16 %v3664_v48, %v3663_v56 }
 0x1fa   :  { %v805_v11 = vadd.f32 1e-05, %v741_v27  ;;  %v806_v25 = vadd.f32 1e-05, %v742_v45  ;;  %4072 = vmatmul.mubr.f32.gmra.mrb[36].mxu1 %v936_v47  ;;  %v904_v16 = vmul.f32 %v5337_v61, %v866_v22  ;;  %v3666_v27 = vld [vmem:[%s7246_s5 + $0x98] sm:$0xff] }
 0x1fb   :  { %4074 = vmatprep.mubr.f32.mxu1 %v937_v13  ;;  %v941_v43 = vadd.f32 %v5343_v21, %v903_v52  ;;  %4362 = vmatprep.subr.bf16.mxu0 %v4361_v62  ;;  %v4365_v42 = vpack.c.bf16 %v3666_v27, %v3665_v59  ;;  %v3667_v13 = vld [vmem:[%s7246_s5 + $0xa0] sm:$0xff]  ;;  %v3673_v52 = vld [vmem:[%s7246_s5 + $0xd0] sm:$0xff] }
 0x1fc   :  { %4512 = vrsqrt.f32 %v805_v11  ;;  %v942_v3 = vadd.f32 %v5343_v21, %v904_v16  ;;  %4364 = vmatpush3.bf16.msra.mxu0 %v4361_v62  ;;  %v4369_v20 = vpack.c.bf16 %v3668_v8, %v3667_v13  ;;  %v3669_v11 = vld [vmem:[%s7246_s5 + $0xb0] sm:$0xff]  ;;  %v3676_v16 = vld [vmem:[%s7246_s5 + $0xe8] sm:$0xff] }
 0x1fd   :  { %4514 = vrsqrt.f32 %v806_v25  ;;  %4366 = vmatprep.subr.bf16.mxu0 %v4365_v42  ;;  %v3670_v25 = vld [vmem:[%s7246_s5 + $0xb8] sm:$0xff] }
 0x1fe   :  { %v4509_v30 = vpop.eup %4508  ;;  %4075 = vmatmul.mubr.f32.gmra.mrb[38].mxu1 %v938_v19  ;;  %v4373_v9 = vpack.c.bf16 %v3670_v25, %v3669_v11 }
 0x1ff   :  { %v4511_v57 = vpop.eup %4510  ;;  %v867_v55 = vmul.f32 %v4509_v30, %v771_v6  ;;  %4077 = vmatprep.mubr.f32.mxu1 %v939_v49  ;;  %v3671_v6 = vld [vmem:[%s7246_s5 + $0xc0] sm:$0xff] }
 0x200   :  { %v868_v35 = vmul.f32 %v4511_v57, %v772_v39  ;;  %4368 = vmatpush3.bf16.msra.mxu0 %v4365_v42  ;;  %v4377_v30 = vpack.c.bf16 %v3672_v31, %v3671_v6  ;;  %v3674_v57 = vld [vmem:[%s7246_s5 + $0xd8] sm:$0xff] }
 0x201   :  { %v905_v28 = vmul.f32 %v5337_v61, %v867_v55  ;;  %4370 = vmatprep.subr.bf16.mxu0 %v4369_v20  ;;  %v4381_v39 = vpack.c.bf16 %v3674_v57, %v3673_v52 }
 0x202   :  { %4078 = vmatmul.mubr.f32.gmra.mrb[40].mxu1 %v940_v1  ;;  %v906_v44 = vmul.f32 %v5337_v61, %v868_v35  ;;  %v3675_v1 = vld [vmem:[%s7246_s5 + $0xe0] sm:$0xff] }
 0x203   :  { %4080 = vmatprep.mubr.f32.mxu1 %v941_v43  ;;  %v943_v24 = vadd.f32 %v5343_v21, %v905_v28  ;;  %v4385_v35 = vpack.c.bf16 %v3676_v16, %v3675_v1  ;;  %v3677_v43 = vld [vmem:[%s7246_s5 + $0xf0] sm:$0xff]  ;;  %v3678_v28 = vld [vmem:[%s7246_s5 + $0xf8] sm:$0xff] }
 0x204   :  { %v944_v0 = vadd.f32 %v5343_v21, %v906_v44  ;;  %4372 = vmatpush3.bf16.msra.mxu0 %v4369_v20  ;;  %v4389_v51 = vpack.c.bf16 %v3678_v28, %v3677_v43 }
 0x205   :  { %4374 = vmatprep.subr.bf16.mxu0 %v4373_v9 }
 0x206   :  { %v4513_v53 = vpop.eup %4512  ;;  %4081 = vmatmul.mubr.f32.gmra.mrb[42].mxu1 %v942_v3 }
 0x207   :  { %v4515_v54 = vpop.eup %4514  ;;  %v869_v2 = vmul.f32 %v4513_v53, %v773_v34  ;;  %4083 = vmatprep.mubr.f32.mxu1 %v943_v24 }
 0x208   :  { %v870_v41 = vmul.f32 %v4515_v54, %v774_v58  ;;  %4376 = vmatpush3.bf16.msra.mxu0 %v4373_v9 }
 0x209   :  { %v907_v4 = vmul.f32 %v5337_v61, %v869_v2  ;;  %4378 = vmatprep.subr.bf16.mxu0 %v4377_v30 }
 0x20a   :  { %v908_v46 = vmul.f32 %v5337_v61, %v870_v41  ;;  %4084 = vmatmul.mubr.f32.gmra.mrb[44].mxu1 %v944_v0 }
 0x20b   :  { %v945_v38 = vadd.f32 %v5343_v21, %v907_v4 }
 0x20c   :  { %v946_v18 = vadd.f32 %v5343_v21, %v908_v46  ;;  %4380 = vmatpush3.bf16.msra.mxu0 %v4377_v30 }
 0x20d   :  { %4086 = vmatprep.mubr.f32.mxu1 %v945_v38  ;;  %4382 = vmatprep.subr.bf16.mxu0 %v4381_v39 }
 0x20e   :  { %4087 = vmatmul.mubr.f32.gmra.mrb[46].mxu1 %v946_v18 }
 0x210   :  { %4384 = vmatpush3.bf16.msra.mxu0 %v4381_v39 }
 0x211   :  { %4386 = vmatprep.subr.bf16.mxu0 %v4385_v35 }
 0x214   :  { %4388 = vmatpush3.bf16.msra.mxu0 %v4385_v35 }
 0x215   :  { %4390 = vmatprep.subr.bf16.mxu0 %v4389_v51 }
 0x218   :  { %4392 = vmatpush3.bf16.msra.mxu0 %v4389_v51 }
 0x271   :  { %v4043_v40 = vpop.f32.mrb[16].mxu1 }
 0x272   :  { %v1044_v60 = vadd.f32 %v4043_v40, %v5607_v63  ;;  %v1038_v36 = vpop.f32.mrb[17].mxu1 }
 0x273   :  { %v1039_v5 = vadd.f32 %v5607_v63, %v1038_v36 }
 0x274   :  { %v5611_v14 = vmax.f32 %v1044_v60, 0.0 }
 0x275   :  { %v5613_v61 = vmax.f32 %v1039_v5, 0.0 }
 0x276   :  { %1231 = vadd.xlane.f32.xlu1 %v5611_v14  ;;  %v1326_v21 = vmul.f32 %v5611_v14, %v5611_v14 }
 0x277   :  { %1229 = vadd.xlane.f32.xlu0 %v5613_v61  ;;  %v1325_v37 = vmul.f32 %v5613_v61, %v5613_v61 }
 0x27a   :  { %1359 = vadd.xlane.f32.xlu1 %v1326_v21 }
 0x27b   :  { %1357 = vadd.xlane.f32.xlu0 %v1325_v37 }
 0x27d   :  { %v4046_v7 = vpop.f32.mrb[18].mxu1 }
 0x27e   :  { %v1054_v23 = vadd.f32 %v4046_v7, %v5607_v63  ;;  %v1048_v10 = vpop.f32.mrb[19].mxu1 }
 0x27f   :  { %v1049_v17 = vadd.f32 %v5607_v63, %v1048_v10 }
 0x280   :  { %v5629_v29 = vmax.f32 %v1054_v23, 0.0 }
 0x281   :  { %v5631_v15 = vmax.f32 %v1049_v17, 0.0 }
 0x282   :  { %1235 = vadd.xlane.f32.xlu1 %v5629_v29  ;;  %v1328_v45 = vmul.f32 %v5629_v29, %v5629_v29 }
 0x283   :  { %1233 = vadd.xlane.f32.xlu0 %v5631_v15  ;;  %v1327_v47 = vmul.f32 %v5631_v15, %v5631_v15 }
 0x286   :  { %1363 = vadd.xlane.f32.xlu1 %v1328_v45 }
 0x287   :  { %1361 = vadd.xlane.f32.xlu0 %v1327_v47 }
 0x28d   :  { %v4049_v26 = vpop.f32.mrb[20].mxu1 }
 0x28e   :  { %v1064_v12 = vadd.f32 %v4049_v26, %v5607_v63  ;;  %v1058_v19 = vpop.f32.mrb[21].mxu1 }
 0x28f   :  { %v1059_v50 = vadd.f32 %v5607_v63, %v1058_v19 }
 0x290   :  { %v5665_v22 = vmax.f32 %v1064_v12, 0.0 }
 0x291   :  { %v5667_v49 = vmax.f32 %v1059_v50, 0.0 }
 0x292   :  { %1239 = vadd.xlane.f32.xlu1 %v5665_v22  ;;  %v1330_v32 = vmul.f32 %v5665_v22, %v5665_v22 }
 0x293   :  { %1237 = vadd.xlane.f32.xlu0 %v5667_v49  ;;  %v1329_v55 = vmul.f32 %v5667_v49, %v5667_v49 }
 0x296   :  { %1367 = vadd.xlane.f32.xlu1 %v1330_v32 }
 0x297   :  { %1365 = vadd.xlane.f32.xlu0 %v1329_v55 }
 0x29d   :  { %v4052_v34 = vpop.f32.mrb[22].mxu1 }
 0x29e   :  { %v1074_v3 = vadd.f32 %v4052_v34, %v5607_v63  ;;  %v1068_v44 = vpop.f32.mrb[23].mxu1 }
 0x29f   :  { %v1069_v53 = vadd.f32 %v5607_v63, %v1068_v44 }
 0x2a0   :  { %v5695_v33 = vmax.f32 %v1074_v3, 0.0 }
 0x2a1   :  { %v5697_v58 = vmax.f32 %v1069_v53, 0.0 }
 0x2a2   :  { %1243 = vadd.xlane.f32.xlu1 %v5695_v33  ;;  %v1332_v24 = vmul.f32 %v5695_v33, %v5695_v33 }
 0x2a3   :  { %1241 = vadd.xlane.f32.xlu0 %v5697_v58  ;;  %v1331_v54 = vmul.f32 %v5697_v58, %v5697_v58 }
 0x2a6   :  { %1371 = vadd.xlane.f32.xlu1 %v1332_v24 }
 0x2a7   :  { %1369 = vadd.xlane.f32.xlu0 %v1331_v54 }
 0x2aa   :  { %v4055_v2 = vpop.f32.mrb[24].mxu1 }
 0x2ab   :  { %v1084_v41 = vadd.f32 %v4055_v2, %v5607_v63  ;;  %v1078_v0 = vpop.f32.mrb[25].mxu1 }
 0x2ac   :  { %v1079_v4 = vadd.f32 %v5607_v63, %v1078_v0 }
 0x2ad   :  { %v5707_v46 = vmax.f32 %v1084_v41, 0.0 }
 0x2ae   :  { %v5709_v38 = vmax.f32 %v1079_v4, 0.0 }
 0x2af   :  { %1247 = vadd.xlane.f32.xlu1 %v5707_v46  ;;  %v1334_v18 = vmul.f32 %v5707_v46, %v5707_v46 }
 0x2b0   :  { %1245 = vadd.xlane.f32.xlu0 %v5709_v38  ;;  %v1333_v60 = vmul.f32 %v5709_v38, %v5709_v38 }
 0x2b1   :  { %v4058_v40 = vpop.f32.mrb[26].mxu1 }
 0x2b2   :  { %v1094_v36 = vadd.f32 %v4058_v40, %v5607_v63  ;;  %v1088_v5 = vpop.f32.mrb[27].mxu1 }
 0x2b3   :  { %1375 = vadd.xlane.f32.xlu1 %v1334_v18  ;;  %v1089_v21 = vadd.f32 %v5607_v63, %v1088_v5 }
 0x2b4   :  { %1373 = vadd.xlane.f32.xlu0 %v1333_v60  ;;  %v5719_v37 = vmax.f32 %v1094_v36, 0.0 }
 0x2b5   :  { %v5721_v7 = vmax.f32 %v1089_v21, 0.0 }
 0x2b6   :  { %v1336_v23 = vmul.f32 %v5719_v37, %v5719_v37 }
 0x2b7   :  { %1251 = vadd.xlane.f32.xlu1 %v5719_v37  ;;  %v1335_v17 = vmul.f32 %v5721_v7, %v5721_v7 }
 0x2b8   :  { %1249 = vadd.xlane.f32.xlu0 %v5721_v7 }
 0x2b9   :  { %v4061_v10 = vpop.f32.mrb[28].mxu1 }
 0x2ba   :  { %v1104_v56 = vadd.f32 %v4061_v10, %v5607_v63  ;;  %v1098_v48 = vpop.f32.mrb[29].mxu1 }
 0x2bb   :  { %1379 = vadd.xlane.f32.xlu1 %v1336_v23  ;;  %v1099_v62 = vadd.f32 %v5607_v63, %v1098_v48 }
 0x2bc   :  { %1377 = vadd.xlane.f32.xlu0 %v1335_v17  ;;  %v5731_v59 = vmax.f32 %v1104_v56, 0.0 }
 0x2bd   :  { %v5733_v27 = vmax.f32 %v1099_v62, 0.0 }
 0x2be   :  { %v1338_v45 = vmul.f32 %v5731_v59, %v5731_v59 }
 0x2bf   :  { %1255 = vadd.xlane.f32.xlu1 %v5731_v59  ;;  %v1337_v47 = vmul.f32 %v5733_v27, %v5733_v27 }
 0x2c0   :  { %1253 = vadd.xlane.f32.xlu0 %v5733_v27 }
 0x2c1   :  { %v4064_v42 = vpop.f32.mrb[30].mxu1 }
 0x2c2   :  { %v1114_v13 = vadd.f32 %v4064_v42, %v5607_v63  ;;  %v1108_v8 = vpop.f32.mrb[31].mxu1 }
 0x2c3   :  { %1383 = vadd.xlane.f32.xlu1 %v1338_v45  ;;  %v1109_v20 = vadd.f32 %v5607_v63, %v1108_v8 }
 0x2c4   :  { %1381 = vadd.xlane.f32.xlu0 %v1337_v47  ;;  %v5743_v11 = vmax.f32 %v1114_v13, 0.0 }
 0x2c5   :  { %v5745_v25 = vmax.f32 %v1109_v20, 0.0  ;;  %v4067_v9 = vpop.f32.mrb[32].mxu1 }
 0x2c6   :  { %v1118_v26 = vpop.f32.mrb[33].mxu1  ;;  %v1124_v12 = vadd.f32 %v4067_v9, %v5607_v63  ;;  %v1340_v19 = vmul.f32 %v5743_v11, %v5743_v11 }
 0x2c7   :  { %1259 = vadd.xlane.f32.xlu1 %v5743_v11  ;;  %v1119_v50 = vadd.f32 %v5607_v63, %v1118_v26  ;;  %v1339_v31 = vmul.f32 %v5745_v25, %v5745_v25 }
 0x2c8   :  { %1257 = vadd.xlane.f32.xlu0 %v5745_v25  ;;  %v5755_v52 = vmax.f32 %v1124_v12, 0.0 }
 0x2c9   :  { %v4070_v6 = vpop.f32.mrb[34].mxu1  ;;  %v5757_v57 = vmax.f32 %v1119_v50, 0.0 }
 0x2ca   :  { %v1128_v30 = vpop.f32.mrb[35].mxu1  ;;  %v1134_v55 = vadd.f32 %v4070_v6, %v5607_v63  ;;  %v1342_v1 = vmul.f32 %v5755_v52, %v5755_v52 }
 0x2cb   :  { %1387 = vadd.xlane.f32.xlu1 %v1340_v19  ;;  %v1129_v16 = vadd.f32 %v5607_v63, %v1128_v30  ;;  %v1341_v43 = vmul.f32 %v5757_v57, %v5757_v57 }
 0x2cc   :  { %1385 = vadd.xlane.f32.xlu0 %v1339_v31  ;;  %v5767_v51 = vmax.f32 %v1134_v55, 0.0 }
 0x2cd   :  { %v4073_v32 = vpop.f32.mrb[36].mxu1  ;;  %v5769_v34 = vmax.f32 %v1129_v16, 0.0 }
 0x2ce   :  { %v1138_v39 = vpop.f32.mrb[37].mxu1  ;;  %v1144_v53 = vadd.f32 %v4073_v32, %v5607_v63  ;;  %v1344_v24 = vmul.f32 %v5767_v51, %v5767_v51 }
 0x2cf   :  { %1263 = vadd.xlane.f32.xlu1 %v5755_v52  ;;  %v1139_v54 = vadd.f32 %v5607_v63, %v1138_v39  ;;  %v1343_v41 = vmul.f32 %v5769_v34, %v5769_v34 }
 0x2d0   :  { %1261 = vadd.xlane.f32.xlu0 %v5757_v57  ;;  %v5779_v4 = vmax.f32 %v1144_v53, 0.0 }
 0x2d1   :  { %v4076_v35 = vpop.f32.mrb[38].mxu1  ;;  %v5781_v18 = vmax.f32 %v1139_v54, 0.0 }
 0x2d2   :  { %v1148_v28 = vpop.f32.mrb[39].mxu1  ;;  %v1154_v36 = vadd.f32 %v4076_v35, %v5607_v63  ;;  %v1346_v5 = vmul.f32 %v5779_v4, %v5779_v4 }
 0x2d3   :  { %1391 = vadd.xlane.f32.xlu1 %v1342_v1  ;;  %v1149_v21 = vadd.f32 %v5607_v63, %v1148_v28  ;;  %v1345_v10 = vmul.f32 %v5781_v18, %v5781_v18 }
 0x2d4   :  { %1389 = vadd.xlane.f32.xlu0 %v1341_v43  ;;  %v5791_v56 = vmax.f32 %v1154_v36, 0.0 }
 0x2d5   :  { %v4079_v3 = vpop.f32.mrb[40].mxu1  ;;  %v5793_v48 = vmax.f32 %v1149_v21, 0.0 }
 0x2d6   :  { %v1158_v44 = vpop.f32.mrb[41].mxu1  ;;  %v1164_v62 = vadd.f32 %v4079_v3, %v5607_v63  ;;  %v1348_v45 = vmul.f32 %v5791_v56, %v5791_v56 }
 0x2d7   :  { %1267 = vadd.xlane.f32.xlu1 %v5767_v51  ;;  %v1159_v42 = vadd.f32 %v5607_v63, %v1158_v44  ;;  %v1347_v47 = vmul.f32 %v5793_v48, %v5793_v48 }
 0x2d8   :  { %1265 = vadd.xlane.f32.xlu0 %v5769_v34  ;;  %v5803_v13 = vmax.f32 %v1164_v62, 0.0 }
 0x2d9   :  { %v4082_v2 = vpop.f32.mrb[42].mxu1  ;;  %v5805_v8 = vmax.f32 %v1159_v42, 0.0 }
 0x2da   :  { %v1168_v0 = vpop.f32.mrb[43].mxu1  ;;  %v1174_v20 = vadd.f32 %v4082_v2, %v5607_v63  ;;  %v1350_v9 = vmul.f32 %v5803_v13, %v5803_v13 }
 0x2db   :  { %1395 = vadd.xlane.f32.xlu1 %v1344_v24  ;;  %v1169_v26 = vadd.f32 %v5607_v63, %v1168_v0  ;;  %v1349_v12 = vmul.f32 %v5805_v8, %v5805_v8 }
 0x2dc   :  { %1393 = vadd.xlane.f32.xlu0 %v1343_v41  ;;  %v5815_v19 = vmax.f32 %v1174_v20, 0.0 }
 0x2dd   :  { %v4085_v40 = vpop.f32.mrb[44].mxu1  ;;  %v5817_v50 = vmax.f32 %v1169_v26, 0.0 }
 0x2de   :  { %v1178_v60 = vpop.f32.mrb[45].mxu1  ;;  %v1184_v6 = vadd.f32 %v4085_v40, %v5607_v63  ;;  %v1352_v31 = vmul.f32 %v5815_v19, %v5815_v19 }
 0x2df   :  { %1271 = vadd.xlane.f32.xlu1 %v5779_v4  ;;  %v1179_v30 = vadd.f32 %v5607_v63, %v1178_v60  ;;  %v1351_v32 = vmul.f32 %v5817_v50, %v5817_v50 }
 0x2e0   :  { %1269 = vadd.xlane.f32.xlu0 %v5781_v18  ;;  %v5827_v39 = vmax.f32 %v1184_v6, 0.0 }
 0x2e1   :  { %v4088_v23 = vpop.f32.mrb[46].mxu1  ;;  %v5829_v55 = vmax.f32 %v1179_v30, 0.0 }
 0x2e2   :  { %v1188_v17 = vpop.f32.mrb[47].mxu1  ;;  %v1194_v1 = vadd.f32 %v4088_v23, %v5607_v63  ;;  %v1354_v16 = vmul.f32 %v5827_v39, %v5827_v39 }
 0x2e3   :  { %1399 = vadd.xlane.f32.xlu1 %v1346_v5  ;;  %v1189_v35 = vadd.f32 %v5607_v63, %v1188_v17  ;;  %v1353_v43 = vmul.f32 %v5829_v55, %v5829_v55 }
 0x2e4   :  { %1397 = vadd.xlane.f32.xlu0 %v1345_v10  ;;  %v5839_v28 = vmax.f32 %v1194_v1, 0.0 }
 0x2e5   :  { %v5841_v44 = vmax.f32 %v1189_v35, 0.0 }
 0x2e6   :  { %v1356_v63 = vmul.f32 %v5839_v28, %v5839_v28 }
 0x2e7   :  { %1275 = vadd.xlane.f32.xlu1 %v5791_v56  ;;  %v1355_v60 = vmul.f32 %v5841_v44, %v5841_v44 }
 0x2e8   :  { %1273 = vadd.xlane.f32.xlu0 %v5793_v48 }
 0x2eb   :  { %1403 = vadd.xlane.f32.xlu1 %v1348_v45 }
 0x2ec   :  { %1401 = vadd.xlane.f32.xlu0 %v1347_v47 }
 0x2ef   :  { %1279 = vadd.xlane.f32.xlu1 %v5803_v13 }
 0x2f0   :  { %1277 = vadd.xlane.f32.xlu0 %v5805_v8 }
 0x2f3   :  { %1407 = vadd.xlane.f32.xlu1 %v1350_v9 }
 0x2f4   :  { %1405 = vadd.xlane.f32.xlu0 %v1349_v12 }
 0x2f7   :  { %1283 = vadd.xlane.f32.xlu1 %v5815_v19 }
 0x2f8   :  { %1281 = vadd.xlane.f32.xlu0 %v5817_v50 }
 0x2fb   :  { %1411 = vadd.xlane.f32.xlu1 %v1352_v31 }
 0x2fc   :  { %1409 = vadd.xlane.f32.xlu0 %v1351_v32 }
 0x2ff   :  { %1287 = vadd.xlane.f32.xlu1 %v5827_v39 }
 0x300   :  { %1285 = vadd.xlane.f32.xlu0 %v5829_v55 }
 0x303   :  { %1415 = vadd.xlane.f32.xlu1 %v1354_v16  ;;  %v1232_v3 = vpop.xlane.xlu1 %1231 }
 0x304   :  { %1413 = vadd.xlane.f32.xlu0 %v1353_v43  ;;  %v1294_v53 = vmul.f32 0.0078125, %v1232_v3  ;;  %v1230_v24 = vpop.xlane.xlu0 %1229 }
 0x305   :  { %v1293_v54 = vmul.f32 0.0078125, %v1230_v24  ;;  %v5854_v24 = vld [vmem:[%s7248_s7] ss:$0 sm:$0xff] }
 0x306   :  { %v1454_v41 = vmul.f32 %v1294_v53, %v1294_v53  ;;  %v1518_v1 = vsub.f32 %v5611_v14, %v1294_v53 }
 0x307   :  { %1291 = vadd.xlane.f32.xlu1 %v5839_v28  ;;  %v1360_v2 = vpop.xlane.xlu1 %1359  ;;  %v1453_v36 = vmul.f32 %v1293_v54, %v1293_v54  ;;  %v1517_v43 = vsub.f32 %v5613_v61, %v1293_v54 }
 0x308   :  { %1289 = vadd.xlane.f32.xlu0 %v5841_v44  ;;  %v1422_v0 = vmul.f32 0.0078125, %v1360_v2  ;;  %v1358_v40 = vpop.xlane.xlu0 %1357 }
 0x309   :  { %v1421_v5 = vmul.f32 0.0078125, %v1358_v40 }
 0x30a   :  { %v1486_v21 = vsub.f32 %v1422_v0, %v1454_v41  ;;  %v5859_v0 = vld [vmem:[%s7249_s8] ss:$0 sm:$0xff] }
 0x30b   :  { %1419 = vadd.xlane.f32.xlu1 %v1356_v63  ;;  %v1485_v23 = vsub.f32 %v1421_v5, %v1453_v36 }
 0x30c   :  { %1417 = vadd.xlane.f32.xlu0 %v1355_v60  ;;  %v1550_v10 = vadd.f32 1e-05, %v1486_v21 }
 0x30d   :  { %v1549_v17 = vadd.f32 1e-05, %v1485_v23 }
 0x30e   :  { %4516 = vrsqrt.f32 %v1550_v10 }
 0x30f   :  { %v1236_v62 = vpop.xlane.xlu1 %1235  ;;  %4518 = vrsqrt.f32 %v1549_v17 }
 0x310   :  { %v1296_v45 = vmul.f32 0.0078125, %v1236_v62  ;;  %v1234_v42 = vpop.xlane.xlu0 %1233 }
 0x311   :  { %v1295_v47 = vmul.f32 0.0078125, %v1234_v42 }
 0x312   :  { %v1456_v9 = vmul.f32 %v1296_v45, %v1296_v45  ;;  %v1520_v21 = vsub.f32 %v5629_v29, %v1296_v45 }
 0x313   :  { %v1364_v20 = vpop.xlane.xlu1 %1363  ;;  %v1455_v6 = vmul.f32 %v1295_v47, %v1295_v47  ;;  %v1519_v17 = vsub.f32 %v5631_v15, %v1295_v47 }
 0x314   :  { %v1424_v26 = vmul.f32 0.0078125, %v1364_v20  ;;  %v1362_v12 = vpop.xlane.xlu0 %1361 }
 0x315   :  { %v1423_v31 = vmul.f32 0.0078125, %v1362_v12 }
 0x316   :  { %v1488_v30 = vsub.f32 %v1424_v26, %v1456_v9 }
 0x317   :  { %v1487_v32 = vsub.f32 %v1423_v31, %v1455_v6 }
 0x318   :  { %v1552_v16 = vadd.f32 1e-05, %v1488_v30  ;;  %v4517_v35 = vpop.eup %4516 }
 0x319   :  { %v1551_v3 = vadd.f32 1e-05, %v1487_v32  ;;  %v4519_v2 = vpop.eup %4518  ;;  %v1614_v63 = vmul.f32 %v4517_v35, %v1518_v1 }
 0x31a   :  { %4520 = vrsqrt.f32 %v1552_v16  ;;  %v1613_v41 = vmul.f32 %v4519_v2, %v1517_v43 }
 0x31b   :  { %4522 = vrsqrt.f32 %v1551_v3  ;;  %v1652_v14 = vmul.f32 %v5854_v24, %v1614_v63 }
 0x31c   :  { %v1651_v61 = vmul.f32 %v5854_v24, %v1613_v41 }
 0x31d   :  { %v1690_v36 = vadd.f32 %v5859_v0, %v1652_v14 }
 0x31e   :  { %v1689_v54 = vadd.f32 %v5859_v0, %v1651_v61 }
 0x31f   :  { %v1240_v53 = vpop.xlane.xlu1 %1239 }
 0x320   :  { %v1298_v40 = vmul.f32 0.0078125, %v1240_v53  ;;  %v1238_v60 = vpop.xlane.xlu0 %1237  ;;  %4121 = vmatprep.mubr.f32.mxu0 %v1689_v54 }
 0x321   :  { %v1297_v5 = vmul.f32 0.0078125, %v1238_v60  ;;  %4122 = vmatmul.mubr.f32.vlgmr.msra.gmra.mrb[16].mxu0 %v1690_v36 }
 0x322   :  { %v1458_v62 = vmul.f32 %v1298_v40, %v1298_v40  ;;  %v1522_v63 = vsub.f32 %v5665_v22, %v1298_v40 }
 0x323   :  { %v1368_v23 = vpop.xlane.xlu1 %1367  ;;  %v1457_v26 = vmul.f32 %v1297_v5, %v1297_v5  ;;  %v1521_v61 = vsub.f32 %v5667_v49, %v1297_v5 }
 0x324   :  { %v4521_v10 = vpop.eup %4520  ;;  %v1426_v42 = vmul.f32 0.0078125, %v1368_v23  ;;  %v1366_v20 = vpop.xlane.xlu0 %1365 }
 0x325   :  { %v4523_v9 = vpop.eup %4522  ;;  %v1425_v12 = vmul.f32 0.0078125, %v1366_v20  ;;  %v1616_v6 = vmul.f32 %v4521_v10, %v1520_v21 }
 0x326   :  { %v1490_v31 = vsub.f32 %v1426_v42, %v1458_v62  ;;  %v1615_v30 = vmul.f32 %v4523_v9, %v1519_v17 }
 0x327   :  { %v1489_v32 = vsub.f32 %v1425_v12, %v1457_v26  ;;  %v1654_v1 = vmul.f32 %v5854_v24, %v1616_v6 }
 0x328   :  { %v1554_v16 = vadd.f32 1e-05, %v1490_v31  ;;  %v1653_v35 = vmul.f32 %v5854_v24, %v1615_v30 }
 0x329   :  { %v1553_v29 = vadd.f32 1e-05, %v1489_v32  ;;  %v1692_v15 = vadd.f32 %v5859_v0, %v1654_v1 }
 0x32a   :  { %4524 = vrsqrt.f32 %v1554_v16  ;;  %v1691_v45 = vadd.f32 %v5859_v0, %v1653_v35 }
 0x32b   :  { %4526 = vrsqrt.f32 %v1553_v29 }
 0x32c   :  { %4124 = vmatprep.mubr.f32.mxu0 %v1691_v45 }
 0x32d   :  { %4125 = vmatmul.mubr.f32.gmra.mrb[18].mxu0 %v1692_v15 }
 0x32f   :  { %v1244_v47 = vpop.xlane.xlu1 %1243 }
 0x330   :  { %v1300_v43 = vmul.f32 0.0078125, %v1244_v47  ;;  %v1242_v3 = vpop.xlane.xlu0 %1241 }
 0x331   :  { %v1299_v2 = vmul.f32 0.0078125, %v1242_v3 }
 0x332   :  { %v1460_v53 = vmul.f32 %v1300_v43, %v1300_v43  ;;  %v1524_v15 = vsub.f32 %v5695_v33, %v1300_v43 }
 0x333   :  { %v1372_v41 = vpop.xlane.xlu1 %1371  ;;  %v1459_v21 = vmul.f32 %v1299_v2, %v1299_v2 }
 0x334   :  { %v4525_v14 = vpop.eup %4524  ;;  %v1428_v54 = vmul.f32 0.0078125, %v1372_v41  ;;  %v1370_v60 = vpop.xlane.xlu0 %1369  ;;  %v1523_v41 = vsub.f32 %v5697_v58, %v1299_v2 }
 0x335   :  { %v4527_v36 = vpop.eup %4526  ;;  %v1427_v23 = vmul.f32 0.0078125, %v1370_v60  ;;  %v1618_v10 = vmul.f32 %v4525_v14, %v1522_v63 }
 0x336   :  { %v1492_v17 = vsub.f32 %v1428_v54, %v1460_v53  ;;  %v1617_v62 = vmul.f32 %v4527_v36, %v1521_v61 }
 0x337   :  { %v1491_v42 = vsub.f32 %v1427_v23, %v1459_v21  ;;  %v1656_v20 = vmul.f32 %v5854_v24, %v1618_v10 }
 0x338   :  { %v1556_v9 = vadd.f32 1e-05, %v1492_v17  ;;  %v1655_v26 = vmul.f32 %v5854_v24, %v1617_v62 }
 0x339   :  { %v1555_v22 = vadd.f32 1e-05, %v1491_v42  ;;  %v1694_v5 = vadd.f32 %v5859_v0, %v1656_v20 }
 0x33a   :  { %4528 = vrsqrt.f32 %v1556_v9  ;;  %v1693_v40 = vadd.f32 %v5859_v0, %v1655_v26 }
 0x33b   :  { %4530 = vrsqrt.f32 %v1555_v22 }
 0x33c   :  { %v1248_v49 = vpop.xlane.xlu1 %1247  ;;  %4127 = vmatprep.mubr.f32.mxu0 %v1693_v40 }
 0x33d   :  { %v1302_v12 = vmul.f32 0.0078125, %v1248_v49  ;;  %v1246_v6 = vpop.xlane.xlu0 %1245  ;;  %4128 = vmatmul.mubr.f32.gmra.mrb[20].mxu0 %v1694_v5 }
 0x33e   :  { %v1301_v31 = vmul.f32 0.0078125, %v1246_v6 }
 0x33f   :  { %v1462_v32 = vmul.f32 %v1302_v12, %v1302_v12 }
 0x340   :  { %v1376_v30 = vpop.xlane.xlu1 %1375  ;;  %v1461_v35 = vmul.f32 %v1301_v31, %v1301_v31 }
 0x341   :  { %v1430_v1 = vmul.f32 0.0078125, %v1376_v30  ;;  %v1374_v16 = vpop.xlane.xlu0 %1373 }
 0x342   :  { %v1429_v29 = vmul.f32 0.0078125, %v1374_v16 }
 0x343   :  { %v1494_v45 = vsub.f32 %v1430_v1, %v1462_v32  ;;  %v1526_v1 = vsub.f32 %v5707_v46, %v1302_v12 }
 0x344   :  { %v1493_v47 = vsub.f32 %v1429_v29, %v1461_v35  ;;  %v1252_v3 = vpop.xlane.xlu1 %1251  ;;  %v4529_v63 = vpop.eup %4528  ;;  %v1525_v29 = vsub.f32 %v5709_v38, %v1301_v31 }
 0x345   :  { %v1558_v14 = vadd.f32 1e-05, %v1494_v45  ;;  %v5879_v61 = vmul.f32 0.0078125, %v1252_v3  ;;  %v1250_v53 = vpop.xlane.xlu0 %1249  ;;  %v4531_v54 = vpop.eup %4530  ;;  %v1620_v21 = vmul.f32 %v4529_v63, %v1524_v15 }
 0x346   :  { %v1557_v60 = vadd.f32 1e-05, %v1493_v47  ;;  %v5881_v36 = vmul.f32 0.0078125, %v1250_v53  ;;  %v1619_v23 = vmul.f32 %v4531_v54, %v1523_v41 }
 0x347   :  { %4532 = vrsqrt.f32 %v1558_v14  ;;  %v1658_v33 = vmul.f32 %v5854_v24, %v1620_v21  ;;  %v1464_v43 = vmul.f32 %v5879_v61, %v5879_v61 }
 0x348   :  { %4534 = vrsqrt.f32 %v1557_v60  ;;  %v1380_v10 = vpop.xlane.xlu1 %1379  ;;  %v1657_v2 = vmul.f32 %v5854_v24, %v1619_v23  ;;  %v1463_v62 = vmul.f32 %v5881_v36, %v5881_v36 }
 0x349   :  { %v1432_v17 = vmul.f32 0.0078125, %v1380_v10  ;;  %v1378_v58 = vpop.xlane.xlu0 %1377  ;;  %v1696_v40 = vadd.f32 %v5859_v0, %v1658_v33 }
 0x34a   :  { %v1431_v42 = vmul.f32 0.0078125, %v1378_v58  ;;  %v1695_v9 = vadd.f32 %v5859_v0, %v1657_v2 }
 0x34b   :  { %v1496_v20 = vsub.f32 %v1432_v17, %v1464_v43  ;;  %v1528_v17 = vsub.f32 %v5719_v37, %v5879_v61 }
 0x34c   :  { %v1495_v26 = vsub.f32 %v1431_v42, %v1463_v62  ;;  %v1256_v22 = vpop.xlane.xlu1 %1255  ;;  %4130 = vmatprep.mubr.f32.mxu0 %v1695_v9  ;;  %v1527_v42 = vsub.f32 %v5721_v7, %v5881_v36 }
 0x34d   :  { %v1560_v49 = vadd.f32 1e-05, %v1496_v20  ;;  %v5891_v5 = vmul.f32 0.0078125, %v1256_v22  ;;  %v1254_v6 = vpop.xlane.xlu0 %1253  ;;  %4131 = vmatmul.mubr.f32.gmra.mrb[22].mxu0 %v1696_v40 }
 0x34e   :  { %v1559_v30 = vadd.f32 1e-05, %v1495_v26  ;;  %v5893_v32 = vmul.f32 0.0078125, %v1254_v6 }
 0x34f   :  { %4536 = vrsqrt.f32 %v1560_v49  ;;  %v1466_v45 = vmul.f32 %v5891_v5, %v5891_v5 }
 0x350   :  { %4538 = vrsqrt.f32 %v1559_v30  ;;  %v1384_v16 = vpop.xlane.xlu1 %1383  ;;  %v1465_v63 = vmul.f32 %v5893_v32, %v5893_v32 }
 0x351   :  { %v4533_v35 = vpop.eup %4532  ;;  %v1434_v15 = vmul.f32 0.0078125, %v1384_v16  ;;  %v1382_v47 = vpop.xlane.xlu0 %1381 }
 0x352   :  { %v4535_v3 = vpop.eup %4534  ;;  %v1433_v41 = vmul.f32 0.0078125, %v1382_v47  ;;  %v1622_v14 = vmul.f32 %v4533_v35, %v1526_v1 }
 0x353   :  { %v1498_v53 = vsub.f32 %v1434_v15, %v1466_v45  ;;  %v1621_v54 = vmul.f32 %v4535_v3, %v1525_v29  ;;  %v1530_v3 = vsub.f32 %v5731_v59, %v5891_v5 }
 0x354   :  { %v1497_v60 = vsub.f32 %v1433_v41, %v1465_v63  ;;  %v1260_v46 = vpop.xlane.xlu1 %1259  ;;  %v1660_v12 = vmul.f32 %v5854_v24, %v1622_v14 }
 0x355   :  { %v1562_v21 = vadd.f32 1e-05, %v1498_v53  ;;  %v5902_v23 = vmul.f32 0.0078125, %v1260_v46  ;;  %v1258_v38 = vpop.xlane.xlu0 %1257  ;;  %v1659_v31 = vmul.f32 %v5854_v24, %v1621_v54  ;;  %v1529_v53 = vsub.f32 %v5733_v27, %v5893_v32 }
 0x356   :  { %v1561_v10 = vadd.f32 1e-05, %v1497_v60  ;;  %v5905_v33 = vmul.f32 0.0078125, %v1258_v38  ;;  %v1698_v2 = vadd.f32 %v5859_v0, %v1660_v12 }
 0x357   :  { %4540 = vrsqrt.f32 %v1562_v21  ;;  %v1697_v43 = vadd.f32 %v5859_v0, %v1659_v31  ;;  %v1468_v20 = vmul.f32 %v5902_v23, %v5902_v23 }
 0x358   :  { %4542 = vrsqrt.f32 %v1561_v10  ;;  %v1388_v58 = vpop.xlane.xlu1 %1387  ;;  %v1467_v40 = vmul.f32 %v5905_v33, %v5905_v33 }
 0x359   :  { %v4537_v62 = vpop.eup %4536  ;;  %v1436_v9 = vmul.f32 0.0078125, %v1388_v58  ;;  %v1386_v26 = vpop.xlane.xlu0 %1385  ;;  %4133 = vmatprep.mubr.f32.mxu0 %v1697_v43 }
 0x35a   :  { %v4539_v22 = vpop.eup %4538  ;;  %v1435_v49 = vmul.f32 0.0078125, %v1386_v26  ;;  %4134 = vmatmul.mubr.f32.gmra.mrb[24].mxu0 %v1698_v2  ;;  %v1624_v37 = vmul.f32 %v4537_v62, %v1528_v17 }
 0x35b   :  { %v1500_v61 = vsub.f32 %v1436_v9, %v1468_v20  ;;  %v1623_v6 = vmul.f32 %v4539_v22, %v1527_v42  ;;  %v1532_v9 = vsub.f32 %v5743_v11, %v5902_v23 }
 0x35c   :  { %v1499_v30 = vsub.f32 %v1435_v49, %v1467_v40  ;;  %v1264_v1 = vpop.xlane.xlu1 %1263  ;;  %v1662_v16 = vmul.f32 %v5854_v24, %v1624_v37  ;;  %v1531_v49 = vsub.f32 %v5745_v25, %v5905_v33 }
 0x35d   :  { %v1564_v7 = vadd.f32 1e-05, %v1500_v61  ;;  %v5918_v36 = vmul.f32 0.0078125, %v1264_v1  ;;  %v1262_v35 = vpop.xlane.xlu0 %1261  ;;  %v1661_v29 = vmul.f32 %v5854_v24, %v1623_v6 }
 0x35e   :  { %v1563_v45 = vadd.f32 1e-05, %v1499_v30  ;;  %v5921_v15 = vmul.f32 0.0078125, %v1262_v35  ;;  %v1700_v41 = vadd.f32 %v5859_v0, %v1662_v16 }
 0x35f   :  { %4544 = vrsqrt.f32 %v1564_v7  ;;  %v1699_v47 = vadd.f32 %v5859_v0, %v1661_v29  ;;  %v1470_v54 = vmul.f32 %v5918_v36, %v5918_v36 }
 0x360   :  { %4546 = vrsqrt.f32 %v1563_v45  ;;  %v1392_v63 = vpop.xlane.xlu1 %1391  ;;  %v1469_v21 = vmul.f32 %v5921_v15, %v5921_v15 }
 0x361   :  { %v4541_v14 = vpop.eup %4540  ;;  %v1438_v60 = vmul.f32 0.0078125, %v1392_v63  ;;  %v1390_v46 = vpop.xlane.xlu0 %1389  ;;  %4136 = vmatprep.mubr.f32.mxu0 %v1699_v47 }
 0x362   :  { %v4543_v12 = vpop.eup %4542  ;;  %v1437_v38 = vmul.f32 0.0078125, %v1390_v46  ;;  %4137 = vmatmul.mubr.f32.gmra.mrb[26].mxu0 %v1700_v41  ;;  %v1626_v59 = vmul.f32 %v4541_v14, %v1530_v3 }
 0x363   :  { %v1502_v5 = vsub.f32 %v1438_v60, %v1470_v54  ;;  %v1625_v31 = vmul.f32 %v4543_v12, %v1529_v53  ;;  %v1534_v53 = vsub.f32 %v5755_v52, %v5918_v36  ;;  %v1533_v12 = vsub.f32 %v5757_v57, %v5921_v15 }
 0x364   :  { %v1501_v10 = vsub.f32 %v1437_v38, %v1469_v21  ;;  %v1268_v43 = vpop.xlane.xlu1 %1267  ;;  %v1664_v17 = vmul.f32 %v5854_v24, %v1626_v59 }
 0x365   :  { %v1566_v27 = vadd.f32 1e-05, %v1502_v5  ;;  %v5934_v32 = vmul.f32 0.0078125, %v1268_v43  ;;  %v1266_v58 = vpop.xlane.xlu0 %1265  ;;  %v1663_v2 = vmul.f32 %v5854_v24, %v1625_v31 }
 0x366   :  { %v1565_v62 = vadd.f32 1e-05, %v1501_v10  ;;  %v5937_v42 = vmul.f32 0.0078125, %v1266_v58  ;;  %v1702_v22 = vadd.f32 %v5859_v0, %v1664_v17 }
 0x367   :  { %4548 = vrsqrt.f32 %v1566_v27  ;;  %v1701_v20 = vadd.f32 %v5859_v0, %v1663_v2  ;;  %v1472_v37 = vmul.f32 %v5934_v32, %v5934_v32 }
 0x368   :  { %4550 = vrsqrt.f32 %v1565_v62  ;;  %v1396_v26 = vpop.xlane.xlu1 %1395  ;;  %v1471_v1 = vmul.f32 %v5937_v42, %v5937_v42 }
 0x369   :  { %v4545_v40 = vpop.eup %4544  ;;  %v1440_v61 = vmul.f32 0.0078125, %v1396_v26  ;;  %v1394_v6 = vpop.xlane.xlu0 %1393  ;;  %4139 = vmatprep.mubr.f32.mxu0 %v1701_v20 }
 0x36a   :  { %v4547_v30 = vpop.eup %4546  ;;  %v1439_v16 = vmul.f32 0.0078125, %v1394_v6  ;;  %4140 = vmatmul.mubr.f32.gmra.mrb[28].mxu0 %v1702_v22  ;;  %v1628_v11 = vmul.f32 %v4545_v40, %v1532_v9  ;;  %v1536_v22 = vsub.f32 %v5767_v51, %v5934_v32 }
 0x36b   :  { %v1504_v23 = vsub.f32 %v1440_v61, %v1472_v37  ;;  %v1627_v7 = vmul.f32 %v4547_v30, %v1531_v49  ;;  %v1535_v61 = vsub.f32 %v5769_v34, %v5937_v42 }
 0x36c   :  { %v1503_v35 = vsub.f32 %v1439_v16, %v1471_v1  ;;  %v1272_v29 = vpop.xlane.xlu1 %1271  ;;  %v1666_v45 = vmul.f32 %v5854_v24, %v1628_v11 }
 0x36d   :  { %v1568_v25 = vadd.f32 1e-05, %v1504_v23  ;;  %v5950_v33 = vmul.f32 0.0078125, %v1272_v29  ;;  %v1270_v47 = vpop.xlane.xlu0 %1269  ;;  %v1665_v3 = vmul.f32 %v5854_v24, %v1627_v7 }
 0x36e   :  { %v1567_v63 = vadd.f32 1e-05, %v1503_v35  ;;  %v5953_v41 = vmul.f32 0.0078125, %v1270_v47  ;;  %v1704_v60 = vadd.f32 %v5859_v0, %v1666_v45 }
 0x36f   :  { %4552 = vrsqrt.f32 %v1568_v25  ;;  %v1703_v14 = vadd.f32 %v5859_v0, %v1665_v3  ;;  %v1474_v21 = vmul.f32 %v5950_v33, %v5950_v33 }
 0x370   :  { %4554 = vrsqrt.f32 %v1567_v63  ;;  %v1400_v54 = vpop.xlane.xlu1 %1399  ;;  %v1473_v31 = vmul.f32 %v5953_v41, %v5953_v41 }
 0x371   :  { %v4549_v46 = vpop.eup %4548  ;;  %v1442_v38 = vmul.f32 0.0078125, %v1400_v54  ;;  %v1398_v59 = vpop.xlane.xlu0 %1397  ;;  %4142 = vmatprep.mubr.f32.mxu0 %v1703_v14 }
 0x372   :  { %v4551_v5 = vpop.eup %4550  ;;  %v1441_v10 = vmul.f32 0.0078125, %v1398_v59  ;;  %4143 = vmatmul.mubr.f32.gmra.mrb[30].mxu0 %v1704_v60  ;;  %v1630_v52 = vmul.f32 %v4549_v46, %v1534_v53  ;;  %v1538_v53 = vsub.f32 %v5779_v4, %v5950_v33 }
 0x373   :  { %v1506_v36 = vsub.f32 %v1442_v38, %v1474_v21  ;;  %v1629_v43 = vmul.f32 %v4551_v5, %v1533_v12  ;;  %v1537_v12 = vsub.f32 %v5781_v18, %v5953_v41 }
 0x374   :  { %v1505_v17 = vsub.f32 %v1441_v10, %v1473_v31  ;;  %v1276_v27 = vpop.xlane.xlu1 %1275  ;;  %v1668_v58 = vmul.f32 %v5854_v24, %v1630_v52 }
 0x375   :  { %v1570_v57 = vadd.f32 1e-05, %v1506_v36  ;;  %v5966_v15 = vmul.f32 0.0078125, %v1276_v27  ;;  %v1274_v2 = vpop.xlane.xlu0 %1273  ;;  %v1667_v62 = vmul.f32 %v5854_v24, %v1629_v43 }
 0x376   :  { %v1569_v20 = vadd.f32 1e-05, %v1505_v17  ;;  %v5969_v9 = vmul.f32 0.0078125, %v1274_v2  ;;  %v1706_v49 = vadd.f32 %v5859_v0, %v1668_v58 }
 0x377   :  { %4556 = vrsqrt.f32 %v1570_v57  ;;  %v1705_v26 = vadd.f32 %v5859_v0, %v1667_v62  ;;  %v1476_v6 = vmul.f32 %v5966_v15, %v5966_v15 }
 0x378   :  { %4558 = vrsqrt.f32 %v1569_v20  ;;  %v1404_v40 = vpop.xlane.xlu1 %1403  ;;  %v1475_v11 = vmul.f32 %v5969_v9, %v5969_v9  ;;  %v1540_v20 = vsub.f32 %v5791_v56, %v5966_v15 }
 0x379   :  { %v4553_v37 = vpop.eup %4552  ;;  %v1444_v30 = vmul.f32 0.0078125, %v1404_v40  ;;  %v1402_v1 = vpop.xlane.xlu0 %1401  ;;  %4145 = vmatprep.mubr.f32.mxu0 %v1705_v26 }
 0x37a   :  { %v4555_v16 = vpop.eup %4554  ;;  %v1443_v23 = vmul.f32 0.0078125, %v1402_v1  ;;  %4146 = vmatmul.mubr.f32.gmra.mrb[32].mxu0 %v1706_v49  ;;  %v1632_v51 = vmul.f32 %v4553_v37, %v1536_v22  ;;  %v1539_v49 = vsub.f32 %v5793_v48, %v5969_v9 }
 0x37b   :  { %v1508_v32 = vsub.f32 %v1444_v30, %v1476_v6  ;;  %v1631_v7 = vmul.f32 %v4555_v16, %v1535_v61 }
 0x37c   :  { %v1507_v35 = vsub.f32 %v1443_v23, %v1475_v11  ;;  %v1280_v29 = vpop.xlane.xlu1 %1279  ;;  %v1670_v45 = vmul.f32 %v5854_v24, %v1632_v51 }
 0x37d   :  { %v1572_v34 = vadd.f32 1e-05, %v1508_v32  ;;  %v5982_v42 = vmul.f32 0.0078125, %v1280_v29  ;;  %v1278_v25 = vpop.xlane.xlu0 %1277  ;;  %v1669_v47 = vmul.f32 %v5854_v24, %v1631_v7 }
 0x37e   :  { %v1571_v3 = vadd.f32 1e-05, %v1507_v35  ;;  %v5985_v63 = vmul.f32 0.0078125, %v1278_v25  ;;  %v1708_v60 = vadd.f32 %v5859_v0, %v1670_v45 }
 0x37f   :  { %4560 = vrsqrt.f32 %v1572_v34  ;;  %v1707_v14 = vadd.f32 %v5859_v0, %v1669_v47  ;;  %v1478_v21 = vmul.f32 %v5982_v42, %v5982_v42  ;;  %v1542_v25 = vsub.f32 %v5803_v13, %v5982_v42 }
 0x380   :  { %4562 = vrsqrt.f32 %v1571_v3  ;;  %v1408_v54 = vpop.xlane.xlu1 %1407  ;;  %v1477_v31 = vmul.f32 %v5985_v63, %v5985_v63 }
 0x381   :  { %v4557_v46 = vpop.eup %4556  ;;  %v1446_v38 = vmul.f32 0.0078125, %v1408_v54  ;;  %v1406_v59 = vpop.xlane.xlu0 %1405  ;;  %4148 = vmatprep.mubr.f32.mxu0 %v1707_v14 }
 0x382   :  { %v4559_v5 = vpop.eup %4558  ;;  %v1445_v10 = vmul.f32 0.0078125, %v1406_v59  ;;  %4149 = vmatmul.mubr.f32.gmra.mrb[34].mxu0 %v1708_v60  ;;  %v1634_v4 = vmul.f32 %v4557_v46, %v1538_v53  ;;  %v1541_v53 = vsub.f32 %v5805_v8, %v5985_v63 }
 0x383   :  { %v1510_v33 = vsub.f32 %v1446_v38, %v1478_v21  ;;  %v1633_v52 = vmul.f32 %v4559_v5, %v1537_v12 }
 0x384   :  { %v1509_v36 = vsub.f32 %v1445_v10, %v1477_v31  ;;  %v1284_v43 = vpop.xlane.xlu1 %1283  ;;  %v1672_v17 = vmul.f32 %v5854_v24, %v1634_v4 }
 0x385   :  { %v1574_v18 = vadd.f32 1e-05, %v1510_v33  ;;  %v5998_v41 = vmul.f32 0.0078125, %v1284_v43  ;;  %v1282_v27 = vpop.xlane.xlu0 %1281  ;;  %v1671_v58 = vmul.f32 %v5854_v24, %v1633_v52 }
 0x386   :  { %v1573_v57 = vadd.f32 1e-05, %v1509_v36  ;;  %v6001_v2 = vmul.f32 0.0078125, %v1282_v27  ;;  %v1710_v22 = vadd.f32 %v5859_v0, %v1672_v17 }
 0x387   :  { %4564 = vrsqrt.f32 %v1574_v18  ;;  %v1709_v62 = vadd.f32 %v5859_v0, %v1671_v58  ;;  %v1480_v37 = vmul.f32 %v5998_v41, %v5998_v41  ;;  %v1544_v17 = vsub.f32 %v5815_v19, %v5998_v41 }
 0x388   :  { %4566 = vrsqrt.f32 %v1573_v57  ;;  %v1412_v26 = vpop.xlane.xlu1 %1411  ;;  %v1479_v1 = vmul.f32 %v6001_v2, %v6001_v2  ;;  %v1543_v57 = vsub.f32 %v5817_v50, %v6001_v2 }
 0x389   :  { %v4561_v40 = vpop.eup %4560  ;;  %v1448_v61 = vmul.f32 0.0078125, %v1412_v26  ;;  %v1410_v6 = vpop.xlane.xlu0 %1409  ;;  %4151 = vmatprep.mubr.f32.mxu0 %v1709_v62 }
 0x38a   :  { %v4563_v30 = vpop.eup %4562  ;;  %v1447_v16 = vmul.f32 0.0078125, %v1410_v6  ;;  %4152 = vmatmul.mubr.f32.gmra.mrb[36].mxu0 %v1710_v22  ;;  %v1636_v56 = vmul.f32 %v4561_v40, %v1540_v20 }
 0x38b   :  { %v1512_v15 = vsub.f32 %v1448_v61, %v1480_v37  ;;  %v1635_v11 = vmul.f32 %v4563_v30, %v1539_v49 }
 0x38c   :  { %v1511_v23 = vsub.f32 %v1447_v16, %v1479_v1  ;;  %v1288_v51 = vpop.xlane.xlu1 %1287  ;;  %v1674_v32 = vmul.f32 %v5854_v24, %v1636_v56 }
 0x38d   :  { %v1576_v48 = vadd.f32 1e-05, %v1512_v15  ;;  %v6014_v9 = vmul.f32 0.0078125, %v1288_v51  ;;  %v1286_v7 = vpop.xlane.xlu0 %1285  ;;  %v1673_v35 = vmul.f32 %v5854_v24, %v1635_v11 }
 0x38e   :  { %v1575_v29 = vadd.f32 1e-05, %v1511_v23  ;;  %v6017_v45 = vmul.f32 0.0078125, %v1286_v7  ;;  %v1712_v3 = vadd.f32 %v5859_v0, %v1674_v32 }
 0x38f   :  { %4568 = vrsqrt.f32 %v1576_v48  ;;  %v1711_v34 = vadd.f32 %v5859_v0, %v1673_v35  ;;  %v1482_v54 = vmul.f32 %v6014_v9, %v6014_v9  ;;  %v1546_v2 = vsub.f32 %v5827_v39, %v6014_v9 }
 0x390   :  { %4570 = vrsqrt.f32 %v1575_v29  ;;  %v1416_v47 = vpop.xlane.xlu1 %1415  ;;  %v1481_v21 = vmul.f32 %v6017_v45, %v6017_v45  ;;  %v1545_v11 = vsub.f32 %v5829_v55, %v6017_v45 }
 0x391   :  { %v4565_v14 = vpop.eup %4564  ;;  %v1450_v60 = vmul.f32 0.0078125, %v1416_v47  ;;  %v1414_v46 = vpop.xlane.xlu0 %1413  ;;  %4154 = vmatprep.mubr.f32.mxu0 %v1711_v34 }
 0x392   :  { %v4567_v12 = vpop.eup %4566  ;;  %v1449_v38 = vmul.f32 0.0078125, %v1414_v46  ;;  %4155 = vmatmul.mubr.f32.gmra.mrb[38].mxu0 %v1712_v3  ;;  %v1638_v13 = vmul.f32 %v4565_v14, %v1542_v25 }
 0x393   :  { %v1514_v42 = vsub.f32 %v1450_v60, %v1482_v54  ;;  %v1637_v59 = vmul.f32 %v4567_v12, %v1541_v53 }
 0x394   :  { %v1513_v5 = vsub.f32 %v1449_v38, %v1481_v21  ;;  %v1292_v31 = vpop.xlane.xlu1 %1291  ;;  %v1676_v10 = vmul.f32 %v5854_v24, %v1638_v13  ;;  %v2499_v21 = vld [vmem:[%s7250_s9] sm:$0xff]  ;;  %v2500_v38 = vld [vmem:[%s7250_s9 + $0x8] sm:$0xff] }
 0x395   :  { %v1578_v8 = vadd.f32 1e-05, %v1514_v42  ;;  %v1324_v63 = vmul.f32 0.0078125, %v1292_v31  ;;  %v1290_v4 = vpop.xlane.xlu0 %1289  ;;  %v1675_v33 = vmul.f32 %v5854_v24, %v1637_v59  ;;  %v4393_v13 = vpack.c.bf16 %v2500_v38, %v2499_v21 }
 0x396   :  { %v1577_v52 = vadd.f32 1e-05, %v1513_v5  ;;  %v1323_v36 = vmul.f32 0.0078125, %v1290_v4  ;;  %v1714_v27 = vadd.f32 %v5859_v0, %v1676_v10  ;;  %v2502_v4 = vld [vmem:[%s7250_s9 + $0x18] sm:$0xff] }
 0x397   :  { %4572 = vrsqrt.f32 %v1578_v8  ;;  %v1713_v43 = vadd.f32 %v5859_v0, %v1675_v33  ;;  %v1484_v62 = vmul.f32 %v1324_v63, %v1324_v63  ;;  %v1548_v39 = vsub.f32 %v5839_v28, %v1324_v63  ;;  %v4708_v28 = vld [vmem:[%s7241_s0] sm:$0xff]  ;;  %4394 = vmatprep.subr.bf16.mxu1 %v4393_v13  ;;  %v2501_v63 = vld [vmem:[%s7250_s9 + $0x10] sm:$0xff] }
 0x398   :  { %4574 = vrsqrt.f32 %v1577_v52  ;;  %v1420_v18 = vpop.xlane.xlu1 %1419  ;;  %v1483_v40 = vmul.f32 %v1323_v36, %v1323_v36  ;;  %v1547_v34 = vsub.f32 %v5841_v44, %v1323_v36  ;;  %v6062_v44 = vld [vmem:[%s7247_s6 + $0x1] ss:$0 sm:$0xff]  ;;  %4396 = vmatpush3.bf16.msra.mxu1 %v4393_v13  ;;  %v4397_v52 = vpack.c.bf16 %v2502_v4, %v2501_v63 }
 0x399   :  { %v4569_v58 = vpop.eup %4568  ;;  %v1452_v20 = vmul.f32 0.0078125, %v1420_v18  ;;  %v1418_v26 = vpop.xlane.xlu0 %1417  ;;  %4157 = vmatprep.mubr.f32.mxu0 %v1713_v43  ;;  %v2503_v18 = vld [vmem:[%s7250_s9 + $0x20] sm:$0xff] }
 0x39a   :  { %v4571_v22 = vpop.eup %4570  ;;  %v1451_v49 = vmul.f32 0.0078125, %v1418_v26  ;;  %4158 = vmatmul.mubr.f32.gmra.mrb[40].mxu0 %v1714_v27  ;;  %v1640_v37 = vmul.f32 %v4569_v58, %v1544_v17  ;;  %4398 = vmatprep.subr.bf16.mxu1 %v4397_v52  ;;  %v2504_v27 = vld [vmem:[%s7250_s9 + $0x28] sm:$0xff] }
 0x39b   :  { %v1516_v61 = vsub.f32 %v1452_v20, %v1484_v62  ;;  %v1639_v6 = vmul.f32 %v4571_v22, %v1543_v57  ;;  %v4401_v58 = vpack.c.bf16 %v2504_v27, %v2503_v18  ;;  %v2505_v57 = vld [vmem:[%s7250_s9 + $0x30] sm:$0xff]  ;;  %v2506_v62 = vld [vmem:[%s7250_s9 + $0x38] sm:$0xff] }
 0x39c   :  { %v1515_v19 = vsub.f32 %v1451_v49, %v1483_v40  ;;  %v1678_v41 = vmul.f32 %v5854_v24, %v1640_v37  ;;  %4400 = vmatpush3.bf16.msra.mxu1 %v4397_v52  ;;  %v4405_v20 = vpack.c.bf16 %v2506_v62, %v2505_v57  ;;  %v2507_v37 = vld [vmem:[%s7250_s9 + $0x40] sm:$0xff] }
 0x39d   :  { %v1580_v30 = vadd.f32 1e-05, %v1516_v61  ;;  %v1677_v1 = vmul.f32 %v5854_v24, %v1639_v6  ;;  %4402 = vmatprep.subr.bf16.mxu1 %v4401_v58  ;;  %v2508_v61 = vld [vmem:[%s7250_s9 + $0x48] sm:$0xff] }
 0x39e   :  { %v1579_v16 = vadd.f32 1e-05, %v1515_v19  ;;  %v1716_v56 = vadd.f32 %v5859_v0, %v1678_v41  ;;  %v4409_v19 = vpack.c.bf16 %v2508_v61, %v2507_v37 }
 0x39f   :  { %4576 = vrsqrt.f32 %v1580_v30  ;;  %v1715_v50 = vadd.f32 %v5859_v0, %v1677_v1  ;;  %v2509_v30 = vld [vmem:[%s7250_s9 + $0x50] sm:$0xff]  ;;  %v2510_v1 = vld [vmem:[%s7250_s9 + $0x58] sm:$0xff] }
 0x3a0   :  { %4578 = vrsqrt.f32 %v1579_v16  ;;  %4404 = vmatpush3.bf16.msra.mxu1 %v4401_v58 }
 0x3a1   :  { %v4573_v15 = vpop.eup %4572  ;;  %4160 = vmatprep.mubr.f32.mxu0 %v1715_v50  ;;  %4406 = vmatprep.subr.bf16.mxu1 %v4405_v20  ;;  %v4413_v50 = vpack.c.bf16 %v2510_v1, %v2509_v30 }
 0x3a2   :  { %v4575_v23 = vpop.eup %4574  ;;  %4161 = vmatmul.mubr.f32.gmra.mrb[42].mxu0 %v1716_v56  ;;  %v1642_v51 = vmul.f32 %v4573_v15, %v1546_v2  ;;  %v2511_v56 = vld [vmem:[%s7250_s9 + $0x60] sm:$0xff]  ;;  %v2512_v15 = vld [vmem:[%s7250_s9 + $0x68] sm:$0xff] }
 0x3a3   :  { %v1641_v32 = vmul.f32 %v4575_v23, %v1545_v11  ;;  %v4417_v11 = vpack.c.bf16 %v2512_v15, %v2511_v56  ;;  %v2513_v23 = vld [vmem:[%s7250_s9 + $0x70] sm:$0xff] }
 0x3a4   :  { %v1680_v48 = vmul.f32 %v5854_v24, %v1642_v51  ;;  %4408 = vmatpush3.bf16.msra.mxu1 %v4405_v20  ;;  %v2514_v51 = vld [vmem:[%s7250_s9 + $0x78] sm:$0xff] }
 0x3a5   :  { %v1679_v7 = vmul.f32 %v5854_v24, %v1641_v32  ;;  %4410 = vmatprep.subr.bf16.mxu1 %v4409_v19  ;;  %v4421_v32 = vpack.c.bf16 %v2514_v51, %v2513_v23 }
 0x3a6   :  { %v1718_v9 = vadd.f32 %v5859_v0, %v1680_v48 }
 0x3a7   :  { %v1717_v35 = vadd.f32 %v5859_v0, %v1679_v7 }
 0x3a8   :  { %4412 = vmatpush3.bf16.msra.mxu1 %v4409_v19 }
 0x3a9   :  { %v4577_v29 = vpop.eup %4576  ;;  %4163 = vmatprep.mubr.f32.mxu0 %v1717_v35  ;;  %4414 = vmatprep.subr.bf16.mxu1 %v4413_v50 }
 0x3aa   :  { %v4579_v55 = vpop.eup %4578  ;;  %4164 = vmatmul.mubr.f32.gmra.mrb[44].mxu0 %v1718_v9  ;;  %v1644_v45 = vmul.f32 %v4577_v29, %v1548_v39 }
 0x3ab   :  { %v1643_v25 = vmul.f32 %v4579_v55, %v1547_v34 }
 0x3ac   :  { %v1682_v47 = vmul.f32 %v5854_v24, %v1644_v45  ;;  %4416 = vmatpush3.bf16.msra.mxu1 %v4413_v50 }
 0x3ad   :  { %v1681_v3 = vmul.f32 %v5854_v24, %v1643_v25  ;;  %4418 = vmatprep.subr.bf16.mxu1 %v4417_v11 }
 0x3ae   :  { %v1720_v53 = vadd.f32 %v5859_v0, %v1682_v47 }
 0x3af   :  { %v1719_v14 = vadd.f32 %v5859_v0, %v1681_v3 }
 0x3b0   :  { %4420 = vmatpush3.bf16.msra.mxu1 %v4417_v11 }
 0x3b1   :  { %4166 = vmatprep.mubr.f32.mxu0 %v1719_v14  ;;  %4422 = vmatprep.subr.bf16.mxu1 %v4421_v32 }
 0x3b2   :  { %4167 = vmatmul.mubr.f32.gmra.mrb[46].mxu0 %v1720_v53 }
 0x3b3   :  { %4265 = vmatprep.mubr.msk.f32.mxu0 %vm100_vm0, %v4708_v28 }
 0x3b4   :  { %4424 = vmatpush3.bf16.msra.mxu1 %v4421_v32 }
 0x3f4   :  { %v4123_v54 = vpop.f32.mrb[16].mxu0 }
 0x3f5   :  { %v1822_v24 = vadd.f32 %v4123_v54, %v6062_v44  ;;  %v1816_v60 = vpop.f32.mrb[17].mxu0 }
 0x3f6   :  { %v1817_v46 = vadd.f32 %v6062_v44, %v1816_v60 }
 0x3f7   :  { %v6066_v0 = vmax.f32 %v1822_v24, 0.0 }
 0x3f8   :  { %v6068_v12 = vmax.f32 %v1817_v46, 0.0 }
 0x3f9   :  { %2009 = vadd.xlane.f32.xlu1 %v6066_v0  ;;  %v2104_v42 = vmul.f32 %v6066_v0, %v6066_v0 }
 0x3fa   :  { %2007 = vadd.xlane.f32.xlu0 %v6068_v12  ;;  %v2103_v59 = vmul.f32 %v6068_v12, %v6068_v12 }
 0x3fd   :  { %2137 = vadd.xlane.f32.xlu1 %v2104_v42 }
 0x3fe   :  { %2135 = vadd.xlane.f32.xlu0 %v2103_v59 }
 0x400   :  { %v4126_v5 = vpop.f32.mrb[18].mxu0 }
 0x401   :  { %v1832_v31 = vadd.f32 %v4126_v5, %v6062_v44  ;;  %v1826_v10 = vpop.f32.mrb[19].mxu0 }
 0x402   :  { %v1827_v8 = vadd.f32 %v6062_v44, %v1826_v10 }
 0x403   :  { %v6090_v33 = vmax.f32 %v1832_v31, 0.0 }
 0x404   :  { %v6092_v36 = vmax.f32 %v1827_v8, 0.0 }
 0x405   :  { %2013 = vadd.xlane.f32.xlu1 %v6090_v33  ;;  %v2106_v43 = vmul.f32 %v6090_v33, %v6090_v33 }
 0x406   :  { %2011 = vadd.xlane.f32.xlu0 %v6092_v36  ;;  %v2105_v17 = vmul.f32 %v6092_v36, %v6092_v36 }
 0x409   :  { %2141 = vadd.xlane.f32.xlu1 %v2106_v43 }
 0x40a   :  { %2139 = vadd.xlane.f32.xlu0 %v2105_v17 }
 0x410   :  { %v4129_v26 = vpop.f32.mrb[20].mxu0 }
 0x411   :  { %v1842_v22 = vadd.f32 %v4129_v26, %v6062_v44  ;;  %v1836_v40 = vpop.f32.mrb[21].mxu0 }
 0x412   :  { %v1837_v49 = vadd.f32 %v6062_v44, %v1836_v40 }
 0x413   :  { %v6120_v6 = vmax.f32 %v1842_v22, 0.0 }
 0x414   :  { %v6122_v41 = vmax.f32 %v1837_v49, 0.0 }
 0x415   :  { %2017 = vadd.xlane.f32.xlu1 %v6120_v6  ;;  %v2108_v16 = vmul.f32 %v6120_v6, %v6120_v6 }
 0x416   :  { %2015 = vadd.xlane.f32.xlu0 %v6122_v41  ;;  %v2107_v2 = vmul.f32 %v6122_v41, %v6122_v41 }
 0x419   :  { %2145 = vadd.xlane.f32.xlu1 %v2108_v16 }
 0x41a   :  { %2143 = vadd.xlane.f32.xlu0 %v2107_v2 }
 0x420   :  { %v4132_v48 = vpop.f32.mrb[22].mxu0 }
 0x421   :  { %v1852_v7 = vadd.f32 %v4132_v48, %v6062_v44  ;;  %v1846_v35 = vpop.f32.mrb[23].mxu0 }
 0x422   :  { %v1847_v39 = vadd.f32 %v6062_v44, %v1846_v35 }
 0x423   :  { %v6150_v9 = vmax.f32 %v1852_v7, 0.0 }
 0x424   :  { %v6152_v29 = vmax.f32 %v1847_v39, 0.0 }
 0x425   :  { %2021 = vadd.xlane.f32.xlu1 %v6150_v9  ;;  %v2110_v34 = vmul.f32 %v6150_v9, %v6150_v9 }
 0x426   :  { %2019 = vadd.xlane.f32.xlu0 %v6152_v29  ;;  %v2109_v55 = vmul.f32 %v6152_v29, %v6152_v29 }
 0x429   :  { %2149 = vadd.xlane.f32.xlu1 %v2110_v34 }
 0x42a   :  { %2147 = vadd.xlane.f32.xlu0 %v2109_v55 }
 0x42d   :  { %v4135_v45 = vpop.f32.mrb[24].mxu0 }
 0x42e   :  { %v1862_v25 = vadd.f32 %v4135_v45, %v6062_v44  ;;  %v1856_v47 = vpop.f32.mrb[25].mxu0 }
 0x42f   :  { %v1857_v3 = vadd.f32 %v6062_v44, %v1856_v47 }
 0x430   :  { %v6162_v14 = vmax.f32 %v1862_v25, 0.0 }
 0x431   :  { %v6164_v53 = vmax.f32 %v1857_v3, 0.0 }
 0x432   :  { %2025 = vadd.xlane.f32.xlu1 %v6162_v14  ;;  %v2112_v28 = vmul.f32 %v6162_v14, %v6162_v14 }
 0x433   :  { %2023 = vadd.xlane.f32.xlu0 %v6164_v53  ;;  %v2111_v24 = vmul.f32 %v6164_v53, %v6164_v53 }
 0x435   :  { %v4138_v54 = vpop.f32.mrb[26].mxu0 }
 0x436   :  { %v1872_v60 = vadd.f32 %v4138_v54, %v6062_v44  ;;  %2153 = vadd.xlane.f32.xlu1 %v2112_v28  ;;  %v1866_v46 = vpop.f32.mrb[27].mxu0 }
 0x437   :  { %v1867_v21 = vadd.f32 %v6062_v44, %v1866_v46  ;;  %2151 = vadd.xlane.f32.xlu0 %v2111_v24 }
 0x438   :  { %v6174_v38 = vmax.f32 %v1872_v60, 0.0 }
 0x439   :  { %v6176_v13 = vmax.f32 %v1867_v21, 0.0 }
 0x43a   :  { %2029 = vadd.xlane.f32.xlu1 %v6174_v38  ;;  %v2114_v42 = vmul.f32 %v6174_v38, %v6174_v38 }
 0x43b   :  { %2027 = vadd.xlane.f32.xlu0 %v6176_v13  ;;  %v2113_v5 = vmul.f32 %v6176_v13, %v6176_v13 }
 0x43d   :  { %v4141_v59 = vpop.f32.mrb[28].mxu0 }
 0x43e   :  { %v1882_v31 = vadd.f32 %v4141_v59, %v6062_v44  ;;  %2157 = vadd.xlane.f32.xlu1 %v2114_v42  ;;  %v1876_v10 = vpop.f32.mrb[29].mxu0 }
 0x43f   :  { %v1877_v8 = vadd.f32 %v6062_v44, %v1876_v10  ;;  %2155 = vadd.xlane.f32.xlu0 %v2113_v5 }
 0x440   :  { %v6186_v63 = vmax.f32 %v1882_v31, 0.0 }
 0x441   :  { %v6188_v4 = vmax.f32 %v1877_v8, 0.0 }
 0x442   :  { %2033 = vadd.xlane.f32.xlu1 %v6186_v63  ;;  %v2116_v52 = vmul.f32 %v6186_v63, %v6186_v63 }
 0x443   :  { %2031 = vadd.xlane.f32.xlu0 %v6188_v4  ;;  %v2115_v17 = vmul.f32 %v6188_v4, %v6188_v4 }
 0x445   :  { %v4144_v43 = vpop.f32.mrb[30].mxu0 }
 0x446   :  { %v1892_v18 = vadd.f32 %v4144_v43, %v6062_v44  ;;  %2161 = vadd.xlane.f32.xlu1 %v2116_v52  ;;  %v1886_v27 = vpop.f32.mrb[31].mxu0 }
 0x447   :  { %v1887_v58 = vadd.f32 %v6062_v44, %v1886_v27  ;;  %2159 = vadd.xlane.f32.xlu0 %v2115_v17 }
 0x448   :  { %v6198_v57 = vmax.f32 %v1892_v18, 0.0 }
 0x449   :  { %v6200_v62 = vmax.f32 %v1887_v58, 0.0 }
 0x44a   :  { %2037 = vadd.xlane.f32.xlu1 %v6198_v57  ;;  %v2118_v20 = vmul.f32 %v6198_v57, %v6198_v57 }
 0x44b   :  { %2035 = vadd.xlane.f32.xlu0 %v6200_v62  ;;  %v2117_v22 = vmul.f32 %v6200_v62, %v6200_v62 }
 0x44d   :  { %v4147_v26 = vpop.f32.mrb[32].mxu0 }
 0x44e   :  { %v1902_v40 = vadd.f32 %v4147_v26, %v6062_v44  ;;  %2165 = vadd.xlane.f32.xlu1 %v2118_v20  ;;  %v1896_v49 = vpop.f32.mrb[33].mxu0 }
 0x44f   :  { %v1897_v37 = vadd.f32 %v6062_v44, %v1896_v49  ;;  %2163 = vadd.xlane.f32.xlu0 %v2117_v22 }
 0x450   :  { %v6210_v61 = vmax.f32 %v1902_v40, 0.0 }
 0x451   :  { %v6212_v19 = vmax.f32 %v1897_v37, 0.0 }
 0x452   :  { %2041 = vadd.xlane.f32.xlu1 %v6210_v61  ;;  %v2120_v30 = vmul.f32 %v6210_v61, %v6210_v61 }
 0x453   :  { %2039 = vadd.xlane.f32.xlu0 %v6212_v19  ;;  %v2119_v16 = vmul.f32 %v6212_v19, %v6212_v19 }
 0x455   :  { %v4150_v1 = vpop.f32.mrb[34].mxu0 }
 0x456   :  { %v1912_v50 = vadd.f32 %v4150_v1, %v6062_v44  ;;  %2169 = vadd.xlane.f32.xlu1 %v2120_v30  ;;  %v1906_v2 = vpop.f32.mrb[35].mxu0 }
 0x457   :  { %v1907_v56 = vadd.f32 %v6062_v44, %v1906_v2  ;;  %2167 = vadd.xlane.f32.xlu0 %v2119_v16 }
 0x458   :  { %v6222_v15 = vmax.f32 %v1912_v50, 0.0 }
 0x459   :  { %v6224_v11 = vmax.f32 %v1907_v56, 0.0 }
 0x45a   :  { %2045 = vadd.xlane.f32.xlu1 %v6222_v15  ;;  %v2122_v23 = vmul.f32 %v6222_v15, %v6222_v15 }
 0x45b   :  { %2043 = vadd.xlane.f32.xlu0 %v6224_v11  ;;  %v2121_v32 = vmul.f32 %v6224_v11, %v6224_v11 }
 0x45d   :  { %v4153_v51 = vpop.f32.mrb[36].mxu0 }
 0x45e   :  { %v1922_v48 = vadd.f32 %v4153_v51, %v6062_v44  ;;  %2173 = vadd.xlane.f32.xlu1 %v2122_v23  ;;  %v1916_v7 = vpop.f32.mrb[37].mxu0 }
 0x45f   :  { %v1917_v35 = vadd.f32 %v6062_v44, %v1916_v7  ;;  %2171 = vadd.xlane.f32.xlu0 %v2121_v32 }
 0x460   :  { %v6234_v39 = vmax.f32 %v1922_v48, 0.0 }
 0x461   :  { %v6236_v34 = vmax.f32 %v1917_v35, 0.0 }
 0x462   :  { %2049 = vadd.xlane.f32.xlu1 %v6234_v39  ;;  %v2124_v55 = vmul.f32 %v6234_v39, %v6234_v39 }
 0x463   :  { %2047 = vadd.xlane.f32.xlu0 %v6236_v34  ;;  %v2123_v25 = vmul.f32 %v6236_v34, %v6236_v34 }
 0x465   :  { %v4156_v45 = vpop.f32.mrb[38].mxu0 }
 0x466   :  { %v1932_v47 = vadd.f32 %v4156_v45, %v6062_v44  ;;  %2177 = vadd.xlane.f32.xlu1 %v2124_v55  ;;  %v1926_v3 = vpop.f32.mrb[39].mxu0 }
 0x467   :  { %v1927_v28 = vadd.f32 %v6062_v44, %v1926_v3  ;;  %2175 = vadd.xlane.f32.xlu0 %v2123_v25 }
 0x468   :  { %v6246_v54 = vmax.f32 %v1932_v47, 0.0 }
 0x469   :  { %v6248_v24 = vmax.f32 %v1927_v28, 0.0 }
 0x46a   :  { %2053 = vadd.xlane.f32.xlu1 %v6246_v54  ;;  %v2126_v60 = vmul.f32 %v6246_v54, %v6246_v54 }
 0x46b   :  { %2051 = vadd.xlane.f32.xlu0 %v6248_v24  ;;  %v2125_v21 = vmul.f32 %v6248_v24, %v6248_v24 }
 0x46d   :  { %v4159_v46 = vpop.f32.mrb[40].mxu0 }
 0x46e   :  { %v1942_v42 = vadd.f32 %v4159_v46, %v6062_v44  ;;  %2181 = vadd.xlane.f32.xlu1 %v2126_v60  ;;  %v1936_v59 = vpop.f32.mrb[41].mxu0 }
 0x46f   :  { %v1937_v5 = vadd.f32 %v6062_v44, %v1936_v59  ;;  %2179 = vadd.xlane.f32.xlu0 %v2125_v21 }
 0x470   :  { %v6258_v31 = vmax.f32 %v1942_v42, 0.0 }
 0x471   :  { %v6260_v10 = vmax.f32 %v1937_v5, 0.0 }
 0x472   :  { %2057 = vadd.xlane.f32.xlu1 %v6258_v31  ;;  %v2128_v8 = vmul.f32 %v6258_v31, %v6258_v31 }
 0x473   :  { %2055 = vadd.xlane.f32.xlu0 %v6260_v10  ;;  %v2127_v43 = vmul.f32 %v6260_v10, %v6260_v10 }
 0x475   :  { %v4162_v52 = vpop.f32.mrb[42].mxu0 }
 0x476   :  { %v1952_v17 = vadd.f32 %v4162_v52, %v6062_v44  ;;  %2185 = vadd.xlane.f32.xlu1 %v2128_v8  ;;  %v1946_v18 = vpop.f32.mrb[43].mxu0 }
 0x477   :  { %v1947_v27 = vadd.f32 %v6062_v44, %v1946_v18  ;;  %2183 = vadd.xlane.f32.xlu0 %v2127_v43 }
 0x478   :  { %v6270_v58 = vmax.f32 %v1952_v17, 0.0 }
 0x479   :  { %v6272_v20 = vmax.f32 %v1947_v27, 0.0 }
 0x47a   :  { %2061 = vadd.xlane.f32.xlu1 %v6270_v58  ;;  %v2130_v26 = vmul.f32 %v6270_v58, %v6270_v58 }
 0x47b   :  { %2059 = vadd.xlane.f32.xlu0 %v6272_v20  ;;  %v2129_v40 = vmul.f32 %v6272_v20, %v6272_v20 }
 0x47d   :  { %v4165_v22 = vpop.f32.mrb[44].mxu0 }
 0x47e   :  { %v1962_v49 = vadd.f32 %v4165_v22, %v6062_v44  ;;  %2189 = vadd.xlane.f32.xlu1 %v2130_v26  ;;  %v1956_v37 = vpop.f32.mrb[45].mxu0 }
 0x47f   :  { %v1957_v30 = vadd.f32 %v6062_v44, %v1956_v37  ;;  %2187 = vadd.xlane.f32.xlu0 %v2129_v40 }
 0x480   :  { %v6282_v1 = vmax.f32 %v1962_v49, 0.0 }
 0x481   :  { %v6284_v16 = vmax.f32 %v1957_v30, 0.0 }
 0x482   :  { %2065 = vadd.xlane.f32.xlu1 %v6282_v1  ;;  %v2132_v50 = vmul.f32 %v6282_v1, %v6282_v1 }
 0x483   :  { %2063 = vadd.xlane.f32.xlu0 %v6284_v16  ;;  %v2131_v56 = vmul.f32 %v6284_v16, %v6284_v16 }
 0x485   :  { %v4168_v2 = vpop.f32.mrb[46].mxu0 }
 0x486   :  { %v1972_v23 = vadd.f32 %v4168_v2, %v6062_v44  ;;  %2193 = vadd.xlane.f32.xlu1 %v2132_v50  ;;  %v1966_v51 = vpop.f32.mrb[47].mxu0  ;;  %v2010_v7 = vpop.xlane.xlu1 %2009 }
 0x487   :  { %v1967_v32 = vadd.f32 %v6062_v44, %v1966_v51  ;;  %2191 = vadd.xlane.f32.xlu0 %v2131_v56  ;;  %v2072_v55 = vmul.f32 0.0078125, %v2010_v7  ;;  %v2008_v45 = vpop.xlane.xlu0 %2007 }
 0x488   :  { %v6294_v48 = vmax.f32 %v1972_v23, 0.0  ;;  %v2071_v25 = vmul.f32 0.0078125, %v2008_v45  ;;  %v6309_v45 = vld [vmem:[%s7248_s7 + $0x1] ss:$0 sm:$0xff] }
 0x489   :  { %v6296_v35 = vmax.f32 %v1967_v32, 0.0  ;;  %v2232_v28 = vmul.f32 %v2072_v55, %v2072_v55  ;;  %v2296_v56 = vsub.f32 %v6066_v0, %v2072_v55 }
 0x48a   :  { %2069 = vadd.xlane.f32.xlu1 %v6294_v48  ;;  %v2138_v47 = vpop.xlane.xlu1 %2137  ;;  %v2134_v3 = vmul.f32 %v6294_v48, %v6294_v48  ;;  %v2231_v21 = vmul.f32 %v2071_v25, %v2071_v25  ;;  %v2295_v32 = vsub.f32 %v6068_v12, %v2071_v25 }
 0x48b   :  { %2067 = vadd.xlane.f32.xlu0 %v6296_v35  ;;  %v2200_v60 = vmul.f32 0.0078125, %v2138_v47  ;;  %v2136_v44 = vpop.xlane.xlu0 %2135  ;;  %v2133_v46 = vmul.f32 %v6296_v35, %v6296_v35 }
 0x48c   :  { %v2199_v42 = vmul.f32 0.0078125, %v2136_v44 }
 0x48d   :  { %v2264_v59 = vsub.f32 %v2200_v60, %v2232_v28  ;;  %v6314_v60 = vld [vmem:[%s7249_s8 + $0x1] ss:$0 sm:$0xff] }
 0x48e   :  { %2197 = vadd.xlane.f32.xlu1 %v2134_v3  ;;  %v2263_v5 = vsub.f32 %v2199_v42, %v2231_v21 }
 0x48f   :  { %2195 = vadd.xlane.f32.xlu0 %v2133_v46  ;;  %v2328_v8 = vadd.f32 1e-05, %v2264_v59 }
 0x490   :  { %v2327_v52 = vadd.f32 1e-05, %v2263_v5 }
 0x491   :  { %4580 = vrsqrt.f32 %v2328_v8 }
 0x492   :  { %v2014_v43 = vpop.xlane.xlu1 %2013  ;;  %4582 = vrsqrt.f32 %v2327_v52 }
 0x493   :  { %v2074_v17 = vmul.f32 0.0078125, %v2014_v43  ;;  %v2012_v18 = vpop.xlane.xlu0 %2011 }
 0x494   :  { %v2073_v27 = vmul.f32 0.0078125, %v2012_v18 }
 0x495   :  { %v2234_v22 = vmul.f32 %v2074_v17, %v2074_v17  ;;  %v2298_v59 = vsub.f32 %v6090_v33, %v2074_v17 }
 0x496   :  { %v2142_v26 = vpop.xlane.xlu1 %2141  ;;  %v2233_v37 = vmul.f32 %v2073_v27, %v2073_v27  ;;  %v2297_v52 = vsub.f32 %v6092_v36, %v2073_v27 }
 0x497   :  { %v2202_v40 = vmul.f32 0.0078125, %v2142_v26  ;;  %v2140_v49 = vpop.xlane.xlu0 %2139 }
 0x498   :  { %v2201_v30 = vmul.f32 0.0078125, %v2140_v49 }
 0x499   :  { %v2266_v50 = vsub.f32 %v2202_v40, %v2234_v22 }
 0x49a   :  { %v2265_v2 = vsub.f32 %v2201_v30, %v2233_v37 }
 0x49b   :  { %v2330_v23 = vadd.f32 1e-05, %v2266_v50  ;;  %v4581_v51 = vpop.eup %4580 }
 0x49c   :  { %v2329_v7 = vadd.f32 1e-05, %v2265_v2  ;;  %v4583_v47 = vpop.eup %4582  ;;  %v2392_v3 = vmul.f32 %v4581_v51, %v2296_v56 }
 0x49d   :  { %4584 = vrsqrt.f32 %v2330_v23  ;;  %v2391_v28 = vmul.f32 %v4583_v47, %v2295_v32 }
 0x49e   :  { %4586 = vrsqrt.f32 %v2329_v7  ;;  %v2430_v0 = vmul.f32 %v6309_v45, %v2392_v3  ;;  %v3273_v3 = vld [vmem:[%s7254_s13] sm:$0xff] }
 0x49f   :  { %v2429_v12 = vmul.f32 %v6309_v45, %v2391_v28  ;;  %v3274_v28 = vld [vmem:[%s7254_s13 + $0x8] sm:$0xff] }
 0x4a0   :  { %v2468_v21 = vadd.f32 %v6314_v60, %v2430_v0  ;;  %v3275_v0 = vld [vmem:[%s7254_s13 + $0x10] sm:$0xff] }
 0x4a1   :  { %v2467_v25 = vadd.f32 %v6314_v60, %v2429_v12  ;;  %v4425_v12 = vpack.c.bf16 %v3274_v28, %v3273_v3 }
 0x4a2   :  { %v2018_v55 = vpop.xlane.xlu1 %2017 }
 0x4a3   :  { %v2076_v44 = vmul.f32 0.0078125, %v2018_v55  ;;  %v2016_v46 = vpop.xlane.xlu0 %2015  ;;  %4201 = vmatprep.mubr.f32.mxu1 %v2467_v25  ;;  %v3276_v55 = vld [vmem:[%s7254_s13 + $0x18] sm:$0xff]  ;;  %4426 = vmatprep.subr.bf16.mxu0 %v4425_v12 }
 0x4a4   :  { %v2075_v42 = vmul.f32 0.0078125, %v2016_v46  ;;  %4202 = vmatmul.mubr.f32.vlgmr.msra.gmra.mrb[48].mxu1 %v2468_v21  ;;  %v4429_v21 = vpack.c.bf16 %v3276_v55, %v3275_v0  ;;  %4428 = vmatpush3.bf16.msra.mxu0 %v4425_v12 }
 0x4a5   :  { %v2236_v43 = vmul.f32 %v2076_v44, %v2076_v44  ;;  %v2300_v25 = vsub.f32 %v6120_v6, %v2076_v44 }
 0x4a6   :  { %v2146_v5 = vpop.xlane.xlu1 %2145  ;;  %v2235_v40 = vmul.f32 %v2075_v42, %v2075_v42  ;;  %4430 = vmatprep.subr.bf16.mxu0 %v4429_v21 }
 0x4a7   :  { %v4585_v8 = vpop.eup %4584  ;;  %v2204_v18 = vmul.f32 0.0078125, %v2146_v5  ;;  %v2144_v26 = vpop.xlane.xlu0 %2143  ;;  %v3278_v5 = vld [vmem:[%s7254_s13 + $0x28] sm:$0xff] }
 0x4a8   :  { %v4587_v22 = vpop.eup %4586  ;;  %v2203_v49 = vmul.f32 0.0078125, %v2144_v26  ;;  %v2394_v37 = vmul.f32 %v4585_v8, %v2298_v59  ;;  %v3277_v59 = vld [vmem:[%s7254_s13 + $0x20] sm:$0xff]  ;;  %4432 = vmatpush3.bf16.msra.mxu0 %v4429_v21 }
 0x4a9   :  { %v2268_v30 = vsub.f32 %v2204_v18, %v2236_v43  ;;  %v2393_v50 = vmul.f32 %v4587_v22, %v2297_v52  ;;  %v2299_v52 = vsub.f32 %v6122_v41, %v2075_v42  ;;  %v3279_v42 = vld [vmem:[%s7254_s13 + $0x30] sm:$0xff] }
 0x4aa   :  { %v2267_v2 = vsub.f32 %v2203_v49, %v2235_v40  ;;  %v2432_v56 = vmul.f32 %v6309_v45, %v2394_v37 }
 0x4ab   :  { %v2332_v23 = vadd.f32 1e-05, %v2268_v30  ;;  %v2431_v51 = vmul.f32 %v6309_v45, %v2393_v50  ;;  %v4433_v30 = vpack.c.bf16 %v3278_v5, %v3277_v59 }
 0x4ac   :  { %v2331_v33 = vadd.f32 1e-05, %v2267_v2  ;;  %v2470_v36 = vadd.f32 %v6314_v60, %v2432_v56  ;;  %v3280_v2 = vld [vmem:[%s7254_s13 + $0x38] sm:$0xff] }
 0x4ad   :  { %4588 = vrsqrt.f32 %v2332_v23  ;;  %v2469_v17 = vadd.f32 %v6314_v60, %v2431_v51  ;;  %4434 = vmatprep.subr.bf16.mxu0 %v4433_v30 }
 0x4ae   :  { %4590 = vrsqrt.f32 %v2331_v33  ;;  %4436 = vmatpush3.bf16.msra.mxu0 %v4433_v30 }
 0x4af   :  { %4204 = vmatprep.mubr.f32.mxu1 %v2469_v17  ;;  %v4437_v17 = vpack.c.bf16 %v3280_v2, %v3279_v42 }
 0x4b0   :  { %4205 = vmatmul.mubr.f32.gmra.mrb[50].mxu1 %v2470_v36 }
 0x4b1   :  { %4438 = vmatprep.subr.bf16.mxu0 %v4437_v17 }
 0x4b2   :  { %v2022_v27 = vpop.xlane.xlu1 %2021  ;;  %4440 = vmatpush3.bf16.msra.mxu0 %v4437_v17 }
 0x4b3   :  { %v6326_v32 = vmul.f32 0.0078125, %v2022_v27  ;;  %v2020_v7 = vpop.xlane.xlu0 %2019 }
 0x4b4   :  { %v6328_v47 = vmul.f32 0.0078125, %v2020_v7 }
 0x4b5   :  { %v2238_v43 = vmul.f32 %v6326_v32, %v6326_v32  ;;  %v2302_v5 = vsub.f32 %v6150_v9, %v6326_v32  ;;  %v4710_v32 = vld [vmem:[%s7241_s0 + $0x10] sm:$0xff] }
 0x4b6   :  { %v2150_v46 = vpop.xlane.xlu1 %2149  ;;  %v2237_v44 = vmul.f32 %v6328_v47, %v6328_v47 }
 0x4b7   :  { %v4589_v8 = vpop.eup %4588  ;;  %v2206_v18 = vmul.f32 0.0078125, %v2150_v46  ;;  %v2148_v26 = vpop.xlane.xlu0 %2147 }
 0x4b8   :  { %v4591_v6 = vpop.eup %4590  ;;  %v2205_v22 = vmul.f32 0.0078125, %v2148_v26  ;;  %v2396_v40 = vmul.f32 %v4589_v8, %v2300_v25 }
 0x4b9   :  { %v2270_v49 = vsub.f32 %v2206_v18, %v2238_v43  ;;  %v2395_v37 = vmul.f32 %v4591_v6, %v2299_v52  ;;  %v2301_v18 = vsub.f32 %v6152_v29, %v6328_v47 }
 0x4ba   :  { %v2269_v50 = vsub.f32 %v2205_v22, %v2237_v44  ;;  %v2434_v41 = vmul.f32 %v6309_v45, %v2396_v40  ;;  %v4709_v22 = vld [vmem:[%s7241_s0 + $0x8] sm:$0xff] }
 0x4bb   :  { %v2334_v56 = vadd.f32 1e-05, %v2270_v49  ;;  %v2433_v23 = vmul.f32 %v6309_v45, %v2395_v37  ;;  %4266 = vmatmul.mubr.msk.f32.vlgmr.msra.gmra.mrb[48].mxu0 %vm100_vm0, %v4709_v22 }
 0x4bc   :  { %v2333_v51 = vadd.f32 1e-05, %v2269_v50  ;;  %v2472_v27 = vadd.f32 %v6314_v60, %v2434_v41  ;;  %4268 = vmatprep.mubr.msk.f32.mxu0 %vm100_vm0, %v4710_v32 }
 0x4bd   :  { %4592 = vrsqrt.f32 %v2334_v56  ;;  %v2471_v33 = vadd.f32 %v6314_v60, %v2433_v23  ;;  %v4711_v56 = vld [vmem:[%s7241_s0 + $0x18] sm:$0xff] }
 0x4be   :  { %4594 = vrsqrt.f32 %v2333_v51 }
 0x4bf   :  { %v2026_v36 = vpop.xlane.xlu1 %2025  ;;  %4207 = vmatprep.mubr.f32.mxu1 %v2471_v33  ;;  %4269 = vmatmul.mubr.msk.f32.gmra.mrb[50].mxu0 %vm100_vm0, %v4711_v56  ;;  %v4712_v33 = vld [vmem:[%s7241_s0 + $0x20] sm:$0xff]  ;;  %v4717_v56 = vld [vmem:[%s7241_s0 + $0x48] sm:$0xff] }
 0x4c0   :  { %v6364_v7 = vmul.f32 0.0078125, %v2026_v36  ;;  %v2024_v3 = vpop.xlane.xlu0 %2023  ;;  %4208 = vmatmul.mubr.f32.gmra.mrb[52].mxu1 %v2472_v27  ;;  %4271 = vmatprep.mubr.msk.f32.mxu0 %vm100_vm0, %v4712_v33  ;;  %v4718_v33 = vld [vmem:[%s7241_s0 + $0x50] sm:$0xff] }
 0x4c1   :  { %v6366_v28 = vmul.f32 0.0078125, %v2024_v3 }
 0x4c2   :  { %v2240_v12 = vmul.f32 %v6364_v7, %v6364_v7 }
 0x4c3   :  { %v2154_v0 = vpop.xlane.xlu1 %2153  ;;  %v2239_v46 = vmul.f32 %v6366_v28, %v6366_v28 }
 0x4c4   :  { %v2208_v55 = vmul.f32 0.0078125, %v2154_v0  ;;  %v2152_v25 = vpop.xlane.xlu0 %2151 }
 0x4c5   :  { %v2207_v21 = vmul.f32 0.0078125, %v2152_v25 }
 0x4c6   :  { %v2272_v59 = vsub.f32 %v2208_v55, %v2240_v12 }
 0x4c7   :  { %v2271_v8 = vsub.f32 %v2207_v21, %v2239_v46  ;;  %v2030_v52 = vpop.xlane.xlu1 %2029  ;;  %v4593_v43 = vpop.eup %4592  ;;  %v4713_v46 = vld [vmem:[%s7241_s0 + $0x28] sm:$0xff] }
 0x4c8   :  { %v2336_v26 = vadd.f32 1e-05, %v2272_v59  ;;  %v6376_v6 = vmul.f32 0.0078125, %v2030_v52  ;;  %v2028_v44 = vpop.xlane.xlu0 %2027  ;;  %v4595_v40 = vpop.eup %4594  ;;  %v2398_v9 = vmul.f32 %v4593_v43, %v2302_v5  ;;  %4272 = vmatmul.mubr.msk.f32.gmra.mrb[52].mxu0 %vm100_vm0, %v4713_v46  ;;  %v4714_v5 = vld [vmem:[%s7241_s0 + $0x30] sm:$0xff] }
 0x4c9   :  { %v2335_v49 = vadd.f32 1e-05, %v2271_v8  ;;  %v6382_v37 = vmul.f32 0.0078125, %v2028_v44  ;;  %v2397_v29 = vmul.f32 %v4595_v40, %v2301_v18  ;;  %4274 = vmatprep.mubr.msk.f32.mxu0 %vm100_vm0, %v4714_v5  ;;  %v2304_v8 = vsub.f32 %v6162_v14, %v6364_v7  ;;  %v4715_v40 = vld [vmem:[%s7241_s0 + $0x38] sm:$0xff] }
 0x4ca   :  { %4596 = vrsqrt.f32 %v2336_v26  ;;  %v2436_v30 = vmul.f32 %v6309_v45, %v2398_v9  ;;  %v2242_v50 = vmul.f32 %v6376_v6, %v6376_v6  ;;  %v2303_v18 = vsub.f32 %v6164_v53, %v6366_v28  ;;  %v4716_v53 = vld [vmem:[%s7241_s0 + $0x40] sm:$0xff]  ;;  %v4719_v5 = vld [vmem:[%s7241_s0 + $0x58] sm:$0xff] }
 0x4cb   :  { %4598 = vrsqrt.f32 %v2335_v49  ;;  %v2158_v47 = vpop.xlane.xlu1 %2157  ;;  %v2435_v2 = vmul.f32 %v6309_v45, %v2397_v29  ;;  %v2241_v23 = vmul.f32 %v6382_v37, %v6382_v37 }
 0x4cc   :  { %v2210_v41 = vmul.f32 0.0078125, %v2158_v47  ;;  %v2156_v42 = vpop.xlane.xlu0 %2155  ;;  %v2474_v0 = vadd.f32 %v6314_v60, %v2436_v30  ;;  %4275 = vmatmul.mubr.msk.f32.gmra.mrb[54].mxu0 %vm100_vm0, %v4715_v40 }
 0x4cd   :  { %v2209_v51 = vmul.f32 0.0078125, %v2156_v42  ;;  %v2473_v36 = vadd.f32 %v6314_v60, %v2435_v2  ;;  %4277 = vmatprep.mubr.msk.f32.mxu0 %vm100_vm0, %v4716_v53 }
 0x4ce   :  { %v2274_v17 = vsub.f32 %v2210_v41, %v2242_v50 }
 0x4cf   :  { %v2273_v27 = vsub.f32 %v2209_v51, %v2241_v23  ;;  %v2034_v3 = vpop.xlane.xlu1 %2033  ;;  %4210 = vmatprep.mubr.f32.mxu1 %v2473_v36  ;;  %v2306_v36 = vsub.f32 %v6174_v38, %v6376_v6 }
 0x4d0   :  { %v2338_v12 = vadd.f32 1e-05, %v2274_v17  ;;  %v6404_v55 = vmul.f32 0.0078125, %v2034_v3  ;;  %v2032_v25 = vpop.xlane.xlu0 %2031  ;;  %4211 = vmatmul.mubr.f32.gmra.mrb[54].mxu1 %v2474_v0  ;;  %4278 = vmatmul.mubr.msk.f32.gmra.mrb[56].mxu0 %vm100_vm0, %v4717_v56 }
 0x4d1   :  { %v2337_v21 = vadd.f32 1e-05, %v2273_v27  ;;  %v6410_v59 = vmul.f32 0.0078125, %v2032_v25  ;;  %4280 = vmatprep.mubr.msk.f32.mxu0 %vm100_vm0, %v4718_v33  ;;  %v4723_v33 = vld [vmem:[%s7241_s0 + $0x78] sm:$0xff] }
 0x4d2   :  { %4600 = vrsqrt.f32 %v2338_v12  ;;  %v2244_v26 = vmul.f32 %v6404_v55, %v6404_v55  ;;  %v2305_v12 = vsub.f32 %v6176_v13, %v6382_v37  ;;  %v4720_v13 = vld [vmem:[%s7241_s0 + $0x60] sm:$0xff] }
 0x4d3   :  { %4602 = vrsqrt.f32 %v2337_v21  ;;  %v2162_v52 = vpop.xlane.xlu1 %2161  ;;  %v2243_v14 = vmul.f32 %v6410_v59, %v6410_v59 }
 0x4d4   :  { %v4597_v43 = vpop.eup %4596  ;;  %v2212_v44 = vmul.f32 0.0078125, %v2162_v52  ;;  %v2160_v22 = vpop.xlane.xlu0 %2159  ;;  %4281 = vmatmul.mubr.msk.f32.gmra.mrb[58].mxu0 %vm100_vm0, %v4719_v5 }
 0x4d5   :  { %v4599_v49 = vpop.eup %4598  ;;  %v2211_v7 = vmul.f32 0.0078125, %v2160_v22  ;;  %v2400_v9 = vmul.f32 %v4597_v43, %v2304_v8  ;;  %4283 = vmatprep.mubr.msk.f32.mxu0 %vm100_vm0, %v4720_v13 }
 0x4d6   :  { %v2276_v28 = vsub.f32 %v2212_v44, %v2244_v26  ;;  %v2399_v32 = vmul.f32 %v4599_v49, %v2303_v18 }
 0x4d7   :  { %v2275_v29 = vsub.f32 %v2211_v7, %v2243_v14  ;;  %v2038_v47 = vpop.xlane.xlu1 %2037  ;;  %v2438_v30 = vmul.f32 %v6309_v45, %v2400_v9  ;;  %v4721_v7 = vld [vmem:[%s7241_s0 + $0x68] sm:$0xff] }
 0x4d8   :  { %v2340_v50 = vadd.f32 1e-05, %v2276_v28  ;;  %v6433_v41 = vmul.f32 0.0078125, %v2038_v47  ;;  %v2036_v42 = vpop.xlane.xlu0 %2035  ;;  %v2437_v2 = vmul.f32 %v6309_v45, %v2399_v32  ;;  %4284 = vmatmul.mubr.msk.f32.gmra.mrb[60].mxu0 %vm100_vm0, %v4721_v7  ;;  %v4722_v28 = vld [vmem:[%s7241_s0 + $0x70] sm:$0xff]  ;;  %v4727_v7 = vld [vmem:[%s7241_s0 + $0x98] sm:$0xff] }
 0x4d9   :  { %v2339_v23 = vadd.f32 1e-05, %v2275_v29  ;;  %v6440_v51 = vmul.f32 0.0078125, %v2036_v42  ;;  %v2476_v3 = vadd.f32 %v6314_v60, %v2438_v30  ;;  %4286 = vmatprep.mubr.msk.f32.mxu0 %vm100_vm0, %v4722_v28  ;;  %v2308_v29 = vsub.f32 %v6186_v63, %v6404_v55 }
 0x4da   :  { %4604 = vrsqrt.f32 %v2340_v50  ;;  %v2475_v17 = vadd.f32 %v6314_v60, %v2437_v2  ;;  %v2246_v25 = vmul.f32 %v6433_v41, %v6433_v41  ;;  %v2307_v42 = vsub.f32 %v6188_v4, %v6410_v59  ;;  %v4724_v4 = vld [vmem:[%s7241_s0 + $0x80] sm:$0xff] }
 0x4db   :  { %4606 = vrsqrt.f32 %v2339_v23  ;;  %v2166_v27 = vpop.xlane.xlu1 %2165  ;;  %v2245_v6 = vmul.f32 %v6440_v51, %v6440_v51 }
 0x4dc   :  { %v4601_v0 = vpop.eup %4600  ;;  %v2214_v46 = vmul.f32 0.0078125, %v2166_v27  ;;  %v2164_v21 = vpop.xlane.xlu0 %2163  ;;  %4213 = vmatprep.mubr.f32.mxu1 %v2475_v17  ;;  %4287 = vmatmul.mubr.msk.f32.gmra.mrb[62].mxu0 %vm100_vm0, %v4723_v33 }
 0x4dd   :  { %v4603_v38 = vpop.eup %4602  ;;  %v2213_v8 = vmul.f32 0.0078125, %v2164_v21  ;;  %4214 = vmatmul.mubr.f32.gmra.mrb[56].mxu1 %v2476_v3  ;;  %v2402_v52 = vmul.f32 %v4601_v0, %v2306_v36  ;;  %4289 = vmatprep.mubr.msk.f32.mxu0 %vm100_vm0, %v4724_v4 }
 0x4de   :  { %v2278_v37 = vsub.f32 %v2214_v46, %v2246_v25  ;;  %v2401_v43 = vmul.f32 %v4603_v38, %v2305_v12  ;;  %v4725_v38 = vld [vmem:[%s7241_s0 + $0x88] sm:$0xff] }
 0x4df   :  { %v2277_v18 = vsub.f32 %v2213_v8, %v2245_v6  ;;  %v2042_v26 = vpop.xlane.xlu1 %2041  ;;  %v2440_v44 = vmul.f32 %v6309_v45, %v2402_v52  ;;  %v4726_v52 = vld [vmem:[%s7241_s0 + $0x90] sm:$0xff] }
 0x4e0   :  { %v2342_v22 = vadd.f32 1e-05, %v2278_v37  ;;  %v6465_v40 = vmul.f32 0.0078125, %v2042_v26  ;;  %v2040_v49 = vpop.xlane.xlu0 %2039  ;;  %v2439_v14 = vmul.f32 %v6309_v45, %v2401_v43  ;;  %4290 = vmatmul.mubr.msk.f32.gmra.mrb[64].mxu0 %vm100_vm0, %v4725_v38  ;;  %v2310_v37 = vsub.f32 %v6198_v57, %v6433_v41 }
 0x4e1   :  { %v2341_v9 = vadd.f32 1e-05, %v2277_v18  ;;  %v6472_v53 = vmul.f32 0.0078125, %v2040_v49  ;;  %v2478_v30 = vadd.f32 %v6314_v60, %v2440_v44  ;;  %4292 = vmatprep.mubr.msk.f32.mxu0 %vm100_vm0, %v4726_v52  ;;  %v2309_v44 = vsub.f32 %v6200_v62, %v6440_v51  ;;  %v4728_v62 = vld [vmem:[%s7241_s0 + $0xa0] sm:$0xff] }
 0x4e2   :  { %4608 = vrsqrt.f32 %v2342_v22  ;;  %v2477_v32 = vadd.f32 %v6314_v60, %v2439_v14  ;;  %v2248_v2 = vmul.f32 %v6465_v40, %v6465_v40 }
 0x4e3   :  { %4610 = vrsqrt.f32 %v2341_v9  ;;  %v2170_v47 = vpop.xlane.xlu1 %2169  ;;  %v2247_v55 = vmul.f32 %v6472_v53, %v6472_v53 }
 0x4e4   :  { %v4605_v50 = vpop.eup %4604  ;;  %v2216_v56 = vmul.f32 0.0078125, %v2170_v47  ;;  %v2168_v23 = vpop.xlane.xlu0 %2167  ;;  %4216 = vmatprep.mubr.f32.mxu1 %v2477_v32  ;;  %4293 = vmatmul.mubr.msk.f32.gmra.mrb[66].mxu0 %vm100_vm0, %v4727_v7  ;;  %v4734_v7 = vld [vmem:[%s7241_s0 + $0xd0] sm:$0xff] }
 0x4e5   :  { %v4607_v63 = vpop.eup %4606  ;;  %v2215_v17 = vmul.f32 0.0078125, %v2168_v23  ;;  %4217 = vmatmul.mubr.f32.gmra.mrb[58].mxu1 %v2478_v30  ;;  %v2404_v36 = vmul.f32 %v4605_v50, %v2308_v29  ;;  %4295 = vmatprep.mubr.msk.f32.mxu0 %vm100_vm0, %v4728_v62  ;;  %v4729_v23 = vld [vmem:[%s7241_s0 + $0xa8] sm:$0xff] }
 0x4e6   :  { %v2280_v59 = vsub.f32 %v2216_v56, %v2248_v2  ;;  %v2403_v27 = vmul.f32 %v4607_v63, %v2307_v42 }
 0x4e7   :  { %v2279_v3 = vsub.f32 %v2215_v17, %v2247_v55  ;;  %v2046_v0 = vpop.xlane.xlu1 %2045  ;;  %v2442_v12 = vmul.f32 %v6309_v45, %v2404_v36  ;;  %v4730_v55 = vld [vmem:[%s7241_s0 + $0xb0] sm:$0xff]  ;;  %v2312_v36 = vsub.f32 %v6210_v61, %v6465_v40 }
 0x4e8   :  { %v2344_v25 = vadd.f32 1e-05, %v2280_v59  ;;  %v6497_v46 = vmul.f32 0.0078125, %v2046_v0  ;;  %v2044_v21 = vpop.xlane.xlu0 %2043  ;;  %v2441_v5 = vmul.f32 %v6309_v45, %v2403_v27  ;;  %4296 = vmatmul.mubr.msk.f32.gmra.mrb[68].mxu0 %vm100_vm0, %v4729_v23 }
 0x4e9   :  { %v2343_v6 = vadd.f32 1e-05, %v2279_v3  ;;  %v6504_v8 = vmul.f32 0.0078125, %v2044_v21  ;;  %v2480_v18 = vadd.f32 %v6314_v60, %v2442_v12  ;;  %4298 = vmatprep.mubr.msk.f32.mxu0 %vm100_vm0, %v4730_v55  ;;  %v2311_v3 = vsub.f32 %v6212_v19, %v6472_v53  ;;  %v4731_v21 = vld [vmem:[%s7241_s0 + $0xb8] sm:$0xff]  ;;  %v4732_v19 = vld [vmem:[%s7241_s0 + $0xc0] sm:$0xff] }
 0x4ea   :  { %4612 = vrsqrt.f32 %v2344_v25  ;;  %v2479_v13 = vadd.f32 %v6314_v60, %v2441_v5  ;;  %v2250_v22 = vmul.f32 %v6497_v46, %v6497_v46 }
 0x4eb   :  { %4614 = vrsqrt.f32 %v2343_v6  ;;  %v2174_v43 = vpop.xlane.xlu1 %2173  ;;  %v2249_v41 = vmul.f32 %v6504_v8, %v6504_v8 }
 0x4ec   :  { %v4609_v26 = vpop.eup %4608  ;;  %v2218_v49 = vmul.f32 0.0078125, %v2174_v43  ;;  %v2172_v14 = vpop.xlane.xlu0 %2171  ;;  %4219 = vmatprep.mubr.f32.mxu1 %v2479_v13  ;;  %4299 = vmatmul.mubr.msk.f32.gmra.mrb[70].mxu0 %vm100_vm0, %v4731_v21 }
 0x4ed   :  { %v4611_v57 = vpop.eup %4610  ;;  %v2217_v9 = vmul.f32 0.0078125, %v2172_v14  ;;  %4220 = vmatmul.mubr.f32.gmra.mrb[60].mxu1 %v2480_v18  ;;  %v2406_v28 = vmul.f32 %v4609_v26, %v2310_v37  ;;  %4301 = vmatprep.mubr.msk.f32.mxu0 %vm100_vm0, %v4732_v19 }
 0x4ee   :  { %v2282_v51 = vsub.f32 %v2218_v49, %v2250_v22  ;;  %v2405_v32 = vmul.f32 %v4611_v57, %v2309_v44  ;;  %v4733_v22 = vld [vmem:[%s7241_s0 + $0xc8] sm:$0xff] }
 0x4ef   :  { %v2281_v29 = vsub.f32 %v2217_v9, %v2249_v41  ;;  %v2050_v47 = vpop.xlane.xlu1 %2049  ;;  %v2444_v30 = vmul.f32 %v6309_v45, %v2406_v28  ;;  %v2314_v41 = vsub.f32 %v6222_v15, %v6497_v46 }
 0x4f0   :  { %v2346_v50 = vadd.f32 1e-05, %v2282_v51  ;;  %v6529_v42 = vmul.f32 0.0078125, %v2050_v47  ;;  %v2048_v2 = vpop.xlane.xlu0 %2047  ;;  %v2443_v56 = vmul.f32 %v6309_v45, %v2405_v32  ;;  %4302 = vmatmul.mubr.msk.f32.gmra.mrb[72].mxu0 %vm100_vm0, %v4733_v22  ;;  %v2313_v51 = vsub.f32 %v6224_v11, %v6504_v8  ;;  %v4736_v11 = vld [vmem:[%s7241_s0 + $0xe0] sm:$0xff] }
 0x4f1   :  { %v2345_v33 = vadd.f32 1e-05, %v2281_v29  ;;  %v6536_v63 = vmul.f32 0.0078125, %v2048_v2  ;;  %v2482_v59 = vadd.f32 %v6314_v60, %v2444_v30  ;;  %4304 = vmatprep.mubr.msk.f32.mxu0 %vm100_vm0, %v4734_v7  ;;  %v4735_v30 = vld [vmem:[%s7241_s0 + $0xd8] sm:$0xff] }
 0x4f2   :  { %4616 = vrsqrt.f32 %v2346_v50  ;;  %v2481_v17 = vadd.f32 %v6314_v60, %v2443_v56  ;;  %v2252_v0 = vmul.f32 %v6529_v42, %v6529_v42  ;;  %v2316_v21 = vsub.f32 %v6234_v39, %v6529_v42 }
 0x4f3   :  { %4618 = vrsqrt.f32 %v2345_v33  ;;  %v2178_v4 = vpop.xlane.xlu1 %2177  ;;  %v2251_v40 = vmul.f32 %v6536_v63, %v6536_v63 }
 0x4f4   :  { %v4613_v27 = vpop.eup %4612  ;;  %v2220_v12 = vmul.f32 0.0078125, %v2178_v4  ;;  %v2176_v25 = vpop.xlane.xlu0 %2175  ;;  %4222 = vmatprep.mubr.f32.mxu1 %v2481_v17  ;;  %4305 = vmatmul.mubr.msk.f32.gmra.mrb[74].mxu0 %vm100_vm0, %v4735_v30 }
 0x4f5   :  { %v4615_v61 = vpop.eup %4614  ;;  %v2219_v5 = vmul.f32 0.0078125, %v2176_v25  ;;  %4223 = vmatmul.mubr.f32.gmra.mrb[62].mxu1 %v2482_v59  ;;  %v2408_v38 = vmul.f32 %v4613_v27, %v2312_v36  ;;  %4307 = vmatprep.mubr.msk.f32.mxu0 %vm100_vm0, %v4736_v11  ;;  %v4737_v27 = vld [vmem:[%s7241_s0 + $0xe8] sm:$0xff] }
 0x4f6   :  { %v2284_v53 = vsub.f32 %v2220_v12, %v2252_v0  ;;  %v2407_v6 = vmul.f32 %v4615_v61, %v2311_v3  ;;  %v4738_v12 = vld [vmem:[%s7241_s0 + $0xf0] sm:$0xff] }
 0x4f7   :  { %v2283_v52 = vsub.f32 %v2219_v5, %v2251_v40  ;;  %v2054_v13 = vpop.xlane.xlu1 %2053  ;;  %v2446_v37 = vmul.f32 %v6309_v45, %v2408_v38  ;;  %v2315_v38 = vsub.f32 %v6236_v34, %v6536_v63 }
 0x4f8   :  { %v2348_v43 = vadd.f32 1e-05, %v2284_v53  ;;  %v6561_v18 = vmul.f32 0.0078125, %v2054_v13  ;;  %v2052_v26 = vpop.xlane.xlu0 %2051  ;;  %v2445_v44 = vmul.f32 %v6309_v45, %v2407_v6  ;;  %4308 = vmatmul.mubr.msk.f32.gmra.mrb[76].mxu0 %vm100_vm0, %v4737_v27 }
 0x4f9   :  { %v2347_v49 = vadd.f32 1e-05, %v2283_v52  ;;  %v6568_v14 = vmul.f32 0.0078125, %v2052_v26  ;;  %v2484_v28 = vadd.f32 %v6314_v60, %v2446_v37  ;;  %4310 = vmatprep.mubr.msk.f32.mxu0 %vm100_vm0, %v4738_v12  ;;  %v4739_v52 = vld [vmem:[%s7241_s0 + $0xf8] sm:$0xff] }
 0x4fa   :  { %4620 = vrsqrt.f32 %v2348_v43  ;;  %v2483_v57 = vadd.f32 %v6314_v60, %v2445_v44  ;;  %v2254_v32 = vmul.f32 %v6561_v18, %v6561_v18 }
 0x4fb   :  { %4622 = vrsqrt.f32 %v2347_v49  ;;  %v2182_v9 = vpop.xlane.xlu1 %2181  ;;  %v2253_v46 = vmul.f32 %v6568_v14, %v6568_v14 }
 0x4fc   :  { %v4617_v62 = vpop.eup %4616  ;;  %v2222_v29 = vmul.f32 0.0078125, %v2182_v9  ;;  %v2180_v47 = vpop.xlane.xlu0 %2179  ;;  %4225 = vmatprep.mubr.f32.mxu1 %v2483_v57  ;;  %4311 = vmatmul.mubr.msk.f32.gmra.mrb[78].mxu0 %vm100_vm0, %v4739_v52 }
 0x4fd   :  { %v4619_v15 = vpop.eup %4618  ;;  %v2221_v50 = vmul.f32 0.0078125, %v2180_v47  ;;  %4226 = vmatmul.mubr.f32.gmra.mrb[64].mxu1 %v2484_v28  ;;  %v2410_v2 = vmul.f32 %v4617_v62, %v2314_v41  ;;  %v2318_v62 = vsub.f32 %v6246_v54, %v6561_v18  ;;  %v2317_v47 = vsub.f32 %v6248_v24, %v6568_v14 }
 0x4fe   :  { %v2286_v8 = vsub.f32 %v2222_v29, %v2254_v32  ;;  %v2409_v56 = vmul.f32 %v4619_v15, %v2313_v51 }
 0x4ff   :  { %v2285_v23 = vsub.f32 %v2221_v50, %v2253_v46  ;;  %v2058_v33 = vpop.xlane.xlu1 %2057  ;;  %v2448_v55 = vmul.f32 %v6309_v45, %v2410_v2 }
 0x500   :  { %v2350_v17 = vadd.f32 1e-05, %v2286_v8  ;;  %v6593_v36 = vmul.f32 0.0078125, %v2058_v33  ;;  %v2056_v4 = vpop.xlane.xlu0 %2055  ;;  %v2447_v59 = vmul.f32 %v6309_v45, %v2409_v56 }
 0x501   :  { %v2349_v3 = vadd.f32 1e-05, %v2285_v23  ;;  %v6600_v0 = vmul.f32 0.0078125, %v2056_v4  ;;  %v2486_v40 = vadd.f32 %v6314_v60, %v2448_v55 }
 0x502   :  { %4624 = vrsqrt.f32 %v2350_v17  ;;  %v2485_v25 = vadd.f32 %v6314_v60, %v2447_v59  ;;  %v2256_v19 = vmul.f32 %v6593_v36, %v6593_v36 }
 0x503   :  { %4626 = vrsqrt.f32 %v2349_v3  ;;  %v2186_v61 = vpop.xlane.xlu1 %2185  ;;  %v2255_v42 = vmul.f32 %v6600_v0, %v6600_v0  ;;  %v2320_v3 = vsub.f32 %v6258_v31, %v6593_v36 }
 0x504   :  { %v4621_v5 = vpop.eup %4620  ;;  %v2224_v53 = vmul.f32 0.0078125, %v2186_v61  ;;  %v2184_v6 = vpop.xlane.xlu0 %2183  ;;  %4228 = vmatprep.mubr.f32.mxu1 %v2485_v25  ;;  %v2319_v61 = vsub.f32 %v6260_v10, %v6600_v0 }
 0x505   :  { %v4623_v39 = vpop.eup %4622  ;;  %v2223_v13 = vmul.f32 0.0078125, %v2184_v6  ;;  %4229 = vmatmul.mubr.f32.gmra.mrb[66].mxu1 %v2486_v40  ;;  %v2412_v37 = vmul.f32 %v4621_v5, %v2316_v21 }
 0x506   :  { %v2288_v34 = vsub.f32 %v2224_v53, %v2256_v19  ;;  %v2411_v63 = vmul.f32 %v4623_v39, %v2315_v38 }
 0x507   :  { %v2287_v43 = vsub.f32 %v2223_v13, %v2255_v42  ;;  %v2062_v26 = vpop.xlane.xlu1 %2061  ;;  %v2450_v44 = vmul.f32 %v6309_v45, %v2412_v37 }
 0x508   :  { %v2352_v22 = vadd.f32 1e-05, %v2288_v34  ;;  %v6621_v49 = vmul.f32 0.0078125, %v2062_v26  ;;  %v2060_v7 = vpop.xlane.xlu0 %2059  ;;  %v2449_v57 = vmul.f32 %v6309_v45, %v2411_v63 }
 0x509   :  { %v2351_v41 = vadd.f32 1e-05, %v2287_v43  ;;  %v6624_v9 = vmul.f32 0.0078125, %v2060_v7  ;;  %v2488_v32 = vadd.f32 %v6314_v60, %v2450_v44 }
 0x50a   :  { %4628 = vrsqrt.f32 %v2352_v22  ;;  %v2487_v28 = vadd.f32 %v6314_v60, %v2449_v57  ;;  %v2258_v30 = vmul.f32 %v6621_v49, %v6621_v49  ;;  %v2322_v44 = vsub.f32 %v6270_v58, %v6621_v49 }
 0x50b   :  { %4630 = vrsqrt.f32 %v2351_v41  ;;  %v2190_v51 = vpop.xlane.xlu1 %2189  ;;  %v2257_v2 = vmul.f32 %v6624_v9, %v6624_v9  ;;  %v2321_v41 = vsub.f32 %v6272_v20, %v6624_v9 }
 0x50c   :  { %v4625_v29 = vpop.eup %4624  ;;  %v2226_v15 = vmul.f32 0.0078125, %v2190_v51  ;;  %v2188_v46 = vpop.xlane.xlu0 %2187  ;;  %4231 = vmatprep.mubr.f32.mxu1 %v2487_v28 }
 0x50d   :  { %v4627_v50 = vpop.eup %4626  ;;  %v2225_v11 = vmul.f32 0.0078125, %v2188_v46  ;;  %4232 = vmatmul.mubr.f32.gmra.mrb[68].mxu1 %v2488_v32  ;;  %v2414_v54 = vmul.f32 %v4625_v29, %v2318_v62 }
 0x50e   :  { %v2290_v18 = vsub.f32 %v2226_v15, %v2258_v30  ;;  %v2413_v8 = vmul.f32 %v4627_v50, %v2317_v47 }
 0x50f   :  { %v2289_v56 = vsub.f32 %v2225_v11, %v2257_v2  ;;  %v2066_v23 = vpop.xlane.xlu1 %2065  ;;  %v2452_v33 = vmul.f32 %v6309_v45, %v2414_v54 }
 0x510   :  { %v2354_v24 = vadd.f32 1e-05, %v2290_v18  ;;  %v6637_v14 = vmul.f32 0.0078125, %v2066_v23  ;;  %v2064_v55 = vpop.xlane.xlu0 %2063  ;;  %v2451_v17 = vmul.f32 %v6309_v45, %v2413_v8 }
 0x511   :  { %v2353_v4 = vadd.f32 1e-05, %v2289_v56  ;;  %v6640_v59 = vmul.f32 0.0078125, %v2064_v55  ;;  %v2490_v25 = vadd.f32 %v6314_v60, %v2452_v33 }
 0x512   :  { %4632 = vrsqrt.f32 %v2354_v24  ;;  %v2489_v27 = vadd.f32 %v6314_v60, %v2451_v17  ;;  %v2260_v40 = vmul.f32 %v6637_v14, %v6637_v14  ;;  %v2324_v9 = vsub.f32 %v6282_v1, %v6637_v14 }
 0x513   :  { %4634 = vrsqrt.f32 %v2353_v4  ;;  %v2194_v12 = vpop.xlane.xlu1 %2193  ;;  %v2259_v53 = vmul.f32 %v6640_v59, %v6640_v59  ;;  %v2323_v8 = vsub.f32 %v6284_v16, %v6640_v59 }
 0x514   :  { %v4629_v21 = vpop.eup %4628  ;;  %v2228_v5 = vmul.f32 0.0078125, %v2194_v12  ;;  %v2192_v38 = vpop.xlane.xlu0 %2191  ;;  %4234 = vmatprep.mubr.f32.mxu1 %v2489_v27 }
 0x515   :  { %v4631_v19 = vpop.eup %4630  ;;  %v2227_v6 = vmul.f32 0.0078125, %v2192_v38  ;;  %4235 = vmatmul.mubr.f32.gmra.mrb[70].mxu1 %v2490_v25  ;;  %v2416_v31 = vmul.f32 %v4629_v21, %v2320_v3 }
 0x516   :  { %v2292_v36 = vsub.f32 %v2228_v5, %v2260_v40  ;;  %v2415_v52 = vmul.f32 %v4631_v19, %v2319_v61 }
 0x517   :  { %v2291_v39 = vsub.f32 %v2227_v6, %v2259_v53  ;;  %v2070_v42 = vpop.xlane.xlu1 %2069  ;;  %v2454_v13 = vmul.f32 %v6309_v45, %v2416_v31 }
 0x518   :  { %v2356_v10 = vadd.f32 1e-05, %v2292_v36  ;;  %v2102_v0 = vmul.f32 0.0078125, %v2070_v42  ;;  %v2068_v37 = vpop.xlane.xlu0 %2067  ;;  %v2453_v34 = vmul.f32 %v6309_v45, %v2415_v52 }
 0x519   :  { %v2355_v63 = vadd.f32 1e-05, %v2291_v39  ;;  %v2101_v43 = vmul.f32 0.0078125, %v2068_v37  ;;  %v2492_v7 = vadd.f32 %v6314_v60, %v2454_v13 }
 0x51a   :  { %4636 = vrsqrt.f32 %v2356_v10  ;;  %v2491_v26 = vadd.f32 %v6314_v60, %v2453_v34  ;;  %v2262_v28 = vmul.f32 %v2102_v0, %v2102_v0  ;;  %v2326_v1 = vsub.f32 %v6294_v48, %v2102_v0  ;;  %v6681_v48 = vld [vmem:[%s7251_s10] ss:$0 sm:$0xff] }
 0x51b   :  { %4638 = vrsqrt.f32 %v2355_v63  ;;  %v2198_v22 = vpop.xlane.xlu1 %2197  ;;  %v2261_v29 = vmul.f32 %v2101_v43, %v2101_v43  ;;  %v2325_v27 = vsub.f32 %v6296_v35, %v2101_v43 }
 0x51c   :  { %v4633_v57 = vpop.eup %4632  ;;  %v2230_v62 = vmul.f32 0.0078125, %v2198_v22  ;;  %v2196_v51 = vpop.xlane.xlu0 %2195  ;;  %4237 = vmatprep.mubr.f32.mxu1 %v2491_v26 }
 0x51d   :  { %v4635_v32 = vpop.eup %4634  ;;  %v2229_v47 = vmul.f32 0.0078125, %v2196_v51  ;;  %4238 = vmatmul.mubr.f32.gmra.mrb[72].mxu1 %v2492_v7  ;;  %v2418_v30 = vmul.f32 %v4633_v57, %v2322_v44 }
 0x51e   :  { %v2294_v15 = vsub.f32 %v2230_v62, %v2262_v28  ;;  %v2417_v46 = vmul.f32 %v4635_v32, %v2321_v41 }
 0x51f   :  { %v2293_v58 = vsub.f32 %v2229_v47, %v2261_v29  ;;  %v2456_v49 = vmul.f32 %v6309_v45, %v2418_v30 }
 0x520   :  { %v2358_v50 = vadd.f32 1e-05, %v2294_v15  ;;  %v2455_v2 = vmul.f32 %v6309_v45, %v2417_v46 }
 0x521   :  { %v2357_v11 = vadd.f32 1e-05, %v2293_v58  ;;  %v2494_v54 = vadd.f32 %v6314_v60, %v2456_v49 }
 0x522   :  { %4640 = vrsqrt.f32 %v2358_v50  ;;  %v2493_v20 = vadd.f32 %v6314_v60, %v2455_v2 }
 0x523   :  { %4642 = vrsqrt.f32 %v2357_v11 }
 0x524   :  { %v4637_v18 = vpop.eup %4636  ;;  %4240 = vmatprep.mubr.f32.mxu1 %v2493_v20 }
 0x525   :  { %v4639_v56 = vpop.eup %4638  ;;  %4241 = vmatmul.mubr.f32.gmra.mrb[74].mxu1 %v2494_v54  ;;  %v2420_v23 = vmul.f32 %v4637_v18, %v2324_v9 }
 0x526   :  { %v2419_v33 = vmul.f32 %v4639_v56, %v2323_v8 }
 0x527   :  { %v2458_v24 = vmul.f32 %v6309_v45, %v2420_v23 }
 0x528   :  { %v2457_v55 = vmul.f32 %v6309_v45, %v2419_v33 }
 0x529   :  { %v2496_v14 = vadd.f32 %v6314_v60, %v2458_v24 }
 0x52a   :  { %v2495_v17 = vadd.f32 %v6314_v60, %v2457_v55 }
 0x52c   :  { %v4641_v4 = vpop.eup %4640  ;;  %4243 = vmatprep.mubr.f32.mxu1 %v2495_v17 }
 0x52d   :  { %v4643_v16 = vpop.eup %4642  ;;  %4244 = vmatmul.mubr.f32.gmra.mrb[76].mxu1 %v2496_v14  ;;  %v2422_v59 = vmul.f32 %v4641_v4, %v2326_v1 }
 0x52e   :  { %v2421_v3 = vmul.f32 %v4643_v16, %v2325_v27 }
 0x52f   :  { %v2460_v12 = vmul.f32 %v6309_v45, %v2422_v59 }
 0x530   :  { %v2459_v25 = vmul.f32 %v6309_v45, %v2421_v3 }
 0x531   :  { %v2498_v61 = vadd.f32 %v6314_v60, %v2460_v12 }
 0x532   :  { %v2497_v21 = vadd.f32 %v6314_v60, %v2459_v25 }
 0x534   :  { %4246 = vmatprep.mubr.f32.mxu1 %v2497_v21 }
 0x535   :  { %4247 = vmatmul.mubr.f32.gmra.mrb[78].mxu1 %v2498_v61 }
 0x577   :  { %v4203_v35 = vpop.f32.mrb[48].mxu1 }
 0x578   :  { %v2596_v40 = vadd.f32 %v4203_v35, %v6681_v48  ;;  %v2590_v5 = vpop.f32.mrb[49].mxu1 }
 0x579   :  { %v2591_v38 = vadd.f32 %v6681_v48, %v2590_v5 }
 0x57a   :  { %v6685_v19 = vmax.f32 %v2596_v40, 0.0 }
 0x57b   :  { %v6687_v45 = vmax.f32 %v2591_v38, 0.0 }
 0x57c   :  { %2783 = vadd.xlane.f32.xlu1 %v6685_v19  ;;  %v2878_v60 = vmul.f32 %v6685_v19, %v6685_v19 }
 0x57d   :  { %2781 = vadd.xlane.f32.xlu0 %v6687_v45  ;;  %v2877_v53 = vmul.f32 %v6687_v45, %v6687_v45 }
 0x580   :  { %2911 = vadd.xlane.f32.xlu1 %v2878_v60 }
 0x581   :  { %2909 = vadd.xlane.f32.xlu0 %v2877_v53 }
 0x583   :  { %v4206_v6 = vpop.f32.mrb[50].mxu1 }
 0x584   :  { %v2606_v31 = vadd.f32 %v4206_v6, %v6681_v48  ;;  %v2600_v36 = vpop.f32.mrb[51].mxu1 }
 0x585   :  { %v2601_v52 = vadd.f32 %v6681_v48, %v2600_v36 }
 0x586   :  { %v6697_v39 = vmax.f32 %v2606_v31, 0.0 }
 0x587   :  { %v6699_v42 = vmax.f32 %v2601_v52, 0.0 }
 0x588   :  { %2787 = vadd.xlane.f32.xlu1 %v6697_v39  ;;  %v2880_v13 = vmul.f32 %v6697_v39, %v6697_v39 }
 0x589   :  { %2785 = vadd.xlane.f32.xlu0 %v6699_v42  ;;  %v2879_v10 = vmul.f32 %v6699_v42, %v6699_v42 }
 0x58c   :  { %2915 = vadd.xlane.f32.xlu1 %v2880_v13 }
 0x58d   :  { %2913 = vadd.xlane.f32.xlu0 %v2879_v10 }
 0x58e   :  { %v6719_v57 = vpop.f32.mrb[48].mxu0 }
 0x58f   :  { %v6722_v62 = vpop.f32.mrb[49].mxu0 }
 0x592   :  { %v6735_v46 = vpop.f32.mrb[50].mxu0 }
 0x593   :  { %v4209_v0 = vpop.f32.mrb[52].mxu1  ;;  %v6738_v50 = vpop.f32.mrb[51].mxu0 }
 0x594   :  { %v2616_v37 = vadd.f32 %v4209_v0, %v6681_v48  ;;  %v2610_v34 = vpop.f32.mrb[53].mxu1 }
 0x595   :  { %v2611_v63 = vadd.f32 %v6681_v48, %v2610_v34 }
 0x596   :  { %v6709_v43 = vmax.f32 %v2616_v37, 0.0 }
 0x597   :  { %v6711_v26 = vmax.f32 %v2611_v63, 0.0 }
 0x598   :  { %2791 = vadd.xlane.f32.xlu1 %v6709_v43  ;;  %v2882_v44 = vmul.f32 %v6709_v43, %v6709_v43 }
 0x599   :  { %2789 = vadd.xlane.f32.xlu0 %v6711_v26  ;;  %v2881_v22 = vmul.f32 %v6711_v26, %v6711_v26 }
 0x59b   :  { %v6763_v14 = vpop.f32.mrb[52].mxu0 }
 0x59c   :  { %2919 = vadd.xlane.f32.xlu1 %v2882_v44  ;;  %v6766_v16 = vpop.f32.mrb[53].mxu0 }
 0x59d   :  { %2917 = vadd.xlane.f32.xlu0 %v2881_v22 }
 0x59f   :  { %v6791_v36 = vpop.f32.mrb[54].mxu0 }
 0x5a0   :  { %v6794_v10 = vpop.f32.mrb[55].mxu0 }
 0x5a3   :  { %v4212_v7 = vpop.f32.mrb[54].mxu1 }
 0x5a4   :  { %v2626_v41 = vadd.f32 %v4212_v7, %v6681_v48  ;;  %v2620_v28 = vpop.f32.mrb[55].mxu1 }
 0x5a5   :  { %v2621_v51 = vadd.f32 %v6681_v48, %v2620_v28 }
 0x5a6   :  { %v6725_v32 = vmax.f32 %v2626_v41, 0.0 }
 0x5a7   :  { %v6727_v29 = vmax.f32 %v2621_v51, 0.0 }
 0x5a8   :  { %2795 = vadd.xlane.f32.xlu1 %v6725_v32  ;;  %v2884_v47 = vmul.f32 %v6725_v32, %v6725_v32 }
 0x5a9   :  { %2793 = vadd.xlane.f32.xlu0 %v6727_v29  ;;  %v2883_v30 = vmul.f32 %v6727_v29, %v6727_v29 }
 0x5ac   :  { %2923 = vadd.xlane.f32.xlu1 %v2884_v47 }
 0x5ad   :  { %2921 = vadd.xlane.f32.xlu0 %v2883_v30  ;;  %v6813_v30 = vpop.f32.mrb[56].mxu0 }
 0x5b0   :  { %v4215_v15 = vpop.f32.mrb[56].mxu1 }
 0x5b1   :  { %v2636_v58 = vadd.f32 %v4215_v15, %v6681_v48  ;;  %v2630_v49 = vpop.f32.mrb[57].mxu1  ;;  %v6816_v15 = vpop.f32.mrb[57].mxu0 }
 0x5b2   :  { %v2631_v2 = vadd.f32 %v6681_v48, %v2630_v49 }
 0x5b3   :  { %v6741_v11 = vmax.f32 %v2636_v58, 0.0 }
 0x5b4   :  { %v6743_v20 = vmax.f32 %v2631_v2, 0.0 }
 0x5b5   :  { %2799 = vadd.xlane.f32.xlu1 %v6741_v11  ;;  %v2886_v9 = vmul.f32 %v6741_v11, %v6741_v11 }
 0x5b6   :  { %2797 = vadd.xlane.f32.xlu0 %v6743_v20  ;;  %v2885_v18 = vmul.f32 %v6743_v20, %v6743_v20 }
 0x5b8   :  { %v4218_v54 = vpop.f32.mrb[58].mxu1 }
 0x5b9   :  { %v2646_v8 = vadd.f32 %v4218_v54, %v6681_v48  ;;  %2927 = vadd.xlane.f32.xlu1 %v2886_v9  ;;  %v2640_v56 = vpop.f32.mrb[59].mxu1 }
 0x5ba   :  { %v2641_v23 = vadd.f32 %v6681_v48, %v2640_v56  ;;  %2925 = vadd.xlane.f32.xlu0 %v2885_v18 }
 0x5bb   :  { %v6753_v33 = vmax.f32 %v2646_v8, 0.0 }
 0x5bc   :  { %v6755_v24 = vmax.f32 %v2641_v23, 0.0  ;;  %v6829_v23 = vpop.f32.mrb[58].mxu0 }
 0x5bd   :  { %2803 = vadd.xlane.f32.xlu1 %v6753_v33  ;;  %v2888_v55 = vmul.f32 %v6753_v33, %v6753_v33 }
 0x5be   :  { %2801 = vadd.xlane.f32.xlu0 %v6755_v24  ;;  %v2887_v1 = vmul.f32 %v6755_v24, %v6755_v24 }
 0x5c0   :  { %v4221_v17 = vpop.f32.mrb[60].mxu1 }
 0x5c1   :  { %v2656_v4 = vadd.f32 %v4221_v17, %v6681_v48  ;;  %2931 = vadd.xlane.f32.xlu1 %v2888_v55  ;;  %v2650_v27 = vpop.f32.mrb[61].mxu1  ;;  %v6832_v55 = vpop.f32.mrb[59].mxu0 }
 0x5c2   :  { %v2651_v59 = vadd.f32 %v6681_v48, %v2650_v27  ;;  %2929 = vadd.xlane.f32.xlu0 %v2887_v1 }
 0x5c3   :  { %v6769_v3 = vmax.f32 %v2656_v4, 0.0 }
 0x5c4   :  { %v6771_v12 = vmax.f32 %v2651_v59, 0.0 }
 0x5c5   :  { %2807 = vadd.xlane.f32.xlu1 %v6769_v3  ;;  %v2890_v25 = vmul.f32 %v6769_v3, %v6769_v3 }
 0x5c6   :  { %2805 = vadd.xlane.f32.xlu0 %v6771_v12  ;;  %v2889_v61 = vmul.f32 %v6771_v12, %v6771_v12 }
 0x5c8   :  { %v4224_v21 = vpop.f32.mrb[62].mxu1 }
 0x5c9   :  { %v2666_v35 = vadd.f32 %v4224_v21, %v6681_v48  ;;  %2935 = vadd.xlane.f32.xlu1 %v2890_v25  ;;  %v2660_v40 = vpop.f32.mrb[63].mxu1 }
 0x5ca   :  { %v2661_v5 = vadd.f32 %v6681_v48, %v2660_v40  ;;  %2933 = vadd.xlane.f32.xlu0 %v2889_v61 }
 0x5cb   :  { %v6781_v38 = vmax.f32 %v2666_v35, 0.0  ;;  %v6845_v35 = vpop.f32.mrb[60].mxu0 }
 0x5cc   :  { %v6783_v60 = vmax.f32 %v2661_v5, 0.0  ;;  %v6848_v40 = vpop.f32.mrb[61].mxu0 }
 0x5cd   :  { %2811 = vadd.xlane.f32.xlu1 %v6781_v38  ;;  %v2892_v53 = vmul.f32 %v6781_v38, %v6781_v38 }
 0x5ce   :  { %2809 = vadd.xlane.f32.xlu0 %v6783_v60  ;;  %v2891_v31 = vmul.f32 %v6783_v60, %v6783_v60 }
 0x5d0   :  { %v4227_v6 = vpop.f32.mrb[64].mxu1 }
 0x5d1   :  { %v2676_v52 = vadd.f32 %v4227_v6, %v6681_v48  ;;  %2939 = vadd.xlane.f32.xlu1 %v2892_v53  ;;  %v2670_v13 = vpop.f32.mrb[65].mxu1 }
 0x5d2   :  { %v2671_v0 = vadd.f32 %v6681_v48, %v2670_v13  ;;  %2937 = vadd.xlane.f32.xlu0 %v2891_v31 }
 0x5d3   :  { %v6797_v37 = vmax.f32 %v2676_v52, 0.0 }
 0x5d4   :  { %v6799_v34 = vmax.f32 %v2671_v0, 0.0 }
 0x5d5   :  { %2815 = vadd.xlane.f32.xlu1 %v6797_v37  ;;  %v2894_v63 = vmul.f32 %v6797_v37, %v6797_v37 }
 0x5d6   :  { %2813 = vadd.xlane.f32.xlu0 %v6799_v34  ;;  %v2893_v22 = vmul.f32 %v6799_v34, %v6799_v34 }
 0x5d8   :  { %v4230_v44 = vpop.f32.mrb[66].mxu1 }
 0x5d9   :  { %v2686_v7 = vadd.f32 %v4230_v44, %v6681_v48  ;;  %2943 = vadd.xlane.f32.xlu1 %v2894_v63  ;;  %v2680_v41 = vpop.f32.mrb[67].mxu1  ;;  %v6861_v44 = vpop.f32.mrb[62].mxu0 }
 0x5da   :  { %v2681_v28 = vadd.f32 %v6681_v48, %v2680_v41  ;;  %2941 = vadd.xlane.f32.xlu0 %v2893_v22  ;;  %v6864_v22 = vpop.f32.mrb[63].mxu0 }
 0x5db   :  { %v6809_v51 = vmax.f32 %v2686_v7, 0.0 }
 0x5dc   :  { %v6811_v47 = vmax.f32 %v2681_v28, 0.0 }
 0x5dd   :  { %2819 = vadd.xlane.f32.xlu1 %v6809_v51  ;;  %v2896_v58 = vmul.f32 %v6809_v51, %v6809_v51 }
 0x5de   :  { %2817 = vadd.xlane.f32.xlu0 %v6811_v47  ;;  %v2895_v2 = vmul.f32 %v6811_v47, %v6811_v47 }
 0x5e0   :  { %v4233_v49 = vpop.f32.mrb[68].mxu1 }
 0x5e1   :  { %v2696_v9 = vadd.f32 %v4233_v49, %v6681_v48  ;;  %2947 = vadd.xlane.f32.xlu1 %v2896_v58  ;;  %v2690_v54 = vpop.f32.mrb[69].mxu1 }
 0x5e2   :  { %v2691_v18 = vadd.f32 %v6681_v48, %v2690_v54  ;;  %2945 = vadd.xlane.f32.xlu0 %v2895_v2 }
 0x5e3   :  { %v6825_v8 = vmax.f32 %v2696_v9, 0.0 }
 0x5e4   :  { %v6827_v56 = vmax.f32 %v2691_v18, 0.0  ;;  %v6877_v18 = vpop.f32.mrb[64].mxu0 }
 0x5e5   :  { %2823 = vadd.xlane.f32.xlu1 %v6825_v8  ;;  %v2898_v17 = vmul.f32 %v6825_v8, %v6825_v8 }
 0x5e6   :  { %2821 = vadd.xlane.f32.xlu0 %v6827_v56  ;;  %v2897_v4 = vmul.f32 %v6827_v56, %v6827_v56 }
 0x5e8   :  { %v4236_v1 = vpop.f32.mrb[70].mxu1 }
 0x5e9   :  { %v2706_v27 = vadd.f32 %v4236_v1, %v6681_v48  ;;  %2951 = vadd.xlane.f32.xlu1 %v2898_v17  ;;  %v2700_v59 = vpop.f32.mrb[71].mxu1  ;;  %v6880_v17 = vpop.f32.mrb[65].mxu0 }
 0x5ea   :  { %v2701_v25 = vadd.f32 %v6681_v48, %v2700_v59  ;;  %2949 = vadd.xlane.f32.xlu0 %v2897_v4 }
 0x5eb   :  { %v6841_v21 = vmax.f32 %v2706_v27, 0.0 }
 0x5ec   :  { %v6843_v61 = vmax.f32 %v2701_v25, 0.0 }
 0x5ed   :  { %7279 = vst [vmem:[#allocation6_spill] sm:$0xff] %v6841_v21  ;;  %2827 = vadd.xlane.f32.xlu1 %v6841_v21  ;;  %v2900_v5 = vmul.f32 %v6841_v21, %v6841_v21 }
 0x5ee   :  { %7280 = vst [vmem:[#allocation5_spill] sm:$0xff] %v6843_v61  ;;  %2825 = vadd.xlane.f32.xlu0 %v6843_v61  ;;  %v2899_v6 = vmul.f32 %v6843_v61, %v6843_v61 }
 0x5f0   :  { %v4239_v53 = vpop.f32.mrb[72].mxu1 }
 0x5f1   :  { %v2716_v31 = vadd.f32 %v4239_v53, %v6681_v48  ;;  %2955 = vadd.xlane.f32.xlu1 %v2900_v5  ;;  %v2710_v52 = vpop.f32.mrb[73].mxu1 }
 0x5f2   :  { %v2711_v13 = vadd.f32 %v6681_v48, %v2710_v52  ;;  %2953 = vadd.xlane.f32.xlu0 %v2899_v6 }
 0x5f3   :  { %v6857_v0 = vmax.f32 %v2716_v31, 0.0  ;;  %v6893_v31 = vpop.f32.mrb[66].mxu0 }
 0x5f4   :  { %v6859_v63 = vmax.f32 %v2711_v13, 0.0  ;;  %v6896_v52 = vpop.f32.mrb[67].mxu0 }
 0x5f5   :  { %7281 = vst [vmem:[#allocation8_spill] sm:$0xff] %v6857_v0  ;;  %2831 = vadd.xlane.f32.xlu1 %v6857_v0  ;;  %v2902_v7 = vmul.f32 %v6857_v0, %v6857_v0 }
 0x5f6   :  { %7282 = vst [vmem:[#allocation7_spill] sm:$0xff] %v6859_v63  ;;  %2829 = vadd.xlane.f32.xlu0 %v6859_v63  ;;  %v2901_v28 = vmul.f32 %v6859_v63, %v6859_v63 }
 0x5f8   :  { %v4242_v41 = vpop.f32.mrb[74].mxu1 }
 0x5f9   :  { %v2726_v58 = vadd.f32 %v4242_v41, %v6681_v48  ;;  %2959 = vadd.xlane.f32.xlu1 %v2902_v7  ;;  %v2720_v49 = vpop.f32.mrb[75].mxu1 }
 0x5fa   :  { %v2721_v2 = vadd.f32 %v6681_v48, %v2720_v49  ;;  %2957 = vadd.xlane.f32.xlu0 %v2901_v28 }
 0x5fb   :  { %v6873_v9 = vmax.f32 %v2726_v58, 0.0 }
 0x5fc   :  { %v6875_v54 = vmax.f32 %v2721_v2, 0.0 }
 0x5fd   :  { %7283 = vst [vmem:[#allocation9_spill] sm:$0xff] %v6873_v9  ;;  %2835 = vadd.xlane.f32.xlu1 %v6873_v9  ;;  %v2904_v1 = vmul.f32 %v6873_v9, %v6873_v9 }
 0x5fe   :  { %7284 = vst [vmem:[#allocation10_spill] sm:$0xff] %v6875_v54  ;;  %2833 = vadd.xlane.f32.xlu0 %v6875_v54  ;;  %v2903_v27 = vmul.f32 %v6875_v54, %v6875_v54 }
 0x600   :  { %v4245_v4 = vpop.f32.mrb[76].mxu1 }
 0x601   :  { %v2736_v59 = vadd.f32 %v4245_v4, %v6681_v48  ;;  %2963 = vadd.xlane.f32.xlu1 %v2904_v1  ;;  %v2730_v25 = vpop.f32.mrb[77].mxu1 }
 0x602   :  { %v2731_v5 = vadd.f32 %v6681_v48, %v2730_v25  ;;  %2961 = vadd.xlane.f32.xlu0 %v2903_v27  ;;  %v6909_v25 = vpop.f32.mrb[68].mxu0 }
 0x603   :  { %v6889_v53 = vmax.f32 %v2736_v59, 0.0  ;;  %7289 = vst [vmem:[#allocation15_spill] sm:$0xff] %v6909_v25 }
 0x604   :  { %v6891_v6 = vmax.f32 %v2731_v5, 0.0 }
 0x605   :  { %7285 = vst [vmem:[#allocation11_spill] sm:$0xff] %v6889_v53  ;;  %2839 = vadd.xlane.f32.xlu1 %v6889_v53  ;;  %v2906_v13 = vmul.f32 %v6889_v53, %v6889_v53 }
 0x606   :  { %7286 = vst [vmem:[#allocation12_spill] sm:$0xff] %v6891_v6  ;;  %2837 = vadd.xlane.f32.xlu0 %v6891_v6  ;;  %v2905_v41 = vmul.f32 %v6891_v6, %v6891_v6  ;;  %v6912_v6 = vpop.f32.mrb[69].mxu0 }
 0x607   :  { %7290 = vst [vmem:[#allocation16_spill] sm:$0xff] %v6912_v6  ;;  %v6919_v9 = vpop.f32.mrb[70].mxu0 }
 0x608   :  { %v4248_v7 = vpop.f32.mrb[78].mxu1  ;;  %7291 = vst [vmem:[#allocation17_spill] sm:$0xff] %v6919_v9  ;;  %v6921_v0 = vpop.f32.mrb[71].mxu0 }
 0x609   :  { %v2746_v28 = vadd.f32 %v4248_v7, %v6681_v48  ;;  %2967 = vadd.xlane.f32.xlu1 %v2906_v13  ;;  %v2740_v58 = vpop.f32.mrb[79].mxu1  ;;  %v2784_v1 = vpop.xlane.xlu1 %2783  ;;  %7292 = vst [vmem:[#allocation18_spill] sm:$0xff] %v6921_v0 }
 0x60a   :  { %v2741_v49 = vadd.f32 %v6681_v48, %v2740_v58  ;;  %2965 = vadd.xlane.f32.xlu0 %v2905_v41  ;;  %v2846_v27 = vmul.f32 0.0078125, %v2784_v1  ;;  %v2782_v59 = vpop.xlane.xlu0 %2781 }
 0x60b   :  { %v6905_v2 = vmax.f32 %v2746_v28, 0.0  ;;  %v2845_v5 = vmul.f32 0.0078125, %v2782_v59 }
 0x60c   :  { %v6907_v4 = vmax.f32 %v2741_v49, 0.0  ;;  %v3006_v7 = vmul.f32 %v2846_v27, %v2846_v27 }
 0x60d   :  { %7287 = vst [vmem:[#allocation13_spill] sm:$0xff] %v6905_v2  ;;  %2843 = vadd.xlane.f32.xlu1 %v6905_v2  ;;  %v2912_v13 = vpop.xlane.xlu1 %2911  ;;  %v2908_v48 = vmul.f32 %v6905_v2, %v6905_v2  ;;  %v3005_v49 = vmul.f32 %v2845_v5, %v2845_v5 }
 0x60e   :  { %7288 = vst [vmem:[#allocation14_spill] sm:$0xff] %v6907_v4  ;;  %2841 = vadd.xlane.f32.xlu0 %v6907_v4  ;;  %v2974_v41 = vmul.f32 0.0078125, %v2912_v13  ;;  %v2910_v28 = vpop.xlane.xlu0 %2909  ;;  %v2907_v58 = vmul.f32 %v6907_v4, %v6907_v4 }
 0x60f   :  { %v2973_v1 = vmul.f32 0.0078125, %v2910_v28 }
 0x610   :  { %v3038_v59 = vsub.f32 %v2974_v41, %v3006_v7  ;;  %v6923_v41 = vpop.f32.mrb[72].mxu0 }
 0x611   :  { %2971 = vadd.xlane.f32.xlu1 %v2908_v48  ;;  %v3037_v53 = vsub.f32 %v2973_v1, %v3005_v49  ;;  %7293 = vst [vmem:[#allocation19_spill] sm:$0xff] %v6923_v41  ;;  %v6925_v49 = vpop.f32.mrb[73].mxu0  ;;  %v3070_v1 = vsub.f32 %v6685_v19, %v2846_v27  ;;  %v6942_v19 = vld [vmem:[%s7253_s12] ss:$0 sm:$0xff] }
 0x612   :  { %2969 = vadd.xlane.f32.xlu0 %v2907_v58  ;;  %v3102_v54 = vadd.f32 1e-05, %v3038_v59  ;;  %7294 = vst [vmem:[#allocation20_spill] sm:$0xff] %v6925_v49 }
 0x613   :  { %v3101_v63 = vadd.f32 1e-05, %v3037_v53 }
 0x614   :  { %4644 = vrsqrt.f32 %v3102_v54 }
 0x615   :  { %v2788_v2 = vpop.xlane.xlu1 %2787  ;;  %4646 = vrsqrt.f32 %v3101_v63  ;;  %v3069_v63 = vsub.f32 %v6687_v45, %v2845_v5 }
 0x616   :  { %v2848_v13 = vmul.f32 0.0078125, %v2788_v2  ;;  %v2786_v61 = vpop.xlane.xlu0 %2785 }
 0x617   :  { %v2847_v21 = vmul.f32 0.0078125, %v2786_v61  ;;  %v6932_v61 = vld [vmem:[%s7252_s11] ss:$0 sm:$0xff]  ;;  %s4764_s11 = smov [#allocation2]  }
 0x618   :  { %v3008_v4 = vmul.f32 %v2848_v13, %v2848_v13  ;;  %s3614_s12 = sshll.u32 %s4764_s11, 4  ;;  %s3615_s12 = int_to_ptr.vmem [resolvable:$true] %s3614_s12 }
 0x619   :  { %v2916_v6 = vpop.xlane.xlu1 %2915  ;;  %v3007_v48 = vmul.f32 %v2847_v21, %v2847_v21  ;;  %p4745_p1 = scmp.lt.s32.totalorder %s3615_s12, %s3615_s12 }
 0x61a   :  { %v2976_v25 = vmul.f32 0.0078125, %v2916_v6  ;;  %v2914_v28 = vpop.xlane.xlu0 %2913  ;;  %v6937_v6 = vld [vmem:[%s7255_s14] ss:$0 sm:$0xff]  ;;  %s4740_s14 = scalar_lea.vmem %s3615_s12, 4096 }
 0x61b   :  { %v2975_v7 = vmul.f32 0.0078125, %v2914_v28  ;;  %v3360_v5 = vadd.f32 %v6719_v57, %v6937_v6  ;;  %p4741_p0 = scmp.ne.s32.totalorder %s3615_s12, %s4740_s14  ;;  %p4746_p2 = scmp.lt.s32.totalorder %s4740_s14, %s4740_s14 }
 0x61c   :  { %v3040_v58 = vsub.f32 %v2976_v25, %v3008_v4 }
 0x61d   :  { %v3039_v53 = vsub.f32 %v2975_v7, %v3007_v48  ;;  %v3355_v48 = vadd.f32 %v6937_v6, %v6722_v62  ;;  %v6950_v7 = vpop.f32.mrb[74].mxu0  ;;  %p4747_p3 = por %p4746_p2, %p4745_p1 }
 0x61e   :  { %v3104_v54 = vadd.f32 1e-05, %v3040_v58  ;;  %v4645_v59 = vpop.eup %4644  ;;  %7295 = vst [vmem:[#allocation21_spill] sm:$0xff] %v6950_v7  ;;  %v3071_v7 = vsub.f32 %v6699_v42, %v2847_v21  ;;  %v3370_v42 = vadd.f32 %v6735_v46, %v6937_v6 }
 0x61f   :  { %v3103_v2 = vadd.f32 1e-05, %v3039_v53  ;;  %v4647_v4 = vpop.eup %4646  ;;  %v3166_v25 = vmul.f32 %v4645_v59, %v3070_v1  ;;  %v6953_v53 = vpop.f32.mrb[75].mxu0  ;;  %p4748_p4 = pnand %p4747_p3, %p4741_p0 }
 0x620   :  { %4648 = vrsqrt.f32 %v3104_v54  ;;  %v3165_v45 = vmul.f32 %v4647_v4, %v3069_v63  ;;  %7296 = vst [vmem:[#allocation22_spill] sm:$0xff] %v6953_v53 }
 0x621   :  { %4650 = vrsqrt.f32 %v3103_v2  ;;  %v3204_v27 = vmul.f32 %v6932_v61, %v3166_v25 }
 0x622   :  { %v3203_v28 = vmul.f32 %v6932_v61, %v3165_v45  ;;  %v3072_v45 = vsub.f32 %v6697_v39, %v2848_v13 }
 0x623   :  { %v3242_v58 = vadd.f32 %v6942_v19, %v3204_v27 }
 0x624   :  { %v3241_v1 = vadd.f32 %v6942_v19, %v3203_v28 }
 0x625   :  { %v2792_v54 = vpop.xlane.xlu1 %2791  ;;  %v3514_v59 = vadd.f32 %v3360_v5, %v3242_v58 }
 0x626   :  { %v2850_v63 = vmul.f32 0.0078125, %v2792_v54  ;;  %v2790_v2 = vpop.xlane.xlu0 %2789  ;;  %v3513_v4 = vadd.f32 %v3355_v48, %v3241_v1  ;;  %v6958_v54 = vpop.f32.mrb[76].mxu0 }
 0x627   :  { %v2849_v25 = vmul.f32 0.0078125, %v2790_v2  ;;  %v3546_v57 = vmax.f32 %v3514_v59, 0.0  ;;  %v6960_v59 = vpop.f32.mrb[77].mxu0 }
 0x628   :  { %v3545_v49 = vmax.f32 %v3513_v4, 0.0  ;;  %v3010_v27 = vmul.f32 %v2850_v63, %v2850_v63  ;;  %v6970_v4 = vpop.f32.mrb[78].mxu0 }
 0x629   :  { %v2920_v41 = vpop.xlane.xlu1 %2919  ;;  %3578 = vst [vmem:[#allocation2 + $0x8] sm:$0xff] %v3546_v57  ;;  %v3009_v28 = vmul.f32 %v2849_v25, %v2849_v25 }
 0x62a   :  { %v4649_v62 = vpop.eup %4648  ;;  %v2978_v0 = vmul.f32 0.0078125, %v2920_v41  ;;  %v2918_v53 = vpop.xlane.xlu0 %2917  ;;  %3577 = vst [vmem:[#allocation2] sm:$0xff] %v3545_v49  ;;  %v3365_v49 = vadd.f32 %v6937_v6, %v6738_v50 }
 0x62b   :  { %v4651_v9 = vpop.eup %4650  ;;  %v2977_v5 = vmul.f32 0.0078125, %v2918_v53  ;;  %v3168_v58 = vmul.f32 %v4649_v62, %v3072_v45  ;;  %v6972_v45 = vpop.f32.mrb[79].mxu0 }
 0x62c   :  { %v3042_v48 = vsub.f32 %v2978_v0, %v3010_v27  ;;  %v3167_v1 = vmul.f32 %v4651_v9, %v3071_v7 }
 0x62d   :  { %v3041_v39 = vsub.f32 %v2977_v5, %v3009_v28  ;;  %v3206_v13 = vmul.f32 %v6932_v61, %v3168_v58  ;;  %v3074_v5 = vsub.f32 %v6709_v43, %v2850_v63 }
 0x62e   :  { %v3106_v21 = vadd.f32 1e-05, %v3042_v48  ;;  %v3205_v41 = vmul.f32 %v6932_v61, %v3167_v1  ;;  %v3073_v1 = vsub.f32 %v6711_v26, %v2849_v25  ;;  %v3375_v26 = vadd.f32 %v6937_v6, %v6766_v16 }
 0x62f   :  { %v3105_v53 = vadd.f32 1e-05, %v3041_v39  ;;  %v3244_v2 = vadd.f32 %v6942_v19, %v3206_v13 }
 0x630   :  { %4652 = vrsqrt.f32 %v3106_v21  ;;  %v3243_v0 = vadd.f32 %v6942_v19, %v3205_v41 }
 0x631   :  { %4654 = vrsqrt.f32 %v3105_v53  ;;  %v3516_v9 = vadd.f32 %v3370_v42, %v3244_v2 }
 0x632   :  { %v3515_v7 = vadd.f32 %v3365_v49, %v3243_v0 }
 0x633   :  { %v3548_v57 = vmax.f32 %v3516_v9, 0.0 }
 0x634   :  { %v3547_v46 = vmax.f32 %v3515_v7, 0.0 }
 0x635   :  { %3580 = vst [vmem:[#allocation2 + $0x18] sm:$0xff] %v3548_v57  ;;  %v2796_v62 = vpop.xlane.xlu1 %2795  ;;  %v3380_v57 = vadd.f32 %v6763_v14, %v6937_v6 }
 0x636   :  { %3579 = vst [vmem:[#allocation2 + $0x10] sm:$0xff] %v3547_v46  ;;  %v2852_v27 = vmul.f32 0.0078125, %v2796_v62  ;;  %v2794_v50 = vpop.xlane.xlu0 %2793 }
 0x637   :  { %v2851_v28 = vmul.f32 0.0078125, %v2794_v50 }
 0x638   :  { %v3012_v39 = vmul.f32 %v2852_v27, %v2852_v27 }
 0x639   :  { %v2924_v58 = vpop.xlane.xlu1 %2923  ;;  %v3011_v41 = vmul.f32 %v2851_v28, %v2851_v28 }
 0x63a   :  { %v4653_v48 = vpop.eup %4652  ;;  %v2980_v13 = vmul.f32 0.0078125, %v2924_v58  ;;  %v2922_v42 = vpop.xlane.xlu0 %2921 }
 0x63b   :  { %v4655_v21 = vpop.eup %4654  ;;  %v2979_v49 = vmul.f32 0.0078125, %v2922_v42  ;;  %v3170_v53 = vmul.f32 %v4653_v48, %v3074_v5 }
 0x63c   :  { %v3044_v2 = vsub.f32 %v2980_v13, %v3012_v39  ;;  %v3169_v0 = vmul.f32 %v4655_v21, %v3073_v1 }
 0x63d   :  { %v3043_v9 = vsub.f32 %v2979_v49, %v3011_v41  ;;  %v3208_v7 = vmul.f32 %v6932_v61, %v3170_v53 }
 0x63e   :  { %v3108_v43 = vadd.f32 1e-05, %v3044_v2  ;;  %v3207_v63 = vmul.f32 %v6932_v61, %v3169_v0  ;;  %v3076_v0 = vsub.f32 %v6725_v32, %v2852_v27  ;;  %v3390_v27 = vadd.f32 %v6791_v36, %v6937_v6 }
 0x63f   :  { %v3107_v25 = vadd.f32 1e-05, %v3043_v9  ;;  %v3246_v46 = vadd.f32 %v6942_v19, %v3208_v7 }
 0x640   :  { %4656 = vrsqrt.f32 %v3108_v43  ;;  %v3245_v62 = vadd.f32 %v6942_v19, %v3207_v63  ;;  %v3075_v43 = vsub.f32 %v6727_v29, %v2851_v28 }
 0x641   :  { %4658 = vrsqrt.f32 %v3107_v25  ;;  %v3518_v50 = vadd.f32 %v3380_v57, %v3246_v46 }
 0x642   :  { %v2800_v5 = vpop.xlane.xlu1 %2799  ;;  %v3517_v58 = vadd.f32 %v3375_v26, %v3245_v62 }
 0x643   :  { %v6984_v48 = vmul.f32 0.0078125, %v2800_v5  ;;  %v2798_v1 = vpop.xlane.xlu0 %2797  ;;  %v3550_v14 = vmax.f32 %v3518_v50, 0.0 }
 0x644   :  { %v6986_v39 = vmul.f32 0.0078125, %v2798_v1  ;;  %v3549_v13 = vmax.f32 %v3517_v58, 0.0 }
 0x645   :  { %3582 = vst [vmem:[#allocation2 + $0x28] sm:$0xff] %v3550_v14  ;;  %v3014_v16 = vmul.f32 %v6984_v48, %v6984_v48 }
 0x646   :  { %v2928_v42 = vpop.xlane.xlu1 %2927  ;;  %3581 = vst [vmem:[#allocation2 + $0x20] sm:$0xff] %v3549_v13  ;;  %v3013_v49 = vmul.f32 %v6986_v39, %v6986_v39 }
 0x647   :  { %v2982_v21 = vmul.f32 0.0078125, %v2928_v42  ;;  %v2926_v41 = vpop.xlane.xlu0 %2925  ;;  %v3385_v42 = vadd.f32 %v6937_v6, %v6794_v10 }
 0x648   :  { %v2981_v53 = vmul.f32 0.0078125, %v2926_v41 }
 0x649   :  { %v3046_v2 = vsub.f32 %v2982_v21, %v3014_v16 }
 0x64a   :  { %v3045_v9 = vsub.f32 %v2981_v53, %v3013_v49  ;;  %v2804_v7 = vpop.xlane.xlu1 %2803  ;;  %v4657_v57 = vpop.eup %4656 }
 0x64b   :  { %v3110_v63 = vadd.f32 1e-05, %v3046_v2  ;;  %v6994_v26 = vmul.f32 0.0078125, %v2804_v7  ;;  %v2802_v25 = vpop.xlane.xlu0 %2801  ;;  %v4659_v46 = vpop.eup %4658  ;;  %v3172_v5 = vmul.f32 %v4657_v57, %v3076_v0 }
 0x64c   :  { %v3109_v62 = vadd.f32 1e-05, %v3045_v9  ;;  %v6996_v50 = vmul.f32 0.0078125, %v2802_v25  ;;  %v3171_v58 = vmul.f32 %v4659_v46, %v3075_v43 }
 0x64d   :  { %4660 = vrsqrt.f32 %v3110_v63  ;;  %v3210_v32 = vmul.f32 %v6932_v61, %v3172_v5  ;;  %v3016_v29 = vmul.f32 %v6994_v26, %v6994_v26 }
 0x64e   :  { %4662 = vrsqrt.f32 %v3109_v62  ;;  %v2932_v1 = vpop.xlane.xlu1 %2931  ;;  %v3209_v13 = vmul.f32 %v6932_v61, %v3171_v58  ;;  %v3015_v16 = vmul.f32 %v6996_v50, %v6996_v50  ;;  %v3078_v62 = vsub.f32 %v6741_v11, %v6984_v48 }
 0x64f   :  { %v2984_v28 = vmul.f32 0.0078125, %v2932_v1  ;;  %v2930_v14 = vpop.xlane.xlu0 %2929  ;;  %v3248_v21 = vadd.f32 %v6942_v19, %v3210_v32  ;;  %v3077_v1 = vsub.f32 %v6743_v20, %v6986_v39  ;;  %v3400_v20 = vadd.f32 %v6813_v30, %v6937_v6 }
 0x650   :  { %v2983_v41 = vmul.f32 0.0078125, %v2930_v14  ;;  %v3247_v53 = vadd.f32 %v6942_v19, %v3209_v13  ;;  %v3080_v30 = vsub.f32 %v6753_v33, %v6994_v26 }
 0x651   :  { %v3048_v49 = vsub.f32 %v2984_v28, %v3016_v29  ;;  %v3520_v36 = vadd.f32 %v3390_v27, %v3248_v21 }
 0x652   :  { %v3047_v2 = vsub.f32 %v2983_v41, %v3015_v16  ;;  %v2808_v0 = vpop.xlane.xlu1 %2807  ;;  %v3519_v7 = vadd.f32 %v3385_v42, %v3247_v53 }
 0x653   :  { %v3112_v9 = vadd.f32 1e-05, %v3048_v49  ;;  %v7010_v57 = vmul.f32 0.0078125, %v2808_v0  ;;  %v2806_v43 = vpop.xlane.xlu0 %2805  ;;  %v3552_v63 = vmax.f32 %v3520_v36, 0.0 }
 0x654   :  { %v3111_v25 = vadd.f32 1e-05, %v3047_v2  ;;  %v7012_v10 = vmul.f32 0.0078125, %v2806_v43  ;;  %v3551_v46 = vmax.f32 %v3519_v7, 0.0  ;;  %v3395_v2 = vadd.f32 %v6937_v6, %v6816_v15 }
 0x655   :  { %4664 = vrsqrt.f32 %v3112_v9  ;;  %3584 = vst [vmem:[#allocation2 + $0x38] sm:$0xff] %v3552_v63  ;;  %v3018_v32 = vmul.f32 %v7010_v57, %v7010_v57 }
 0x656   :  { %4666 = vrsqrt.f32 %v3111_v25  ;;  %v2936_v5 = vpop.xlane.xlu1 %2935  ;;  %3583 = vst [vmem:[#allocation2 + $0x30] sm:$0xff] %v3551_v46  ;;  %v3017_v14 = vmul.f32 %v7012_v10, %v7012_v10 }
 0x657   :  { %v4661_v58 = vpop.eup %4660  ;;  %v2986_v27 = vmul.f32 0.0078125, %v2936_v5  ;;  %v2934_v29 = vpop.xlane.xlu0 %2933 }
 0x658   :  { %v4663_v28 = vpop.eup %4662  ;;  %v2985_v13 = vmul.f32 0.0078125, %v2934_v29  ;;  %v3174_v42 = vmul.f32 %v4661_v58, %v3078_v62  ;;  %v3079_v62 = vsub.f32 %v6755_v24, %v6996_v50  ;;  %v3410_v50 = vadd.f32 %v6829_v23, %v6937_v6 }
 0x659   :  { %v3050_v11 = vsub.f32 %v2986_v27, %v3018_v32  ;;  %v3173_v48 = vmul.f32 %v4663_v28, %v3077_v1  ;;  %v3082_v23 = vsub.f32 %v6769_v3, %v7010_v57 }
 0x65a   :  { %v3049_v16 = vsub.f32 %v2985_v13, %v3017_v14  ;;  %v2812_v21 = vpop.xlane.xlu1 %2811  ;;  %v3212_v41 = vmul.f32 %v6932_v61, %v3174_v42 }
 0x65b   :  { %v3114_v39 = vadd.f32 1e-05, %v3050_v11  ;;  %v7025_v49 = vmul.f32 0.0078125, %v2812_v21  ;;  %v2810_v53 = vpop.xlane.xlu0 %2809  ;;  %v3211_v36 = vmul.f32 %v6932_v61, %v3173_v48 }
 0x65c   :  { %v3113_v0 = vadd.f32 1e-05, %v3049_v16  ;;  %v3250_v9 = vadd.f32 %v6942_v19, %v3212_v41  ;;  %v7031_v7 = vmul.f32 0.0078125, %v2810_v53 }
 0x65d   :  { %4668 = vrsqrt.f32 %v3114_v39  ;;  %v3249_v43 = vadd.f32 %v6942_v19, %v3211_v36  ;;  %v3020_v15 = vmul.f32 %v7025_v49, %v7025_v49 }
 0x65e   :  { %4670 = vrsqrt.f32 %v3113_v0  ;;  %v3522_v63 = vadd.f32 %v3400_v20, %v3250_v9  ;;  %v2940_v25 = vpop.xlane.xlu1 %2939  ;;  %v3019_v29 = vmul.f32 %v7031_v7, %v7031_v7  ;;  %v3405_v20 = vadd.f32 %v6937_v6, %v6832_v55 }
 0x65f   :  { %v4665_v46 = vpop.eup %4664  ;;  %v3521_v5 = vadd.f32 %v3395_v2, %v3249_v43  ;;  %v2988_v58 = vmul.f32 0.0078125, %v2940_v25  ;;  %v2938_v1 = vpop.xlane.xlu0 %2937 }
 0x660   :  { %v4667_v32 = vpop.eup %4666  ;;  %v3554_v27 = vmax.f32 %v3522_v63, 0.0  ;;  %v2987_v28 = vmul.f32 0.0078125, %v2938_v1  ;;  %v3176_v33 = vmul.f32 %v4665_v46, %v3080_v30  ;;  %v3081_v30 = vsub.f32 %v6771_v12, %v7012_v10 }
 0x661   :  { %v3553_v26 = vmax.f32 %v3521_v5, 0.0  ;;  %v3052_v14 = vsub.f32 %v2988_v58, %v3020_v15  ;;  %v3175_v13 = vmul.f32 %v4667_v32, %v3079_v62  ;;  %v3420_v10 = vadd.f32 %v6845_v35, %v6937_v6 }
 0x662   :  { %3586 = vst [vmem:[#allocation2 + $0x48] sm:$0xff] %v3554_v27  ;;  %v3051_v42 = vsub.f32 %v2987_v28, %v3019_v29  ;;  %v2816_v11 = vpop.xlane.xlu1 %2815  ;;  %v3214_v24 = vmul.f32 %v6932_v61, %v3176_v33  ;;  %v3084_v35 = vsub.f32 %v6781_v38, %v7025_v49 }
 0x663   :  { %3585 = vst [vmem:[#allocation2 + $0x40] sm:$0xff] %v3553_v26  ;;  %v3116_v48 = vadd.f32 1e-05, %v3052_v14  ;;  %v7045_v16 = vmul.f32 0.0078125, %v2816_v11  ;;  %v2814_v21 = vpop.xlane.xlu0 %2813  ;;  %v3213_v41 = vmul.f32 %v6932_v61, %v3175_v13  ;;  %v3415_v13 = vadd.f32 %v6937_v6, %v6848_v40 }
 0x664   :  { %v3115_v39 = vadd.f32 1e-05, %v3051_v42  ;;  %v3252_v53 = vadd.f32 %v6942_v19, %v3214_v24  ;;  %v7051_v36 = vmul.f32 0.0078125, %v2814_v21 }
 0x665   :  { %4672 = vrsqrt.f32 %v3116_v48  ;;  %v3251_v2 = vadd.f32 %v6942_v19, %v3213_v41  ;;  %v3022_v55 = vmul.f32 %v7045_v16, %v7045_v16 }
 0x666   :  { %4674 = vrsqrt.f32 %v3115_v39  ;;  %v3524_v0 = vadd.f32 %v3410_v50, %v3252_v53  ;;  %v2944_v9 = vpop.xlane.xlu1 %2943  ;;  %v3021_v5 = vmul.f32 %v7051_v36, %v7051_v36 }
 0x667   :  { %v4669_v43 = vpop.eup %4668  ;;  %v3523_v63 = vadd.f32 %v3405_v20, %v3251_v2  ;;  %v2990_v25 = vmul.f32 0.0078125, %v2944_v9  ;;  %v2942_v46 = vpop.xlane.xlu0 %2941  ;;  %v3083_v20 = vsub.f32 %v6783_v60, %v7031_v7  ;;  %v3430_v7 = vadd.f32 %v6861_v44, %v6937_v6 }
 0x668   :  { %v4671_v62 = vpop.eup %4670  ;;  %v3556_v15 = vmax.f32 %v3524_v0, 0.0  ;;  %v2989_v58 = vmul.f32 0.0078125, %v2942_v46  ;;  %v3178_v3 = vmul.f32 %v4669_v43, %v3082_v23  ;;  %v3086_v44 = vsub.f32 %v6797_v37, %v7045_v16 }
 0x669   :  { %v3555_v57 = vmax.f32 %v3523_v63, 0.0  ;;  %v3054_v1 = vsub.f32 %v2990_v25, %v3022_v55  ;;  %v3177_v32 = vmul.f32 %v4671_v62, %v3081_v30 }
 0x66a   :  { %3588 = vst [vmem:[#allocation2 + $0x58] sm:$0xff] %v3556_v15  ;;  %v3053_v27 = vsub.f32 %v2989_v58, %v3021_v5  ;;  %v2820_v29 = vpop.xlane.xlu1 %2819  ;;  %v3216_v12 = vmul.f32 %v6932_v61, %v3178_v3  ;;  %v3425_v58 = vadd.f32 %v6937_v6, %v6864_v22 }
 0x66b   :  { %3587 = vst [vmem:[#allocation2 + $0x50] sm:$0xff] %v3555_v57  ;;  %v3118_v28 = vadd.f32 1e-05, %v3054_v1  ;;  %v7065_v33 = vmul.f32 0.0078125, %v2820_v29  ;;  %v2818_v26 = vpop.xlane.xlu0 %2817  ;;  %v3215_v14 = vmul.f32 %v6932_v61, %v3177_v32 }
 0x66c   :  { %v3117_v42 = vadd.f32 1e-05, %v3053_v27  ;;  %v3254_v11 = vadd.f32 %v6942_v19, %v3216_v12  ;;  %v7071_v24 = vmul.f32 0.0078125, %v2818_v26 }
 0x66d   :  { %4676 = vrsqrt.f32 %v3118_v28  ;;  %v3253_v50 = vadd.f32 %v6942_v19, %v3215_v14  ;;  %v3024_v40 = vmul.f32 %v7065_v33, %v7065_v33 }
 0x66e   :  { %4678 = vrsqrt.f32 %v3117_v42  ;;  %v3526_v48 = vadd.f32 %v3420_v10, %v3254_v11  ;;  %v2948_v21 = vpop.xlane.xlu1 %2947  ;;  %v3023_v9 = vmul.f32 %v7071_v24, %v7071_v24  ;;  %v3085_v10 = vsub.f32 %v6799_v34, %v7051_v36 }
 0x66f   :  { %v4673_v41 = vpop.eup %4672  ;;  %v3525_v39 = vadd.f32 %v3415_v13, %v3253_v50  ;;  %v2992_v53 = vmul.f32 0.0078125, %v2948_v21  ;;  %v2946_v2 = vpop.xlane.xlu0 %2945  ;;  %v3440_v36 = vadd.f32 %v6877_v18, %v6937_v6  ;;  %v3088_v18 = vsub.f32 %v6809_v51, %v7065_v33 }
 0x670   :  { %v4675_v23 = vpop.eup %4674  ;;  %v3558_v0 = vmax.f32 %v3526_v48, 0.0  ;;  %v2991_v43 = vmul.f32 0.0078125, %v2946_v2  ;;  %v3180_v38 = vmul.f32 %v4673_v41, %v3084_v35  ;;  %v3435_v2 = vadd.f32 %v6937_v6, %v6880_v17 }
 0x671   :  { %v3557_v49 = vmax.f32 %v3525_v39, 0.0  ;;  %v3056_v30 = vsub.f32 %v2992_v53, %v3024_v40  ;;  %v3179_v55 = vmul.f32 %v4675_v23, %v3083_v20 }
 0x672   :  { %3590 = vst [vmem:[#allocation2 + $0x68] sm:$0xff] %v3558_v0  ;;  %v3055_v63 = vsub.f32 %v2991_v43, %v3023_v9  ;;  %v2824_v25 = vpop.xlane.xlu1 %2823  ;;  %v3218_v60 = vmul.f32 %v6932_v61, %v3180_v38 }
 0x673   :  { %3589 = vst [vmem:[#allocation2 + $0x60] sm:$0xff] %v3557_v49  ;;  %v3120_v46 = vadd.f32 1e-05, %v3056_v30  ;;  %v7085_v62 = vmul.f32 0.0078125, %v2824_v25  ;;  %v2822_v15 = vpop.xlane.xlu0 %2821  ;;  %v3217_v5 = vmul.f32 %v6932_v61, %v3179_v55  ;;  %v3087_v55 = vsub.f32 %v6811_v47, %v7071_v24 }
 0x674   :  { %v3119_v3 = vadd.f32 1e-05, %v3055_v63  ;;  %v3256_v57 = vadd.f32 %v6942_v19, %v3218_v60  ;;  %v7091_v1 = vmul.f32 0.0078125, %v2822_v15  ;;  %v3450_v24 = vadd.f32 %v6893_v31, %v6937_v6 }
 0x675   :  { %4680 = vrsqrt.f32 %v3120_v46  ;;  %v3255_v32 = vadd.f32 %v6942_v19, %v3217_v5  ;;  %v3026_v22 = vmul.f32 %v7085_v62, %v7085_v62  ;;  %v3090_v31 = vsub.f32 %v6825_v8, %v7085_v62 }
 0x676   :  { %4682 = vrsqrt.f32 %v3119_v3  ;;  %v3528_v27 = vadd.f32 %v3430_v7, %v3256_v57  ;;  %v2952_v29 = vpop.xlane.xlu1 %2951  ;;  %v3025_v11 = vmul.f32 %v7091_v1, %v7091_v1 }
 0x677   :  { %v4677_v12 = vpop.eup %4676  ;;  %v3527_v28 = vadd.f32 %v3425_v58, %v3255_v32  ;;  %v2994_v26 = vmul.f32 0.0078125, %v2952_v29  ;;  %v2950_v14 = vpop.xlane.xlu0 %2949 }
 0x678   :  { %v4679_v13 = vpop.eup %4678  ;;  %v3560_v42 = vmax.f32 %v3528_v27, 0.0  ;;  %v2993_v50 = vmul.f32 0.0078125, %v2950_v14  ;;  %v3182_v37 = vmul.f32 %v4677_v12, %v3086_v44 }
 0x679   :  { %v3559_v16 = vmax.f32 %v3527_v28, 0.0  ;;  %v3058_v35 = vsub.f32 %v2994_v26, %v3026_v22  ;;  %v3181_v48 = vmul.f32 %v4679_v13, %v3085_v10  ;;  %v3445_v10 = vadd.f32 %v6937_v6, %v6896_v52 }
 0x67a   :  { %3592 = vst [vmem:[#allocation2 + $0x78] sm:$0xff] %v3560_v42  ;;  %v3057_v21 = vsub.f32 %v2993_v50, %v3025_v11  ;;  %v2828_v41 = vpop.xlane.xlu1 %2827  ;;  %v3220_v34 = vmul.f32 %v6932_v61, %v3182_v37  ;;  %v3089_v50 = vsub.f32 %v6827_v56, %v7091_v1  ;;  %v7297_v1 = vld [vmem:[#allocation15_spill] sm:$0xff] }
 0x67b   :  { %3591 = vst [vmem:[#allocation2 + $0x70] sm:$0xff] %v3559_v16  ;;  %v3122_v20 = vadd.f32 1e-05, %v3058_v35  ;;  %v7105_v40 = vmul.f32 0.0078125, %v2828_v41  ;;  %v2826_v39 = vpop.xlane.xlu0 %2825  ;;  %v3219_v53 = vmul.f32 %v6932_v61, %v3181_v48 }
 0x67c   :  { %v3121_v23 = vadd.f32 1e-05, %v3057_v21  ;;  %v3258_v0 = vadd.f32 %v6942_v19, %v3220_v34  ;;  %v7111_v9 = vmul.f32 0.0078125, %v2826_v39 }
 0x67d   :  { %4684 = vrsqrt.f32 %v3122_v20  ;;  %v3257_v43 = vadd.f32 %v6942_v19, %v3219_v53  ;;  %v3028_v17 = vmul.f32 %v7105_v40, %v7105_v40 }
 0x67e   :  { %4686 = vrsqrt.f32 %v3121_v23  ;;  %v3530_v38 = vadd.f32 %v3440_v36, %v3258_v0  ;;  %v2956_v49 = vpop.xlane.xlu1 %2955  ;;  %v3027_v15 = vmul.f32 %v7111_v9, %v7111_v9 }
 0x67f   :  { %v4681_v30 = vpop.eup %4680  ;;  %v3529_v63 = vadd.f32 %v3435_v2, %v3257_v43  ;;  %v2996_v25 = vmul.f32 0.0078125, %v2956_v49  ;;  %v2954_v60 = vpop.xlane.xlu0 %2953  ;;  %v3460_v2 = vadd.f32 %v7297_v1, %v6937_v6 }
 0x680   :  { %v4683_v7 = vpop.eup %4682  ;;  %v3562_v46 = vmax.f32 %v3530_v38, 0.0  ;;  %v2995_v5 = vmul.f32 0.0078125, %v2954_v60  ;;  %v3184_v51 = vmul.f32 %v4681_v30, %v3088_v18  ;;  %v7298_v38 = vld [vmem:[#allocation16_spill] sm:$0xff] }
 0x681   :  { %v3561_v33 = vmax.f32 %v3529_v63, 0.0  ;;  %v3060_v58 = vsub.f32 %v2996_v25, %v3028_v17  ;;  %v3183_v3 = vmul.f32 %v4683_v7, %v3087_v55  ;;  %v3455_v49 = vadd.f32 %v6937_v6, %v7298_v38  ;;  %v7299_v25 = vld [vmem:[#allocation6_spill] sm:$0xff] }
 0x682   :  { %3594 = vst [vmem:[#allocation2 + $0x88] sm:$0xff] %v3562_v46  ;;  %v3059_v57 = vsub.f32 %v2995_v5, %v3027_v15  ;;  %v2832_v32 = vpop.xlane.xlu1 %2831  ;;  %v3222_v47 = vmul.f32 %v6932_v61, %v3184_v51  ;;  %v3092_v60 = vsub.f32 %v7299_v25, %v7105_v40  ;;  %v7300_v5 = vld [vmem:[#allocation5_spill] sm:$0xff] }
 0x683   :  { %3593 = vst [vmem:[#allocation2 + $0x80] sm:$0xff] %v3561_v33  ;;  %v3124_v44 = vadd.f32 1e-05, %v3060_v58  ;;  %v7125_v27 = vmul.f32 0.0078125, %v2832_v32  ;;  %v2830_v29 = vpop.xlane.xlu0 %2829  ;;  %v3221_v12 = vmul.f32 %v6932_v61, %v3183_v3  ;;  %v3091_v51 = vsub.f32 %v7300_v5, %v7111_v9 }
 0x684   :  { %v3123_v22 = vadd.f32 1e-05, %v3059_v57  ;;  %v3260_v28 = vadd.f32 %v6942_v19, %v3222_v47  ;;  %v7131_v26 = vmul.f32 0.0078125, %v2830_v29 }
 0x685   :  { %4688 = vrsqrt.f32 %v3124_v44  ;;  %v3259_v14 = vadd.f32 %v6942_v19, %v3221_v12  ;;  %v3030_v52 = vmul.f32 %v7125_v27, %v7125_v27 }
 0x686   :  { %4690 = vrsqrt.f32 %v3123_v22  ;;  %v3532_v13 = vadd.f32 %v3450_v24, %v3260_v28  ;;  %v2960_v42 = vpop.xlane.xlu1 %2959  ;;  %v3029_v41 = vmul.f32 %v7131_v26, %v7131_v26 }
 0x687   :  { %v4685_v11 = vpop.eup %4684  ;;  %v3531_v37 = vadd.f32 %v3445_v10, %v3259_v14  ;;  %v2998_v16 = vmul.f32 0.0078125, %v2960_v42  ;;  %v2958_v35 = vpop.xlane.xlu0 %2957  ;;  %v7301_v14 = vld [vmem:[#allocation17_spill] sm:$0xff] }
 0x688   :  { %v4687_v48 = vpop.eup %4686  ;;  %v3564_v21 = vmax.f32 %v3532_v13, 0.0  ;;  %v2997_v34 = vmul.f32 0.0078125, %v2958_v35  ;;  %v3186_v8 = vmul.f32 %v4685_v11, %v3090_v31  ;;  %v3470_v31 = vadd.f32 %v7301_v14, %v6937_v6 }
 0x689   :  { %v3563_v62 = vmax.f32 %v3531_v37, 0.0  ;;  %v3062_v36 = vsub.f32 %v2998_v16, %v3030_v52  ;;  %v3185_v20 = vmul.f32 %v4687_v48, %v3089_v50  ;;  %v7302_v52 = vld [vmem:[#allocation18_spill] sm:$0xff] }
 0x68a   :  { %3596 = vst [vmem:[#allocation2 + $0x98] sm:$0xff] %v3564_v21  ;;  %v3061_v39 = vsub.f32 %v2997_v34, %v3029_v41  ;;  %v2836_v53 = vpop.xlane.xlu1 %2835  ;;  %v3224_v56 = vmul.f32 %v6932_v61, %v3186_v8  ;;  %v3465_v37 = vadd.f32 %v6937_v6, %v7302_v52  ;;  %v7303_v41 = vld [vmem:[#allocation8_spill] sm:$0xff] }
 0x68b   :  { %3595 = vst [vmem:[#allocation2 + $0x90] sm:$0xff] %v3563_v62  ;;  %v3126_v23 = vadd.f32 1e-05, %v3062_v36  ;;  %v7145_v0 = vmul.f32 0.0078125, %v2836_v53  ;;  %v2834_v43 = vpop.xlane.xlu0 %2833  ;;  %v3223_v18 = vmul.f32 %v6932_v61, %v3185_v20  ;;  %v3094_v34 = vsub.f32 %v7303_v41, %v7125_v27  ;;  %v7304_v20 = vld [vmem:[#allocation7_spill] sm:$0xff] }
 0x68c   :  { %v3125_v30 = vadd.f32 1e-05, %v3061_v39  ;;  %v3262_v55 = vadd.f32 %v6942_v19, %v3224_v56  ;;  %v7151_v17 = vmul.f32 0.0078125, %v2834_v43  ;;  %v3093_v39 = vsub.f32 %v7304_v20, %v7131_v26 }
 0x68d   :  { %4692 = vrsqrt.f32 %v3126_v23  ;;  %v3261_v63 = vadd.f32 %v6942_v19, %v3223_v18  ;;  %v3032_v33 = vmul.f32 %v7145_v0, %v7145_v0 }
 0x68e   :  { %4694 = vrsqrt.f32 %v3125_v30  ;;  %v3534_v7 = vadd.f32 %v3460_v2, %v3262_v55  ;;  %v2964_v46 = vpop.xlane.xlu1 %2963  ;;  %v3031_v24 = vmul.f32 %v7151_v17, %v7151_v17 }
 0x68f   :  { %v4689_v15 = vpop.eup %4688  ;;  %v3533_v58 = vadd.f32 %v3455_v49, %v3261_v63  ;;  %v3000_v3 = vmul.f32 0.0078125, %v2964_v46  ;;  %v2962_v57 = vpop.xlane.xlu0 %2961 }
 0x690   :  { %v4691_v32 = vpop.eup %4690  ;;  %v3566_v47 = vmax.f32 %v3534_v7, 0.0  ;;  %v2999_v44 = vmul.f32 0.0078125, %v2962_v57  ;;  %v3188_v40 = vmul.f32 %v4689_v15, %v3092_v60  ;;  %v7305_v60 = vld [vmem:[#allocation19_spill] sm:$0xff] }
 0x691   :  { %v3565_v29 = vmax.f32 %v3533_v58, 0.0  ;;  %v3064_v12 = vsub.f32 %v3000_v3, %v3032_v33  ;;  %v3187_v10 = vmul.f32 %v4691_v32, %v3091_v51  ;;  %v3480_v7 = vadd.f32 %v7305_v60, %v6937_v6  ;;  %v7306_v33 = vld [vmem:[#allocation20_spill] sm:$0xff] }
 0x692   :  { %3598 = vst [vmem:[#allocation2 + $0xa8] sm:$0xff] %v3566_v47  ;;  %v3063_v22 = vsub.f32 %v2999_v44, %v3031_v24  ;;  %v2840_v28 = vpop.xlane.xlu1 %2839  ;;  %v3226_v9 = vmul.f32 %v6932_v61, %v3188_v40  ;;  %v3475_v58 = vadd.f32 %v6937_v6, %v7306_v33  ;;  %v7307_v24 = vld [vmem:[#allocation9_spill] sm:$0xff]  ;;  %v3500_v60 = vadd.f32 %v6958_v54, %v6937_v6 }
 0x693   :  { %3597 = vst [vmem:[#allocation2 + $0xa0] sm:$0xff] %v3565_v29  ;;  %v3128_v13 = vadd.f32 1e-05, %v3064_v12  ;;  %v7165_v42 = vmul.f32 0.0078125, %v2840_v28  ;;  %v2838_v11 = vpop.xlane.xlu0 %2837  ;;  %v3225_v50 = vmul.f32 %v6932_v61, %v3187_v10  ;;  %v3096_v44 = vsub.f32 %v7307_v24, %v7145_v0  ;;  %v7308_v10 = vld [vmem:[#allocation10_spill] sm:$0xff] }
 0x694   :  { %v3127_v16 = vadd.f32 1e-05, %v3063_v22  ;;  %v3264_v35 = vadd.f32 %v6942_v19, %v3226_v9  ;;  %v7171_v48 = vmul.f32 0.0078125, %v2838_v11  ;;  %v3095_v22 = vsub.f32 %v7308_v10, %v7151_v17  ;;  %v7309_v17 = vld [vmem:[#allocation21_spill] sm:$0xff] }
 0x695   :  { %4696 = vrsqrt.f32 %v3128_v13  ;;  %v3263_v21 = vadd.f32 %v6942_v19, %v3225_v50  ;;  %v3034_v53 = vmul.f32 %v7165_v42, %v7165_v42 }
 0x696   :  { %4698 = vrsqrt.f32 %v3127_v16  ;;  %v3536_v8 = vadd.f32 %v3470_v31, %v3264_v35  ;;  %v2968_v62 = vpop.xlane.xlu1 %2967  ;;  %v3033_v18 = vmul.f32 %v7171_v48, %v7171_v48 }
 0x697   :  { %v4693_v36 = vpop.eup %4692  ;;  %v3535_v56 = vadd.f32 %v3465_v37, %v3263_v21  ;;  %v3002_v1 = vmul.f32 0.0078125, %v2968_v62  ;;  %v2966_v2 = vpop.xlane.xlu0 %2965 }
 0x698   :  { %v4695_v23 = vpop.eup %4694  ;;  %v3568_v43 = vmax.f32 %v3536_v8, 0.0  ;;  %v3001_v38 = vmul.f32 0.0078125, %v2966_v2  ;;  %v3190_v27 = vmul.f32 %v4693_v36, %v3094_v34  ;;  %v3490_v34 = vadd.f32 %v7309_v17, %v6937_v6  ;;  %v7310_v36 = vld [vmem:[#allocation22_spill] sm:$0xff] }
 0x699   :  { %v3567_v49 = vmax.f32 %v3535_v56, 0.0  ;;  %v3066_v30 = vsub.f32 %v3002_v1, %v3034_v53  ;;  %v3189_v55 = vmul.f32 %v4695_v23, %v3093_v39  ;;  %v3485_v20 = vadd.f32 %v6937_v6, %v7310_v36  ;;  %v7311_v1 = vld [vmem:[#allocation11_spill] sm:$0xff] }
 0x69a   :  { %3600 = vst [vmem:[#allocation2 + $0xb8] sm:$0xff] %v3568_v43  ;;  %v3065_v63 = vsub.f32 %v3001_v38, %v3033_v18  ;;  %v2844_v25 = vpop.xlane.xlu1 %2843  ;;  %v3228_v26 = vmul.f32 %v6932_v61, %v3190_v27  ;;  %v3098_v2 = vsub.f32 %v7311_v1, %v7165_v42  ;;  %v7312_v18 = vld [vmem:[#allocation12_spill] sm:$0xff] }
 0x69b   :  { %3599 = vst [vmem:[#allocation2 + $0xb0] sm:$0xff] %v3567_v49  ;;  %v3130_v46 = vadd.f32 1e-05, %v3066_v30  ;;  %v7185_v15 = vmul.f32 0.0078125, %v2844_v25  ;;  %v2842_v5 = vpop.xlane.xlu0 %2841  ;;  %v3227_v51 = vmul.f32 %v6932_v61, %v3189_v55  ;;  %v3097_v38 = vsub.f32 %v7312_v18, %v7171_v48 }
 0x69c   :  { %v3129_v3 = vadd.f32 1e-05, %v3065_v63  ;;  %v3266_v57 = vadd.f32 %v6942_v19, %v3228_v26  ;;  %v2875_v32 = vmul.f32 0.0078125, %v2842_v5  ;;  %v7313_v5 = vld [vmem:[#allocation13_spill] sm:$0xff] }
 0x69d   :  { %4700 = vrsqrt.f32 %v3130_v46  ;;  %v3265_v47 = vadd.f32 %v6942_v19, %v3227_v51  ;;  %v3036_v28 = vmul.f32 %v7185_v15, %v7185_v15  ;;  %v3100_v51 = vsub.f32 %v7313_v5, %v7185_v15 }
 0x69e   :  { %4702 = vrsqrt.f32 %v3129_v3  ;;  %v3538_v40 = vadd.f32 %v3480_v7, %v3266_v57  ;;  %v2972_v29 = vpop.xlane.xlu1 %2971  ;;  %v3035_v50 = vmul.f32 %v2875_v32, %v2875_v32  ;;  %v3495_v7 = vadd.f32 %v6937_v6, %v6960_v59  ;;  %v7314_v3 = vld [vmem:[#allocation14_spill] sm:$0xff] }
 0x69f   :  { %v4697_v12 = vpop.eup %4696  ;;  %v3537_v9 = vadd.f32 %v3475_v58, %v3265_v47  ;;  %v3004_v14 = vmul.f32 0.0078125, %v2972_v29  ;;  %v2970_v31 = vpop.xlane.xlu0 %2969  ;;  %v3099_v57 = vsub.f32 %v7314_v3, %v2875_v32  ;;  %v3505_v15 = vadd.f32 %v6937_v6, %v6972_v45 }
 0x6a0   :  { %v4699_v13 = vpop.eup %4698  ;;  %v3570_v11 = vmax.f32 %v3538_v40, 0.0  ;;  %v3003_v52 = vmul.f32 0.0078125, %v2970_v31  ;;  %v3192_v37 = vmul.f32 %v4697_v12, %v3096_v44  ;;  %v3510_v12 = vadd.f32 %v6970_v4, %v6937_v6 }
 0x6a1   :  { %v3569_v16 = vmax.f32 %v3537_v9, 0.0  ;;  %v3068_v0 = vsub.f32 %v3004_v14, %v3036_v28  ;;  %v3191_v35 = vmul.f32 %v4699_v13, %v3095_v22 }
 0x6a2   :  { %3602 = vst [vmem:[#allocation2 + $0xc8] sm:$0xff] %v3570_v11  ;;  %v3067_v21 = vsub.f32 %v3003_v52, %v3035_v50  ;;  %v3230_v41 = vmul.f32 %v6932_v61, %v3192_v37 }
 0x6a3   :  { %3601 = vst [vmem:[#allocation2 + $0xc0] sm:$0xff] %v3569_v16  ;;  %v3132_v8 = vadd.f32 1e-05, %v3068_v0  ;;  %v3229_v62 = vmul.f32 %v6932_v61, %v3191_v35 }
 0x6a4   :  { %v3131_v39 = vadd.f32 1e-05, %v3067_v21  ;;  %v3268_v53 = vadd.f32 %v6942_v19, %v3230_v41 }
 0x6a5   :  { %4704 = vrsqrt.f32 %v3132_v8  ;;  %v3267_v56 = vadd.f32 %v6942_v19, %v3229_v62 }
 0x6a6   :  { %4706 = vrsqrt.f32 %v3131_v39  ;;  %v3540_v23 = vadd.f32 %v3490_v34, %v3268_v53 }
 0x6a7   :  { %v4701_v43 = vpop.eup %4700  ;;  %v3539_v27 = vadd.f32 %v3485_v20, %v3267_v56 }
 0x6a8   :  { %v4703_v49 = vpop.eup %4702  ;;  %v3572_v30 = vmax.f32 %v3540_v23, 0.0  ;;  %v3194_v55 = vmul.f32 %v4701_v43, %v3098_v2 }
 0x6a9   :  { %v3571_v63 = vmax.f32 %v3539_v27, 0.0  ;;  %v3193_v25 = vmul.f32 %v4703_v49, %v3097_v38 }
 0x6aa   :  { %3604 = vst [vmem:[#allocation2 + $0xd8] sm:$0xff] %v3572_v30  ;;  %v3232_v26 = vmul.f32 %v6932_v61, %v3194_v55 }
 0x6ab   :  { %3603 = vst [vmem:[#allocation2 + $0xd0] sm:$0xff] %v3571_v63  ;;  %v3231_v42 = vmul.f32 %v6932_v61, %v3193_v25 }
 0x6ac   :  { %v3270_v48 = vadd.f32 %v6942_v19, %v3232_v26 }
 0x6ad   :  { %v3269_v46 = vadd.f32 %v6942_v19, %v3231_v42 }
 0x6ae   :  { %v3542_v33 = vadd.f32 %v3500_v60, %v3270_v48 }
 0x6af   :  { %v4705_v58 = vpop.eup %4704  ;;  %v3541_v47 = vadd.f32 %v3495_v7, %v3269_v46 }
 0x6b0   :  { %v4707_v24 = vpop.eup %4706  ;;  %v3574_v54 = vmax.f32 %v3542_v33, 0.0  ;;  %v3196_v44 = vmul.f32 %v4705_v58, %v3100_v51 }
 0x6b1   :  { %v3573_v40 = vmax.f32 %v3541_v47, 0.0  ;;  %v3195_v29 = vmul.f32 %v4707_v24, %v3099_v57 }
 0x6b2   :  { %3606 = vst [vmem:[#allocation2 + $0xe8] sm:$0xff] %v3574_v54  ;;  %v3234_v59 = vmul.f32 %v6932_v61, %v3196_v44 }
 0x6b3   :  { %3605 = vst [vmem:[#allocation2 + $0xe0] sm:$0xff] %v3573_v40  ;;  %v3233_v10 = vmul.f32 %v6932_v61, %v3195_v29 }
 0x6b4   :  { %v3272_v32 = vadd.f32 %v6942_v19, %v3234_v59 }
 0x6b5   :  { %v3271_v22 = vadd.f32 %v6942_v19, %v3233_v10 }
 0x6b6   :  { %v3544_v28 = vadd.f32 %v3510_v12, %v3272_v32 }
 0x6b7   :  { %v3543_v9 = vadd.f32 %v3505_v15, %v3271_v22 }
 0x6b8   :  { %v3576_v14 = vmax.f32 %v3544_v28, 0.0 }
 0x6b9   :  { %v3575_v31 = vmax.f32 %v3543_v9, 0.0 }
 0x6ba   :  { %3608 = vst [vmem:[#allocation2 + $0xf8] sm:$0xff] %v3576_v14 }
 0x6bb   :  { %3607 = vst [vmem:[#allocation2 + $0xf0] sm:$0xff] %v3575_v31 }
 0x6bc   :  { %4751 = shalt.err (!%p4748_p4)
}
 0x6bd   :  { %s4752_s1 = scalar_lea.hbm %s7256_s15, 4096 }
 0x6be   :  { %p4753_p5 = scmp.ne.s32.totalorder %s7256_s15, %s4752_s1  ;;  %p4756_p6 = scmp.lt.u32.totalorder %s4752_s1, %s7256_s15 }
 0x6c0   :  { %p4758_p7 = pnand %p4756_p6, %p4753_p5 }
 0x6c2   :  { %4761 = shalt.err (!%p4758_p7)
}
 0x6c3   :  { %s4765_s13 = smov 128   ;;  %s4766_s28 = smov 8  }
 0x6c4   :  { %3620 = dma.vmem_to_hbm [thread:$0]  %s3615_s12, 4096, %s7256_s15, [#allocation3], %s4765_s13, %s4765_s13, %s4766_s28  }
 0x6c5   :  { %4762 = dma.done.wait [#allocation3], 4096  }
 0x6c6   :  { %4763 = vsyncadd [#allocation3], 4294963200 }
 0x6c7   :  { %3624 = vsyncpa [#allocation3], 1 }

</bundles_post_ra>
